<compile_context>
chip_gen: v7x
topology: tpu7x:2x2x1
jax: 0.10.0
libtpu: 0.0.40
codegen_flags: <defaults>
</compile_context>

<pallas_src>
import jax
import jax.numpy as jnp
from jax import lax
from jax.experimental import pallas as pl
from jax.experimental.pallas import tpu as pltpu


# ----------------------------------------------------------------------------
# Fused kernel: bi-LSTM + self-attention + label-attention + gating + output
# ----------------------------------------------------------------------------
def fused_kernel(emb_ref, h0_ref, c0_ref,
                 wih_t_ref, bg_ref, whhf_t_ref, whhb_t_ref,
                 label_ref, w1_t_ref, b1_ref, w2_t_ref, b2_ref,
                 ww1_ref, ww2_ref, wb_ref, wo_t_ref, bo_ref,
                 pred_ref,
                 xg_sc, out_sc):
    f32, bf16 = jnp.float32, jnp.bfloat16
    Bb, T, H2 = out_sc.shape
    H = H2 // 2
    G = 4 * H                                              # per-direction gate width
    C = label_ref.shape[0]

    # ---- input-gate precompute for BOTH directions: one bf16 MXU matmul ----
    emb = emb_ref[0]                                       # (T*Bb, E_pad) bf16, time-major
    xg_sc[...] = (jnp.dot(emb, wih_t_ref[...], preferred_element_type=f32)
                  + bg_ref[...])                           # (T*Bb, 8H) f32 in VMEM

    whhf_t = whhf_t_ref[...]                               # (H, 4H) bf16
    whhb_t = whhb_t_ref[...]                               # (H, 4H) bf16

    h0 = h0_ref[0]                                         # (2, Bb, H) bf16
    c0 = c0_ref[0]                                         # (2, Bb, H) f32
    h_f, h_b = h0[0], h0[1]
    c_f, c_b = c0[0], c0[1]

    # hoisted lane mask: the 'g' (cell-candidate) lanes use tanh = 2*sigmoid(2x)-1
    lane = lax.broadcasted_iota(jnp.int32, (Bb, G), 1)
    g_lanes = (lane >= 2 * H) & (lane < 3 * H)

    def lstm_step(h, c, whh_t, xg_slice):
        rec = jnp.dot(h, whh_t, preferred_element_type=f32)        # (Bb, 4H)
        gates = xg_slice + rec
        # single EUP pass over the whole gate tile (sigmoid only)
        s = jax.nn.sigmoid(jnp.where(g_lanes, 2.0 * gates, gates))
        act = jnp.where(g_lanes, 2.0 * s - 1.0, s)
        c_new = act[:, H:2 * H] * c + act[:, 0:H] * act[:, 2 * H:3 * H]   # f*c + i*g
        h_new = act[:, 3 * H:4 * H] * jnp.tanh(c_new)                     # o*tanh(c)
        return h_new, c_new

    # Statically-unrolled time loop (T is small here).  The forward and backward
    # chains are independent, so the scheduler interleaves their MXU/EUP latency.
    # TODO(synk): convert to lax.fori_loop with pl.ds slices once T grows.
    for t in range(T):
        tb = T - 1 - t
        hf_new, c_f = lstm_step(h_f, c_f, whhf_t,
                                xg_sc[t * Bb:(t + 1) * Bb, 0:G])
        hb_new, c_b = lstm_step(h_b, c_b, whhb_t,
                                xg_sc[tb * Bb:(tb + 1) * Bb, G:2 * G])
        out_sc[:, t, 0:H] = hf_new                          # fwd half, time t
        out_sc[:, tb, H:2 * H] = hb_new                     # bwd half, time T-1-t
        h_f = hf_new.astype(bf16)                           # bf16 carry for next MXU op
        h_b = hb_new.astype(bf16)

    # ---------------- attention / gating / output head --------------------------
    out3 = out_sc[...]                                      # (Bb, T, 2H) f32, lane-contig
    out3_bf = out3.astype(bf16)
    out2_bf = out3_bf.reshape(Bb * T, 2 * H)

    # linear_first + linear_second fused over all Bb*T rows
    sa = jnp.tanh(jnp.dot(out2_bf, w1_t_ref[...], preferred_element_type=f32)
                  + b1_ref[...])                            # (Bb*T, d_a)
    scores = (jnp.dot(sa.astype(bf16), w2_t_ref[...], preferred_element_type=f32)
              + b2_ref[...]).reshape(Bb, T, C)              # (Bb, T, C)
    scores = scores - jnp.max(scores, axis=1, keepdims=True)  # softmax over time
    e = jnp.exp(scores)
    att = e / jnp.sum(e, axis=1, keepdims=True)             # (Bb, T, C)

    # self-attention pooling over the full 2H lanes (one batched matmul)
    self_att = jnp.einsum('btc,btd->bcd', att.astype(bf16), out3_bf,
                          preferred_element_type=f32)       # (Bb, C, 2H)

    # label attention stays per-half (it only ever touches one half)
    label = label_ref[...]                                  # (C, H) bf16
    outf_bf = out3_bf[:, :, 0:H]
    outb_bf = out3_bf[:, :, H:2 * H]
    m1 = jnp.einsum('bth,ch->btc', outf_bf, label, preferred_element_type=f32)
    m2 = jnp.einsum('bth,ch->btc', outb_bf, label, preferred_element_type=f32)
    latt_f = jnp.einsum('btc,bth->bch', m1.astype(bf16), outf_bf,
                        preferred_element_type=f32)         # (Bb, C, H)
    latt_b = jnp.einsum('btc,bth->bch', m2.astype(bf16), outb_bf,
                        preferred_element_type=f32)         # (Bb, C, H)
    label_att = jnp.concatenate([latt_f, latt_b], axis=-1)  # (Bb, C, 2H)

    # adaptive fusion gates: two full-width (2H-lane) VPU multiply-reduces
    g1 = jax.nn.sigmoid(jnp.sum(label_att * ww1_ref[...], axis=-1, keepdims=True)
                        + wb_ref[0])                        # (Bb, C, 1)
    g2 = jax.nn.sigmoid(jnp.sum(self_att * ww2_ref[...], axis=-1, keepdims=True)
                        + wb_ref[1])
    g1n = g1 / (g1 + g2)
    doc = g1n * label_att + (1.0 - g1n) * self_att          # (Bb, C, 2H)
    avg = jnp.sum(doc, axis=1) * (1.0 / C)                  # (Bb, 2H)

    pred_ref[0] = (jnp.dot(avg.astype(bf16), wo_t_ref[...],
                           preferred_element_type=f32) + bo_ref[...])   # (Bb, C)


# ----------------------------------------------------------------------------
# pallas_call wrapper
# ----------------------------------------------------------------------------
def _pick_block_batch(B):
    # Fatten per-step work, but keep >= 2 grid steps whenever possible so both
    # v7x TensorCores stay busy (a length-1 grid idles half that chip).
    for bb in (8, 4, 2):
        if B % bb == 0 and B // bb >= 2:
            return bb
    return 1


def fused_forward(emb_tb, kp, Bb):
    nb, TB, e_pad = emb_tb.shape
    T = TB // Bb
    C, H = kp['label'].shape
    d_a = kp['w1_t'].shape[1]
    B = nb * Bb

    operands = (emb_tb, kp['h0'], kp['c0'],
                kp['wih_t'], kp['b_cat'], kp['whhf_t'], kp['whhb_t'],
                kp['label'], kp['w1_t'], kp['b1'], kp['w2_t'], kp['b2'],
                kp['ww1'], kp['ww2'], kp['wb'], kp['wo_t'], kp['bo'])

    def full2d(arr):
        return pl.BlockSpec(arr.shape, lambda b: (0, 0))

    in_specs = [
        pl.BlockSpec((1, TB, e_pad), lambda b: (b, 0, 0)),        # emb (bf16)
        pl.BlockSpec((1, 2, Bb, H), lambda b: (b, 0, 0, 0)),      # h0 (bf16)
        pl.BlockSpec((1, 2, Bb, H), lambda b: (b, 0, 0, 0)),      # c0 (f32)
        full2d(kp['wih_t']),                                      # (E_pad, 8H)
        full2d(kp['b_cat']),                                      # (1, 8H)
        full2d(kp['whhf_t']), full2d(kp['whhb_t']),               # (H, 4H) x2
        full2d(kp['label']),                                      # (C, H)
        full2d(kp['w1_t']), full2d(kp['b1']),                     # (2H, d_a), (1, d_a)
        full2d(kp['w2_t']), full2d(kp['b2']),                     # (d_a, C), (1, C)
        full2d(kp['ww1']), full2d(kp['ww2']),                     # (1, 2H) x2
        pl.BlockSpec(memory_space=pltpu.MemorySpace.SMEM),        # wb (2,) scalars
        full2d(kp['wo_t']), full2d(kp['bo']),                     # (2H, C), (1, C)
    ]

    flops = int(B * (
        2 * T * e_pad * 8 * H            # input-gate precompute (both directions)
        + 2 * T * 2 * H * 4 * H          # recurrent matmuls
        + 2 * T * 2 * H * d_a            # linear_first (fused halves)
        + 2 * T * d_a * C                # linear_second
        + 2 * T * C * 2 * H              # self-attention pooling
        + 2 * (2 * T * C * H) * 2        # label-attention scores + pooling
        + 2 * 2 * H * C))                # output layer
    transcendentals = int(B * (2 * T * 5 * H + T * d_a + T * C + 2 * C))
    bytes_accessed = int(sum(int(x.size) * x.dtype.itemsize for x in operands)
                         + B * C * 4)

    pred = pl.pallas_call(
        fused_kernel,
        out_shape=jax.ShapeDtypeStruct((nb, Bb, C), jnp.float32),
        grid_spec=pltpu.PrefetchScalarGridSpec(
            num_scalar_prefetch=0,
            grid=(nb,),
            in_specs=in_specs,
            out_specs=pl.BlockSpec((1, Bb, C), lambda b: (b, 0, 0)),
            scratch_shapes=[
                pltpu.VMEM((TB, 8 * H), jnp.float32),     # staged xg precompute
                pltpu.VMEM((Bb, T, 2 * H), jnp.float32),  # hidden states (head input)
            ]),
        compiler_params=pltpu.CompilerParams(
            dimension_semantics=("parallel",),            # both v7x TCs usable
            vmem_limit_bytes=32 * 1024 * 1024),
        cost_estimate=pl.CostEstimate(flops=flops,
                                      transcendentals=transcendentals,
                                      bytes_accessed=bytes_accessed),
    )(*operands)
    return pred.reshape(B, C)


# ----------------------------------------------------------------------------
# Wrapper glue: derive kernel-layout params from PyTorch-layout params
# ----------------------------------------------------------------------------
def prepare_params(p, Bb):
    E = p['embeddings'].shape[1]
    H = p['whh_f'].shape[1]
    e_pad = ((E + 127) // 128) * 128                      # 300 -> 384 (lane-aligned)
    pad = ((0, 0), (0, e_pad - E))
    bf16 = jnp.bfloat16

    kp = {}
    kp['emb_table'] = jnp.pad(p['embeddings'], pad).astype(bf16)
    kp['wih_t'] = jnp.pad(jnp.concatenate([p['wih_f'], p['wih_b']], axis=0),
                          pad).T.astype(bf16)             # (E_pad, 8H) bf16
    kp['b_cat'] = jnp.concatenate([p['b_f'], p['b_b']], axis=1)   # (1, 8H) f32
    kp['whhf_t'] = p['whh_f'].T.astype(bf16)              # (H, 4H)
    kp['whhb_t'] = p['whh_b'].T.astype(bf16)
    kp['label'] = p['label_embed'].astype(bf16)           # (C, H)
    kp['w1_t'] = p['w1'].T.astype(bf16)                   # (2H, d_a)
    kp['b1'] = p['b1']
    kp['w2_t'] = p['w2'].T.astype(bf16)                   # (d_a, C)
    kp['b2'] = p['b2']
    kp['ww1'], kp['ww2'] = p['ww1'], p['ww2']             # (1, 2H) f32 (VPU reduces)
    kp['wb'] = jnp.concatenate([p['wb1'][0], p['wb2'][0]])  # (2,) f32 -> SMEM
    kp['wo_t'] = p['wo'].T.astype(bf16)                   # (2H, C)
    kp['bo'] = p['bo']

    B = p['h0'].shape[0]
    nb = B // Bb
    kp['h0'] = (p['h0'].reshape(nb, Bb, 2, H).transpose(0, 2, 1, 3)
                .astype(bf16))                            # (nb, 2, Bb, H)
    kp['c0'] = p['c0'].reshape(nb, Bb, 2, H).transpose(0, 2, 1, 3)  # f32
    return kp


def structured_self_attention_forward(x_ids, p):
    B, T = x_ids.shape
    Bb = _pick_block_batch(B)
    nb = B // Bb
    kp = prepare_params(p, Bb)
    # TODO(synk): embedding dropout (p=0.3) omitted (eval-mode semantics).
    # TODO(synk): move the embedding gather in-kernel (scalar-prefetched ids +
    #             manual DMA) to skip the (B,T,E_pad) HBM round trip at large T.
    emb = kp['emb_table'][x_ids]                          # (B, T, E_pad) bf16
    e_pad = emb.shape[-1]
    # time-major row layout inside each block: row t*Bb + j = batch row j at time t
    emb_tb = (emb.reshape(nb, Bb, T, e_pad).transpose(0, 2, 1, 3)
              .reshape(nb, T * Bb, e_pad))
    return fused_forward(emb_tb, kp, Bb)                  # (B, n_classes)


# ----------------------------------------------------------------------------
# Pure-JAX reference (numerical sanity check, PyTorch-layout params, f32)
# ----------------------------------------------------------------------------
def reference_forward(x_ids, p):
    emb = p['embeddings'][x_ids]
    H = p['whh_f'].shape[1]

    def run_dir(wih, whh, b, h0, c0, xs):
        def step(carry, x_t):
            h, c = carry
            gates = x_t @ wih.T + h @ whh.T + b[0]
            i = jax.nn.sigmoid(gates[:, :H])
            f = jax.nn.sigmoid(gates[:, H:2 * H])
            g = jnp.tanh(gates[:, 2 * H:3 * H])
            o = jax.nn.sigmoid(gates[:, 3 * H:])
            c = f * c + i * g
            h = o * jnp.tanh(c)
            return (h, c), h
        _, hs = lax.scan(step, (h0, c0), jnp.swapaxes(xs, 0, 1))
        return jnp.swapaxes(hs, 0, 1)

    out_f = run_dir(p['wih_f'], p['whh_f'], p['b_f'],
                    p['h0'][:, 0], p['c0'][:, 0], emb)
    out_b = run_dir(p['wih_b'], p['whh_b'], p['b_b'],
                    p['h0'][:, 1], p['c0'][:, 1], emb[:, ::-1])[:, ::-1]
    outputs = jnp.concatenate([out_f, out_b], axis=-1)

    sa = jnp.tanh(jnp.einsum('btd,ad->bta', outputs, p['w1']) + p['b1'][0])
    sa = jnp.einsum('bta,ca->btc', sa, p['w2']) + p['b2'][0]
    sa = jax.nn.softmax(sa, axis=1)
    self_att = jnp.einsum('btc,btd->bcd', sa, outputs)
    h1, h2 = outputs[..., :H], outputs[..., H:]
    label = p['label_embed']
    m1 = jnp.einsum('ch,bth->bct', label, h1)
    m2 = jnp.einsum('ch,bth->bct', label, h2)
    label_att = jnp.concatenate([jnp.einsum('bct,bth->bch', m1, h1),
                                 jnp.einsum('bct,bth->bch', m2, h2)], axis=-1)
    g1 = jax.nn.sigmoid(jnp.einsum('bcd,od->bco', label_att, p['ww1']) + p['wb1'][0])
    g2 = jax.nn.sigmoid(jnp.einsum('bcd,od->bco', self_att, p['ww2']) + p['wb2'][0])
    g1n = g1 / (g1 + g2)
    doc = g1n * label_att + (1.0 - g1n) * self_att
    avg = jnp.sum(doc, axis=1) / label.shape[0]
    return avg @ p['wo'].T + p['bo'][0]


# ----------------------------------------------------------------------------
# Deterministic parameter init (PyTorch layout)
# ----------------------------------------------------------------------------
def init_params(key, vocab, E, H, d_a, C, B):
    ks = jax.random.split(key, 18)

    def lin(k, out_dim, in_dim):
        bound = 1.0 / jnp.sqrt(float(in_dim))
        kw, kb = jax.random.split(k)
        w = jax.random.uniform(kw, (out_dim, in_dim), jnp.float32, -bound, bound)
        b = jax.random.uniform(kb, (1, out_dim), jnp.float32, -bound, bound)
        return w, b

    bound = 1.0 / jnp.sqrt(float(H))

    def u(k, shape):
        return jax.random.uniform(k, shape, jnp.float32, -bound, bound)

    p = {}
    p['embeddings'] = 0.1 * jax.random.normal(ks[0], (vocab, E), jnp.float32)
    p['label_embed'] = 0.1 * jax.random.normal(ks[1], (C, H), jnp.float32)
    p['wih_f'], p['whh_f'] = u(ks[2], (4 * H, E)), u(ks[3], (4 * H, H))
    p['b_f'] = u(ks[4], (1, 4 * H)) + u(ks[5], (1, 4 * H))      # b_ih + b_hh
    p['wih_b'], p['whh_b'] = u(ks[6], (4 * H, E)), u(ks[7], (4 * H, H))
    p['b_b'] = u(ks[8], (1, 4 * H)) + u(ks[9], (1, 4 * H))
    p['w1'], p['b1'] = lin(ks[10], d_a, 2 * H)       # linear_first
    p['w2'], p['b2'] = lin(ks[11], C, d_a)           # linear_second
    p['ww1'], p['wb1'] = lin(ks[12], 1, 2 * H)       # weight1
    p['ww2'], p['wb2'] = lin(ks[13], 1, 2 * H)       # weight2
    p['wo'], p['bo'] = lin(ks[14], C, 2 * H)         # output_layer
    # deterministic stand-ins for init_hidden()'s torch.randn, layout (B, 2, H)
    p['h0'] = jax.random.normal(ks[15], (B, 2, H), jnp.float32)
    p['c0'] = jax.random.normal(ks[16], (B, 2, H), jnp.float32)
    return p


if __name__ == "__main__":
    B, T, vocab, E, H, d_a, C = 8, 8, 50, 300, 32, 64, 8
    key = jax.random.PRNGKey(0)
    k_param, k_ids = jax.random.split(key)
    params = init_params(k_param, vocab, E, H, d_a, C, B)
    x_ids = jax.random.randint(k_ids, (B, T), 0, vocab, dtype=jnp.int32)

    fwd = jax.jit(structured_self_attention_forward)
    pred = jax.block_until_ready(fwd(x_ids, params))
    ref = jax.block_until_ready(reference_forward(x_ids, params))

    assert pred.shape == (B, C)
    # Kernel uses bf16 MXU operands (incl. the recurrence, whose error compounds
    # over T) against an all-f32 reference; 2e-2 leaves margin for that while
    # still catching layout / gate-order / indexing bugs (which give O(0.1+) errors).
    assert jnp.allclose(pred, ref, rtol=2e-2, atol=2e-2), (pred, ref)

    print("KERNEL_OK")
</pallas_src>

<mosaic_0001>
module attributes {stable_mosaic.version = 11 : i64} {
  func.func @fused_kernel(%arg0: i32, %arg1: memref<1x32x384xbf16, #tpu.memory_space<vmem>>, %arg2: memref<1x2x4x32xbf16, #tpu.memory_space<vmem>>, %arg3: memref<1x2x4x32xf32, #tpu.memory_space<vmem>>, %arg4: memref<384x256xbf16, #tpu.memory_space<vmem>>, %arg5: memref<1x256xf32, #tpu.memory_space<vmem>>, %arg6: memref<32x128xbf16, #tpu.memory_space<vmem>>, %arg7: memref<32x128xbf16, #tpu.memory_space<vmem>>, %arg8: memref<8x32xbf16, #tpu.memory_space<vmem>>, %arg9: memref<64x64xbf16, #tpu.memory_space<vmem>>, %arg10: memref<1x64xf32, #tpu.memory_space<vmem>>, %arg11: memref<64x8xbf16, #tpu.memory_space<vmem>>, %arg12: memref<1x8xf32, #tpu.memory_space<vmem>>, %arg13: memref<1x64xf32, #tpu.memory_space<vmem>>, %arg14: memref<1x64xf32, #tpu.memory_space<vmem>>, %arg15: memref<2xf32, #tpu.memory_space<smem>>, %arg16: memref<64x8xbf16, #tpu.memory_space<vmem>>, %arg17: memref<1x8xf32, #tpu.memory_space<vmem>>, %arg18: memref<1x4x8xf32, #tpu.memory_space<vmem>>, %arg19: memref<32x256xf32, #tpu.memory_space<vmem>>, %arg20: memref<4x8x64xf32, #tpu.memory_space<vmem>>) attributes {dimension_semantics = [#tpu.dimension_semantics<parallel>], iteration_bounds = array<i64: 2>, scalar_prefetch = 0 : i64, scratch_operands = 2 : i64, tpu.core_type = #tpu.core_type<tc>, window_params = [{transform_indices = @transform_0, window_bounds = array<i64: 1, 32, 384>}, {transform_indices = @transform_1, window_bounds = array<i64: 1, 2, 4, 32>}, {transform_indices = @transform_2, window_bounds = array<i64: 1, 2, 4, 32>}, {pipeline_mode = #tpu.pipeline_mode<synchronous>, transform_indices = @transform_3, window_bounds = array<i64: 384, 256>}, {pipeline_mode = #tpu.pipeline_mode<synchronous>, transform_indices = @transform_4, window_bounds = array<i64: 1, 256>}, {pipeline_mode = #tpu.pipeline_mode<synchronous>, transform_indices = @transform_5, window_bounds = array<i64: 32, 128>}, {pipeline_mode = #tpu.pipeline_mode<synchronous>, transform_indices = @transform_6, window_bounds = array<i64: 32, 128>}, {pipeline_mode = #tpu.pipeline_mode<synchronous>, transform_indices = @transform_7, window_bounds = array<i64: 8, 32>}, {pipeline_mode = #tpu.pipeline_mode<synchronous>, transform_indices = @transform_8, window_bounds = array<i64: 64, 64>}, {pipeline_mode = #tpu.pipeline_mode<synchronous>, transform_indices = @transform_9, window_bounds = array<i64: 1, 64>}, {pipeline_mode = #tpu.pipeline_mode<synchronous>, transform_indices = @transform_10, window_bounds = array<i64: 64, 8>}, {pipeline_mode = #tpu.pipeline_mode<synchronous>, transform_indices = @transform_11, window_bounds = array<i64: 1, 8>}, {pipeline_mode = #tpu.pipeline_mode<synchronous>, transform_indices = @transform_12, window_bounds = array<i64: 1, 64>}, {pipeline_mode = #tpu.pipeline_mode<synchronous>, transform_indices = @transform_13, window_bounds = array<i64: 1, 64>}, {transform_indices = @transform_14, window_bounds = array<i64: 2>}, {pipeline_mode = #tpu.pipeline_mode<synchronous>, transform_indices = @transform_15, window_bounds = array<i64: 64, 8>}, {pipeline_mode = #tpu.pipeline_mode<synchronous>, transform_indices = @transform_16, window_bounds = array<i64: 1, 8>}, {transform_indices = @transform_17, window_bounds = array<i64: 1, 4, 8>}]} {
    %c0 = arith.constant 0 : index
    %c0_0 = arith.constant 0 : index
    %c0_1 = arith.constant 0 : index
    %0 = vector.load %arg1[%c0, %c0_0, %c0_1] : memref<1x32x384xbf16, #tpu.memory_space<vmem>>, vector<1x32x384xbf16>
    %1 = vector.shape_cast %0 : vector<1x32x384xbf16> to vector<32x384xbf16>
    %c0_2 = arith.constant 0 : index
    %c0_3 = arith.constant 0 : index
    %2 = vector.load %arg4[%c0_2, %c0_3] : memref<384x256xbf16, #tpu.memory_space<vmem>>, vector<384x256xbf16>
    %cst = arith.constant dense<0.000000e+00> : vector<32x256xf32>
    %3 = tpu.matmul %1, %2, %cst {dimension_numbers = #tpu.dot_dimension_numbers<[1], [0], [0], [1], [0, 0, 1, 1], [], []>} : vector<32x384xbf16>, vector<384x256xbf16>, vector<32x256xf32> -> vector<32x256xf32>
    %c0_4 = arith.constant 0 : index
    %c0_5 = arith.constant 0 : index
    %4 = vector.load %arg5[%c0_4, %c0_5] : memref<1x256xf32, #tpu.memory_space<vmem>>, vector<1x256xf32>
    %5 = vector.broadcast %4 : vector<1x256xf32> to vector<32x256xf32>
    %6 = arith.addf %3, %5 : vector<32x256xf32>
    %c0_6 = arith.constant 0 : index
    %c0_7 = arith.constant 0 : index
    %7 = vector.load %arg19[%c0_6, %c0_7] : memref<32x256xf32, #tpu.memory_space<vmem>>, vector<32x256xf32>
    tpu.vector_store %arg19[%c0_6, %c0_7], %6 {strides = array<i32>} : memref<32x256xf32, #tpu.memory_space<vmem>>, vector<32x256xf32>,
    %c0_8 = arith.constant 0 : index
    %c0_9 = arith.constant 0 : index
    %8 = vector.load %arg6[%c0_8, %c0_9] : memref<32x128xbf16, #tpu.memory_space<vmem>>, vector<32x128xbf16>
    %c0_10 = arith.constant 0 : index
    %c0_11 = arith.constant 0 : index
    %9 = vector.load %arg7[%c0_10, %c0_11] : memref<32x128xbf16, #tpu.memory_space<vmem>>, vector<32x128xbf16>
    %c0_12 = arith.constant 0 : index
    %c0_13 = arith.constant 0 : index
    %c0_14 = arith.constant 0 : index
    %c0_15 = arith.constant 0 : index
    %10 = vector.load %arg2[%c0_12, %c0_13, %c0_14, %c0_15] : memref<1x2x4x32xbf16, #tpu.memory_space<vmem>>, vector<1x2x4x32xbf16>
    %11 = vector.shape_cast %10 : vector<1x2x4x32xbf16> to vector<2x4x32xbf16>
    %c0_16 = arith.constant 0 : index
    %c0_17 = arith.constant 0 : index
    %c0_18 = arith.constant 0 : index
    %c0_19 = arith.constant 0 : index
    %12 = vector.load %arg3[%c0_16, %c0_17, %c0_18, %c0_19] : memref<1x2x4x32xf32, #tpu.memory_space<vmem>>, vector<1x2x4x32xf32>
    %13 = vector.shape_cast %12 : vector<1x2x4x32xf32> to vector<2x4x32xf32>
    %14 = vector.extract_strided_slice %11 {offsets = [0, 0, 0], sizes = [1, 4, 32], strides = [1, 1, 1]} : vector<2x4x32xbf16> to vector<1x4x32xbf16>
    %15 = vector.shape_cast %14 : vector<1x4x32xbf16> to vector<4x32xbf16>
    %16 = vector.extract_strided_slice %11 {offsets = [1, 0, 0], sizes = [1, 4, 32], strides = [1, 1, 1]} : vector<2x4x32xbf16> to vector<1x4x32xbf16>
    %17 = vector.shape_cast %16 : vector<1x4x32xbf16> to vector<4x32xbf16>
    %18 = vector.extract_strided_slice %13 {offsets = [0, 0, 0], sizes = [1, 4, 32], strides = [1, 1, 1]} : vector<2x4x32xf32> to vector<1x4x32xf32>
    %19 = vector.shape_cast %18 : vector<1x4x32xf32> to vector<4x32xf32>
    %20 = vector.extract_strided_slice %13 {offsets = [1, 0, 0], sizes = [1, 4, 32], strides = [1, 1, 1]} : vector<2x4x32xf32> to vector<1x4x32xf32>
    %21 = vector.shape_cast %20 : vector<1x4x32xf32> to vector<4x32xf32>
    %22 = tpu.iota {dimensions = array<i32: 1>} : vector<4x128xi32>
    %c64_i32 = arith.constant 64 : i32
    %23 = vector.broadcast %c64_i32 : i32 to vector<4x128xi32>
    %24 = arith.cmpi sge, %22, %23 : vector<4x128xi32>
    %c96_i32 = arith.constant 96 : i32
    %25 = vector.broadcast %c96_i32 : i32 to vector<4x128xi32>
    %26 = arith.cmpi slt, %22, %25 : vector<4x128xi32>
    %27 = arith.andi %24, %26 : vector<4x128xi1>
    %c0_20 = arith.constant 0 : index
    %c0_21 = arith.constant 0 : index
    %28 = vector.load %arg19[%c0_20, %c0_21] : memref<32x256xf32, #tpu.memory_space<vmem>>, vector<4x128xf32>
    %cst_22 = arith.constant dense<0.000000e+00> : vector<4x128xf32>
    %29 = tpu.matmul %15, %8, %cst_22 {dimension_numbers = #tpu.dot_dimension_numbers<[1], [0], [0], [1], [0, 0, 1, 1], [], []>} : vector<4x32xbf16>, vector<32x128xbf16>, vector<4x128xf32> -> vector<4x128xf32>
    %30 = arith.addf %28, %29 : vector<4x128xf32>
    %cst_23 = arith.constant 2.000000e+00 : f32
    %31 = vector.broadcast %cst_23 : f32 to vector<4x128xf32>
    %32 = arith.mulf %31, %30 : vector<4x128xf32>
    %33 = arith.select %27, %32, %30 : vector<4x128xi1>, vector<4x128xf32>
    %34 = arith.negf %33 : vector<4x128xf32>
    %35 = math.exp %34 : vector<4x128xf32>
    %cst_24 = arith.constant 1.000000e+00 : f32
    %36 = vector.broadcast %cst_24 : f32 to vector<4x128xf32>
    %37 = arith.addf %36, %35 : vector<4x128xf32>
    %38 = arith.divf %36, %37 : vector<4x128xf32>
    %cst_25 = arith.constant 2.000000e+00 : f32
    %39 = vector.broadcast %cst_25 : f32 to vector<4x128xf32>
    %40 = arith.mulf %39, %38 : vector<4x128xf32>
    %cst_26 = arith.constant 1.000000e+00 : f32
    %41 = vector.broadcast %cst_26 : f32 to vector<4x128xf32>
    %42 = arith.subf %40, %41 : vector<4x128xf32>
    %43 = arith.select %27, %42, %38 : vector<4x128xi1>, vector<4x128xf32>
    %44 = vector.extract_strided_slice %43 {offsets = [0, 32], sizes = [4, 32], strides = [1, 1]} : vector<4x128xf32> to vector<4x32xf32>
    %45 = arith.mulf %44, %19 : vector<4x32xf32>
    %46 = vector.extract_strided_slice %43 {offsets = [0, 0], sizes = [4, 32], strides = [1, 1]} : vector<4x128xf32> to vector<4x32xf32>
    %47 = vector.extract_strided_slice %43 {offsets = [0, 64], sizes = [4, 32], strides = [1, 1]} : vector<4x128xf32> to vector<4x32xf32>
    %48 = arith.mulf %46, %47 : vector<4x32xf32>
    %49 = arith.addf %45, %48 : vector<4x32xf32>
    %50 = vector.extract_strided_slice %43 {offsets = [0, 96], sizes = [4, 32], strides = [1, 1]} : vector<4x128xf32> to vector<4x32xf32>
    %51 = math.tanh %49 : vector<4x32xf32>
    %52 = arith.mulf %50, %51 : vector<4x32xf32>
    %c28 = arith.constant 28 : index
    %c128 = arith.constant 128 : index
    %53 = vector.load %arg19[%c28, %c128] : memref<32x256xf32, #tpu.memory_space<vmem>>, vector<4x128xf32>
    %cst_27 = arith.constant dense<0.000000e+00> : vector<4x128xf32>
    %54 = tpu.matmul %17, %9, %cst_27 {dimension_numbers = #tpu.dot_dimension_numbers<[1], [0], [0], [1], [0, 0, 1, 1], [], []>} : vector<4x32xbf16>, vector<32x128xbf16>, vector<4x128xf32> -> vector<4x128xf32>
    %55 = arith.addf %53, %54 : vector<4x128xf32>
    %cst_28 = arith.constant 2.000000e+00 : f32
    %56 = vector.broadcast %cst_28 : f32 to vector<4x128xf32>
    %57 = arith.mulf %56, %55 : vector<4x128xf32>
    %58 = arith.select %27, %57, %55 : vector<4x128xi1>, vector<4x128xf32>
    %59 = arith.negf %58 : vector<4x128xf32>
    %60 = math.exp %59 : vector<4x128xf32>
    %cst_29 = arith.constant 1.000000e+00 : f32
    %61 = vector.broadcast %cst_29 : f32 to vector<4x128xf32>
    %62 = arith.addf %61, %60 : vector<4x128xf32>
    %63 = arith.divf %61, %62 : vector<4x128xf32>
    %cst_30 = arith.constant 2.000000e+00 : f32
    %64 = vector.broadcast %cst_30 : f32 to vector<4x128xf32>
    %65 = arith.mulf %64, %63 : vector<4x128xf32>
    %cst_31 = arith.constant 1.000000e+00 : f32
    %66 = vector.broadcast %cst_31 : f32 to vector<4x128xf32>
    %67 = arith.subf %65, %66 : vector<4x128xf32>
    %68 = arith.select %27, %67, %63 : vector<4x128xi1>, vector<4x128xf32>
    %69 = vector.extract_strided_slice %68 {offsets = [0, 32], sizes = [4, 32], strides = [1, 1]} : vector<4x128xf32> to vector<4x32xf32>
    %70 = arith.mulf %69, %21 : vector<4x32xf32>
    %71 = vector.extract_strided_slice %68 {offsets = [0, 0], sizes = [4, 32], strides = [1, 1]} : vector<4x128xf32> to vector<4x32xf32>
    %72 = vector.extract_strided_slice %68 {offsets = [0, 64], sizes = [4, 32], strides = [1, 1]} : vector<4x128xf32> to vector<4x32xf32>
    %73 = arith.mulf %71, %72 : vector<4x32xf32>
    %74 = arith.addf %70, %73 : vector<4x32xf32>
    %75 = vector.extract_strided_slice %68 {offsets = [0, 96], sizes = [4, 32], strides = [1, 1]} : vector<4x128xf32> to vector<4x32xf32>
    %76 = math.tanh %74 : vector<4x32xf32>
    %77 = arith.mulf %75, %76 : vector<4x32xf32>
    %c0_32 = arith.constant 0 : index
    %c0_33 = arith.constant 0 : index
    %c0_34 = arith.constant 0 : index
    %78 = vector.load %arg20[%c0_32, %c0_33, %c0_34] : memref<4x8x64xf32, #tpu.memory_space<vmem>>, vector<4x1x32xf32>
    %79 = vector.shape_cast %78 : vector<4x1x32xf32> to vector<4x32xf32>
    %80 = vector.shape_cast %52 : vector<4x32xf32> to vector<4x1x32xf32>
    tpu.vector_store %arg20[%c0_32, %c0_33, %c0_34], %80 {strides = array<i32>} : memref<4x8x64xf32, #tpu.memory_space<vmem>>, vector<4x1x32xf32>,
    %c0_35 = arith.constant 0 : index
    %c7 = arith.constant 7 : index
    %c32 = arith.constant 32 : index
    %81 = vector.load %arg20[%c0_35, %c7, %c32] : memref<4x8x64xf32, #tpu.memory_space<vmem>>, vector<4x1x32xf32>
    %82 = vector.shape_cast %81 : vector<4x1x32xf32> to vector<4x32xf32>
    %83 = vector.shape_cast %77 : vector<4x32xf32> to vector<4x1x32xf32>
    tpu.vector_store %arg20[%c0_35, %c7, %c32], %83 {strides = array<i32>} : memref<4x8x64xf32, #tpu.memory_space<vmem>>, vector<4x1x32xf32>,
    %84 = arith.truncf %52 : vector<4x32xf32> to vector<4x32xbf16>
    %85 = arith.truncf %77 : vector<4x32xf32> to vector<4x32xbf16>
    %c4 = arith.constant 4 : index
    %c0_36 = arith.constant 0 : index
    %86 = vector.load %arg19[%c4, %c0_36] : memref<32x256xf32, #tpu.memory_space<vmem>>, vector<4x128xf32>
    %cst_37 = arith.constant dense<0.000000e+00> : vector<4x128xf32>
    %87 = tpu.matmul %84, %8, %cst_37 {dimension_numbers = #tpu.dot_dimension_numbers<[1], [0], [0], [1], [0, 0, 1, 1], [], []>} : vector<4x32xbf16>, vector<32x128xbf16>, vector<4x128xf32> -> vector<4x128xf32>
    %88 = arith.addf %86, %87 : vector<4x128xf32>
    %cst_38 = arith.constant 2.000000e+00 : f32
    %89 = vector.broadcast %cst_38 : f32 to vector<4x128xf32>
    %90 = arith.mulf %89, %88 : vector<4x128xf32>
    %91 = arith.select %27, %90, %88 : vector<4x128xi1>, vector<4x128xf32>
    %92 = arith.negf %91 : vector<4x128xf32>
    %93 = math.exp %92 : vector<4x128xf32>
    %cst_39 = arith.constant 1.000000e+00 : f32
    %94 = vector.broadcast %cst_39 : f32 to vector<4x128xf32>
    %95 = arith.addf %94, %93 : vector<4x128xf32>
    %96 = arith.divf %94, %95 : vector<4x128xf32>
    %cst_40 = arith.constant 2.000000e+00 : f32
    %97 = vector.broadcast %cst_40 : f32 to vector<4x128xf32>
    %98 = arith.mulf %97, %96 : vector<4x128xf32>
    %cst_41 = arith.constant 1.000000e+00 : f32
    %99 = vector.broadcast %cst_41 : f32 to vector<4x128xf32>
    %100 = arith.subf %98, %99 : vector<4x128xf32>
    %101 = arith.select %27, %100, %96 : vector<4x128xi1>, vector<4x128xf32>
    %102 = vector.extract_strided_slice %101 {offsets = [0, 32], sizes = [4, 32], strides = [1, 1]} : vector<4x128xf32> to vector<4x32xf32>
    %103 = arith.mulf %102, %49 : vector<4x32xf32>
    %104 = vector.extract_strided_slice %101 {offsets = [0, 0], sizes = [4, 32], strides = [1, 1]} : vector<4x128xf32> to vector<4x32xf32>
    %105 = vector.extract_strided_slice %101 {offsets = [0, 64], sizes = [4, 32], strides = [1, 1]} : vector<4x128xf32> to vector<4x32xf32>
    %106 = arith.mulf %104, %105 : vector<4x32xf32>
    %107 = arith.addf %103, %106 : vector<4x32xf32>
    %108 = vector.extract_strided_slice %101 {offsets = [0, 96], sizes = [4, 32], strides = [1, 1]} : vector<4x128xf32> to vector<4x32xf32>
    %109 = math.tanh %107 : vector<4x32xf32>
    %110 = arith.mulf %108, %109 : vector<4x32xf32>
    %c24 = arith.constant 24 : index
    %c128_42 = arith.constant 128 : index
    %111 = vector.load %arg19[%c24, %c128_42] : memref<32x256xf32, #tpu.memory_space<vmem>>, vector<4x128xf32>
    %cst_43 = arith.constant dense<0.000000e+00> : vector<4x128xf32>
    %112 = tpu.matmul %85, %9, %cst_43 {dimension_numbers = #tpu.dot_dimension_numbers<[1], [0], [0], [1], [0, 0, 1, 1], [], []>} : vector<4x32xbf16>, vector<32x128xbf16>, vector<4x128xf32> -> vector<4x128xf32>
    %113 = arith.addf %111, %112 : vector<4x128xf32>
    %cst_44 = arith.constant 2.000000e+00 : f32
    %114 = vector.broadcast %cst_44 : f32 to vector<4x128xf32>
    %115 = arith.mulf %114, %113 : vector<4x128xf32>
    %116 = arith.select %27, %115, %113 : vector<4x128xi1>, vector<4x128xf32>
    %117 = arith.negf %116 : vector<4x128xf32>
    %118 = math.exp %117 : vector<4x128xf32>
    %cst_45 = arith.constant 1.000000e+00 : f32
    %119 = vector.broadcast %cst_45 : f32 to vector<4x128xf32>
    %120 = arith.addf %119, %118 : vector<4x128xf32>
    %121 = arith.divf %119, %120 : vector<4x128xf32>
    %cst_46 = arith.constant 2.000000e+00 : f32
    %122 = vector.broadcast %cst_46 : f32 to vector<4x128xf32>
    %123 = arith.mulf %122, %121 : vector<4x128xf32>
    %cst_47 = arith.constant 1.000000e+00 : f32
    %124 = vector.broadcast %cst_47 : f32 to vector<4x128xf32>
    %125 = arith.subf %123, %124 : vector<4x128xf32>
    %126 = arith.select %27, %125, %121 : vector<4x128xi1>, vector<4x128xf32>
    %127 = vector.extract_strided_slice %126 {offsets = [0, 32], sizes = [4, 32], strides = [1, 1]} : vector<4x128xf32> to vector<4x32xf32>
    %128 = arith.mulf %127, %74 : vector<4x32xf32>
    %129 = vector.extract_strided_slice %126 {offsets = [0, 0], sizes = [4, 32], strides = [1, 1]} : vector<4x128xf32> to vector<4x32xf32>
    %130 = vector.extract_strided_slice %126 {offsets = [0, 64], sizes = [4, 32], strides = [1, 1]} : vector<4x128xf32> to vector<4x32xf32>
    %131 = arith.mulf %129, %130 : vector<4x32xf32>
    %132 = arith.addf %128, %131 : vector<4x32xf32>
    %133 = vector.extract_strided_slice %126 {offsets = [0, 96], sizes = [4, 32], strides = [1, 1]} : vector<4x128xf32> to vector<4x32xf32>
    %134 = math.tanh %132 : vector<4x32xf32>
    %135 = arith.mulf %133, %134 : vector<4x32xf32>
    %c0_48 = arith.constant 0 : index
    %c1 = arith.constant 1 : index
    %c0_49 = arith.constant 0 : index
    %136 = vector.load %arg20[%c0_48, %c1, %c0_49] : memref<4x8x64xf32, #tpu.memory_space<vmem>>, vector<4x1x32xf32>
    %137 = vector.shape_cast %136 : vector<4x1x32xf32> to vector<4x32xf32>
    %138 = vector.shape_cast %110 : vector<4x32xf32> to vector<4x1x32xf32>
    tpu.vector_store %arg20[%c0_48, %c1, %c0_49], %138 {strides = array<i32>} : memref<4x8x64xf32, #tpu.memory_space<vmem>>, vector<4x1x32xf32>,
    %c0_50 = arith.constant 0 : index
    %c6 = arith.constant 6 : index
    %c32_51 = arith.constant 32 : index
    %139 = vector.load %arg20[%c0_50, %c6, %c32_51] : memref<4x8x64xf32, #tpu.memory_space<vmem>>, vector<4x1x32xf32>
    %140 = vector.shape_cast %139 : vector<4x1x32xf32> to vector<4x32xf32>
    %141 = vector.shape_cast %135 : vector<4x32xf32> to vector<4x1x32xf32>
    tpu.vector_store %arg20[%c0_50, %c6, %c32_51], %141 {strides = array<i32>} : memref<4x8x64xf32, #tpu.memory_space<vmem>>, vector<4x1x32xf32>,
    %142 = arith.truncf %110 : vector<4x32xf32> to vector<4x32xbf16>
    %143 = arith.truncf %135 : vector<4x32xf32> to vector<4x32xbf16>
    %c8 = arith.constant 8 : index
    %c0_52 = arith.constant 0 : index
    %144 = vector.load %arg19[%c8, %c0_52] : memref<32x256xf32, #tpu.memory_space<vmem>>, vector<4x128xf32>
    %cst_53 = arith.constant dense<0.000000e+00> : vector<4x128xf32>
    %145 = tpu.matmul %142, %8, %cst_53 {dimension_numbers = #tpu.dot_dimension_numbers<[1], [0], [0], [1], [0, 0, 1, 1], [], []>} : vector<4x32xbf16>, vector<32x128xbf16>, vector<4x128xf32> -> vector<4x128xf32>
    %146 = arith.addf %144, %145 : vector<4x128xf32>
    %cst_54 = arith.constant 2.000000e+00 : f32
    %147 = vector.broadcast %cst_54 : f32 to vector<4x128xf32>
    %148 = arith.mulf %147, %146 : vector<4x128xf32>
    %149 = arith.select %27, %148, %146 : vector<4x128xi1>, vector<4x128xf32>
    %150 = arith.negf %149 : vector<4x128xf32>
    %151 = math.exp %150 : vector<4x128xf32>
    %cst_55 = arith.constant 1.000000e+00 : f32
    %152 = vector.broadcast %cst_55 : f32 to vector<4x128xf32>
    %153 = arith.addf %152, %151 : vector<4x128xf32>
    %154 = arith.divf %152, %153 : vector<4x128xf32>
    %cst_56 = arith.constant 2.000000e+00 : f32
    %155 = vector.broadcast %cst_56 : f32 to vector<4x128xf32>
    %156 = arith.mulf %155, %154 : vector<4x128xf32>
    %cst_57 = arith.constant 1.000000e+00 : f32
    %157 = vector.broadcast %cst_57 : f32 to vector<4x128xf32>
    %158 = arith.subf %156, %157 : vector<4x128xf32>
    %159 = arith.select %27, %158, %154 : vector<4x128xi1>, vector<4x128xf32>
    %160 = vector.extract_strided_slice %159 {offsets = [0, 32], sizes = [4, 32], strides = [1, 1]} : vector<4x128xf32> to vector<4x32xf32>
    %161 = arith.mulf %160, %107 : vector<4x32xf32>
    %162 = vector.extract_strided_slice %159 {offsets = [0, 0], sizes = [4, 32], strides = [1, 1]} : vector<4x128xf32> to vector<4x32xf32>
    %163 = vector.extract_strided_slice %159 {offsets = [0, 64], sizes = [4, 32], strides = [1, 1]} : vector<4x128xf32> to vector<4x32xf32>
    %164 = arith.mulf %162, %163 : vector<4x32xf32>
    %165 = arith.addf %161, %164 : vector<4x32xf32>
    %166 = vector.extract_strided_slice %159 {offsets = [0, 96], sizes = [4, 32], strides = [1, 1]} : vector<4x128xf32> to vector<4x32xf32>
    %167 = math.tanh %165 : vector<4x32xf32>
    %168 = arith.mulf %166, %167 : vector<4x32xf32>
    %c20 = arith.constant 20 : index
    %c128_58 = arith.constant 128 : index
    %169 = vector.load %arg19[%c20, %c128_58] : memref<32x256xf32, #tpu.memory_space<vmem>>, vector<4x128xf32>
    %cst_59 = arith.constant dense<0.000000e+00> : vector<4x128xf32>
    %170 = tpu.matmul %143, %9, %cst_59 {dimension_numbers = #tpu.dot_dimension_numbers<[1], [0], [0], [1], [0, 0, 1, 1], [], []>} : vector<4x32xbf16>, vector<32x128xbf16>, vector<4x128xf32> -> vector<4x128xf32>
    %171 = arith.addf %169, %170 : vector<4x128xf32>
    %cst_60 = arith.constant 2.000000e+00 : f32
    %172 = vector.broadcast %cst_60 : f32 to vector<4x128xf32>
    %173 = arith.mulf %172, %171 : vector<4x128xf32>
    %174 = arith.select %27, %173, %171 : vector<4x128xi1>, vector<4x128xf32>
    %175 = arith.negf %174 : vector<4x128xf32>
    %176 = math.exp %175 : vector<4x128xf32>
    %cst_61 = arith.constant 1.000000e+00 : f32
    %177 = vector.broadcast %cst_61 : f32 to vector<4x128xf32>
    %178 = arith.addf %177, %176 : vector<4x128xf32>
    %179 = arith.divf %177, %178 : vector<4x128xf32>
    %cst_62 = arith.constant 2.000000e+00 : f32
    %180 = vector.broadcast %cst_62 : f32 to vector<4x128xf32>
    %181 = arith.mulf %180, %179 : vector<4x128xf32>
    %cst_63 = arith.constant 1.000000e+00 : f32
    %182 = vector.broadcast %cst_63 : f32 to vector<4x128xf32>
    %183 = arith.subf %181, %182 : vector<4x128xf32>
    %184 = arith.select %27, %183, %179 : vector<4x128xi1>, vector<4x128xf32>
    %185 = vector.extract_strided_slice %184 {offsets = [0, 32], sizes = [4, 32], strides = [1, 1]} : vector<4x128xf32> to vector<4x32xf32>
    %186 = arith.mulf %185, %132 : vector<4x32xf32>
    %187 = vector.extract_strided_slice %184 {offsets = [0, 0], sizes = [4, 32], strides = [1, 1]} : vector<4x128xf32> to vector<4x32xf32>
    %188 = vector.extract_strided_slice %184 {offsets = [0, 64], sizes = [4, 32], strides = [1, 1]} : vector<4x128xf32> to vector<4x32xf32>
    %189 = arith.mulf %187, %188 : vector<4x32xf32>
    %190 = arith.addf %186, %189 : vector<4x32xf32>
    %191 = vector.extract_strided_slice %184 {offsets = [0, 96], sizes = [4, 32], strides = [1, 1]} : vector<4x128xf32> to vector<4x32xf32>
    %192 = math.tanh %190 : vector<4x32xf32>
    %193 = arith.mulf %191, %192 : vector<4x32xf32>
    %c0_64 = arith.constant 0 : index
    %c2 = arith.constant 2 : index
    %c0_65 = arith.constant 0 : index
    %194 = vector.load %arg20[%c0_64, %c2, %c0_65] : memref<4x8x64xf32, #tpu.memory_space<vmem>>, vector<4x1x32xf32>
    %195 = vector.shape_cast %194 : vector<4x1x32xf32> to vector<4x32xf32>
    %196 = vector.shape_cast %168 : vector<4x32xf32> to vector<4x1x32xf32>
    tpu.vector_store %arg20[%c0_64, %c2, %c0_65], %196 {strides = array<i32>} : memref<4x8x64xf32, #tpu.memory_space<vmem>>, vector<4x1x32xf32>,
    %c0_66 = arith.constant 0 : index
    %c5 = arith.constant 5 : index
    %c32_67 = arith.constant 32 : index
    %197 = vector.load %arg20[%c0_66, %c5, %c32_67] : memref<4x8x64xf32, #tpu.memory_space<vmem>>, vector<4x1x32xf32>
    %198 = vector.shape_cast %197 : vector<4x1x32xf32> to vector<4x32xf32>
    %199 = vector.shape_cast %193 : vector<4x32xf32> to vector<4x1x32xf32>
    tpu.vector_store %arg20[%c0_66, %c5, %c32_67], %199 {strides = array<i32>} : memref<4x8x64xf32, #tpu.memory_space<vmem>>, vector<4x1x32xf32>,
    %200 = arith.truncf %168 : vector<4x32xf32> to vector<4x32xbf16>
    %201 = arith.truncf %193 : vector<4x32xf32> to vector<4x32xbf16>
    %c12 = arith.constant 12 : index
    %c0_68 = arith.constant 0 : index
    %202 = vector.load %arg19[%c12, %c0_68] : memref<32x256xf32, #tpu.memory_space<vmem>>, vector<4x128xf32>
    %cst_69 = arith.constant dense<0.000000e+00> : vector<4x128xf32>
    %203 = tpu.matmul %200, %8, %cst_69 {dimension_numbers = #tpu.dot_dimension_numbers<[1], [0], [0], [1], [0, 0, 1, 1], [], []>} : vector<4x32xbf16>, vector<32x128xbf16>, vector<4x128xf32> -> vector<4x128xf32>
    %204 = arith.addf %202, %203 : vector<4x128xf32>
    %cst_70 = arith.constant 2.000000e+00 : f32
    %205 = vector.broadcast %cst_70 : f32 to vector<4x128xf32>
    %206 = arith.mulf %205, %204 : vector<4x128xf32>
    %207 = arith.select %27, %206, %204 : vector<4x128xi1>, vector<4x128xf32>
    %208 = arith.negf %207 : vector<4x128xf32>
    %209 = math.exp %208 : vector<4x128xf32>
    %cst_71 = arith.constant 1.000000e+00 : f32
    %210 = vector.broadcast %cst_71 : f32 to vector<4x128xf32>
    %211 = arith.addf %210, %209 : vector<4x128xf32>
    %212 = arith.divf %210, %211 : vector<4x128xf32>
    %cst_72 = arith.constant 2.000000e+00 : f32
    %213 = vector.broadcast %cst_72 : f32 to vector<4x128xf32>
    %214 = arith.mulf %213, %212 : vector<4x128xf32>
    %cst_73 = arith.constant 1.000000e+00 : f32
    %215 = vector.broadcast %cst_73 : f32 to vector<4x128xf32>
    %216 = arith.subf %214, %215 : vector<4x128xf32>
    %217 = arith.select %27, %216, %212 : vector<4x128xi1>, vector<4x128xf32>
    %218 = vector.extract_strided_slice %217 {offsets = [0, 32], sizes = [4, 32], strides = [1, 1]} : vector<4x128xf32> to vector<4x32xf32>
    %219 = arith.mulf %218, %165 : vector<4x32xf32>
    %220 = vector.extract_strided_slice %217 {offsets = [0, 0], sizes = [4, 32], strides = [1, 1]} : vector<4x128xf32> to vector<4x32xf32>
    %221 = vector.extract_strided_slice %217 {offsets = [0, 64], sizes = [4, 32], strides = [1, 1]} : vector<4x128xf32> to vector<4x32xf32>
    %222 = arith.mulf %220, %221 : vector<4x32xf32>
    %223 = arith.addf %219, %222 : vector<4x32xf32>
    %224 = vector.extract_strided_slice %217 {offsets = [0, 96], sizes = [4, 32], strides = [1, 1]} : vector<4x128xf32> to vector<4x32xf32>
    %225 = math.tanh %223 : vector<4x32xf32>
    %226 = arith.mulf %224, %225 : vector<4x32xf32>
    %c16 = arith.constant 16 : index
    %c128_74 = arith.constant 128 : index
    %227 = vector.load %arg19[%c16, %c128_74] : memref<32x256xf32, #tpu.memory_space<vmem>>, vector<4x128xf32>
    %cst_75 = arith.constant dense<0.000000e+00> : vector<4x128xf32>
    %228 = tpu.matmul %201, %9, %cst_75 {dimension_numbers = #tpu.dot_dimension_numbers<[1], [0], [0], [1], [0, 0, 1, 1], [], []>} : vector<4x32xbf16>, vector<32x128xbf16>, vector<4x128xf32> -> vector<4x128xf32>
    %229 = arith.addf %227, %228 : vector<4x128xf32>
    %cst_76 = arith.constant 2.000000e+00 : f32
    %230 = vector.broadcast %cst_76 : f32 to vector<4x128xf32>
    %231 = arith.mulf %230, %229 : vector<4x128xf32>
    %232 = arith.select %27, %231, %229 : vector<4x128xi1>, vector<4x128xf32>
    %233 = arith.negf %232 : vector<4x128xf32>
    %234 = math.exp %233 : vector<4x128xf32>
    %cst_77 = arith.constant 1.000000e+00 : f32
    %235 = vector.broadcast %cst_77 : f32 to vector<4x128xf32>
    %236 = arith.addf %235, %234 : vector<4x128xf32>
    %237 = arith.divf %235, %236 : vector<4x128xf32>
    %cst_78 = arith.constant 2.000000e+00 : f32
    %238 = vector.broadcast %cst_78 : f32 to vector<4x128xf32>
    %239 = arith.mulf %238, %237 : vector<4x128xf32>
    %cst_79 = arith.constant 1.000000e+00 : f32
    %240 = vector.broadcast %cst_79 : f32 to vector<4x128xf32>
    %241 = arith.subf %239, %240 : vector<4x128xf32>
    %242 = arith.select %27, %241, %237 : vector<4x128xi1>, vector<4x128xf32>
    %243 = vector.extract_strided_slice %242 {offsets = [0, 32], sizes = [4, 32], strides = [1, 1]} : vector<4x128xf32> to vector<4x32xf32>
    %244 = arith.mulf %243, %190 : vector<4x32xf32>
    %245 = vector.extract_strided_slice %242 {offsets = [0, 0], sizes = [4, 32], strides = [1, 1]} : vector<4x128xf32> to vector<4x32xf32>
    %246 = vector.extract_strided_slice %242 {offsets = [0, 64], sizes = [4, 32], strides = [1, 1]} : vector<4x128xf32> to vector<4x32xf32>
    %247 = arith.mulf %245, %246 : vector<4x32xf32>
    %248 = arith.addf %244, %247 : vector<4x32xf32>
    %249 = vector.extract_strided_slice %242 {offsets = [0, 96], sizes = [4, 32], strides = [1, 1]} : vector<4x128xf32> to vector<4x32xf32>
    %250 = math.tanh %248 : vector<4x32xf32>
    %251 = arith.mulf %249, %250 : vector<4x32xf32>
    %c0_80 = arith.constant 0 : index
    %c3 = arith.constant 3 : index
    %c0_81 = arith.constant 0 : index
    %252 = vector.load %arg20[%c0_80, %c3, %c0_81] : memref<4x8x64xf32, #tpu.memory_space<vmem>>, vector<4x1x32xf32>
    %253 = vector.shape_cast %252 : vector<4x1x32xf32> to vector<4x32xf32>
    %254 = vector.shape_cast %226 : vector<4x32xf32> to vector<4x1x32xf32>
    tpu.vector_store %arg20[%c0_80, %c3, %c0_81], %254 {strides = array<i32>} : memref<4x8x64xf32, #tpu.memory_space<vmem>>, vector<4x1x32xf32>,
    %c0_82 = arith.constant 0 : index
    %c4_83 = arith.constant 4 : index
    %c32_84 = arith.constant 32 : index
    %255 = vector.load %arg20[%c0_82, %c4_83, %c32_84] : memref<4x8x64xf32, #tpu.memory_space<vmem>>, vector<4x1x32xf32>
    %256 = vector.shape_cast %255 : vector<4x1x32xf32> to vector<4x32xf32>
    %257 = vector.shape_cast %251 : vector<4x32xf32> to vector<4x1x32xf32>
    tpu.vector_store %arg20[%c0_82, %c4_83, %c32_84], %257 {strides = array<i32>} : memref<4x8x64xf32, #tpu.memory_space<vmem>>, vector<4x1x32xf32>,
    %258 = arith.truncf %226 : vector<4x32xf32> to vector<4x32xbf16>
    %259 = arith.truncf %251 : vector<4x32xf32> to vector<4x32xbf16>
    %c16_85 = arith.constant 16 : index
    %c0_86 = arith.constant 0 : index
    %260 = vector.load %arg19[%c16_85, %c0_86] : memref<32x256xf32, #tpu.memory_space<vmem>>, vector<4x128xf32>
    %cst_87 = arith.constant dense<0.000000e+00> : vector<4x128xf32>
    %261 = tpu.matmul %258, %8, %cst_87 {dimension_numbers = #tpu.dot_dimension_numbers<[1], [0], [0], [1], [0, 0, 1, 1], [], []>} : vector<4x32xbf16>, vector<32x128xbf16>, vector<4x128xf32> -> vector<4x128xf32>
    %262 = arith.addf %260, %261 : vector<4x128xf32>
    %cst_88 = arith.constant 2.000000e+00 : f32
    %263 = vector.broadcast %cst_88 : f32 to vector<4x128xf32>
    %264 = arith.mulf %263, %262 : vector<4x128xf32>
    %265 = arith.select %27, %264, %262 : vector<4x128xi1>, vector<4x128xf32>
    %266 = arith.negf %265 : vector<4x128xf32>
    %267 = math.exp %266 : vector<4x128xf32>
    %cst_89 = arith.constant 1.000000e+00 : f32
    %268 = vector.broadcast %cst_89 : f32 to vector<4x128xf32>
    %269 = arith.addf %268, %267 : vector<4x128xf32>
    %270 = arith.divf %268, %269 : vector<4x128xf32>
    %cst_90 = arith.constant 2.000000e+00 : f32
    %271 = vector.broadcast %cst_90 : f32 to vector<4x128xf32>
    %272 = arith.mulf %271, %270 : vector<4x128xf32>
    %cst_91 = arith.constant 1.000000e+00 : f32
    %273 = vector.broadcast %cst_91 : f32 to vector<4x128xf32>
    %274 = arith.subf %272, %273 : vector<4x128xf32>
    %275 = arith.select %27, %274, %270 : vector<4x128xi1>, vector<4x128xf32>
    %276 = vector.extract_strided_slice %275 {offsets = [0, 32], sizes = [4, 32], strides = [1, 1]} : vector<4x128xf32> to vector<4x32xf32>
    %277 = arith.mulf %276, %223 : vector<4x32xf32>
    %278 = vector.extract_strided_slice %275 {offsets = [0, 0], sizes = [4, 32], strides = [1, 1]} : vector<4x128xf32> to vector<4x32xf32>
    %279 = vector.extract_strided_slice %275 {offsets = [0, 64], sizes = [4, 32], strides = [1, 1]} : vector<4x128xf32> to vector<4x32xf32>
    %280 = arith.mulf %278, %279 : vector<4x32xf32>
    %281 = arith.addf %277, %280 : vector<4x32xf32>
    %282 = vector.extract_strided_slice %275 {offsets = [0, 96], sizes = [4, 32], strides = [1, 1]} : vector<4x128xf32> to vector<4x32xf32>
    %283 = math.tanh %281 : vector<4x32xf32>
    %284 = arith.mulf %282, %283 : vector<4x32xf32>
    %c12_92 = arith.constant 12 : index
    %c128_93 = arith.constant 128 : index
    %285 = vector.load %arg19[%c12_92, %c128_93] : memref<32x256xf32, #tpu.memory_space<vmem>>, vector<4x128xf32>
    %cst_94 = arith.constant dense<0.000000e+00> : vector<4x128xf32>
    %286 = tpu.matmul %259, %9, %cst_94 {dimension_numbers = #tpu.dot_dimension_numbers<[1], [0], [0], [1], [0, 0, 1, 1], [], []>} : vector<4x32xbf16>, vector<32x128xbf16>, vector<4x128xf32> -> vector<4x128xf32>
    %287 = arith.addf %285, %286 : vector<4x128xf32>
    %cst_95 = arith.constant 2.000000e+00 : f32
    %288 = vector.broadcast %cst_95 : f32 to vector<4x128xf32>
    %289 = arith.mulf %288, %287 : vector<4x128xf32>
    %290 = arith.select %27, %289, %287 : vector<4x128xi1>, vector<4x128xf32>
    %291 = arith.negf %290 : vector<4x128xf32>
    %292 = math.exp %291 : vector<4x128xf32>
    %cst_96 = arith.constant 1.000000e+00 : f32
    %293 = vector.broadcast %cst_96 : f32 to vector<4x128xf32>
    %294 = arith.addf %293, %292 : vector<4x128xf32>
    %295 = arith.divf %293, %294 : vector<4x128xf32>
    %cst_97 = arith.constant 2.000000e+00 : f32
    %296 = vector.broadcast %cst_97 : f32 to vector<4x128xf32>
    %297 = arith.mulf %296, %295 : vector<4x128xf32>
    %cst_98 = arith.constant 1.000000e+00 : f32
    %298 = vector.broadcast %cst_98 : f32 to vector<4x128xf32>
    %299 = arith.subf %297, %298 : vector<4x128xf32>
    %300 = arith.select %27, %299, %295 : vector<4x128xi1>, vector<4x128xf32>
    %301 = vector.extract_strided_slice %300 {offsets = [0, 32], sizes = [4, 32], strides = [1, 1]} : vector<4x128xf32> to vector<4x32xf32>
    %302 = arith.mulf %301, %248 : vector<4x32xf32>
    %303 = vector.extract_strided_slice %300 {offsets = [0, 0], sizes = [4, 32], strides = [1, 1]} : vector<4x128xf32> to vector<4x32xf32>
    %304 = vector.extract_strided_slice %300 {offsets = [0, 64], sizes = [4, 32], strides = [1, 1]} : vector<4x128xf32> to vector<4x32xf32>
    %305 = arith.mulf %303, %304 : vector<4x32xf32>
    %306 = arith.addf %302, %305 : vector<4x32xf32>
    %307 = vector.extract_strided_slice %300 {offsets = [0, 96], sizes = [4, 32], strides = [1, 1]} : vector<4x128xf32> to vector<4x32xf32>
    %308 = math.tanh %306 : vector<4x32xf32>
    %309 = arith.mulf %307, %308 : vector<4x32xf32>
    %c0_99 = arith.constant 0 : index
    %c4_100 = arith.constant 4 : index
    %c0_101 = arith.constant 0 : index
    %310 = vector.load %arg20[%c0_99, %c4_100, %c0_101] : memref<4x8x64xf32, #tpu.memory_space<vmem>>, vector<4x1x32xf32>
    %311 = vector.shape_cast %310 : vector<4x1x32xf32> to vector<4x32xf32>
    %312 = vector.shape_cast %284 : vector<4x32xf32> to vector<4x1x32xf32>
    tpu.vector_store %arg20[%c0_99, %c4_100, %c0_101], %312 {strides = array<i32>} : memref<4x8x64xf32, #tpu.memory_space<vmem>>, vector<4x1x32xf32>,
    %c0_102 = arith.constant 0 : index
    %c3_103 = arith.constant 3 : index
    %c32_104 = arith.constant 32 : index
    %313 = vector.load %arg20[%c0_102, %c3_103, %c32_104] : memref<4x8x64xf32, #tpu.memory_space<vmem>>, vector<4x1x32xf32>
    %314 = vector.shape_cast %313 : vector<4x1x32xf32> to vector<4x32xf32>
    %315 = vector.shape_cast %309 : vector<4x32xf32> to vector<4x1x32xf32>
    tpu.vector_store %arg20[%c0_102, %c3_103, %c32_104], %315 {strides = array<i32>} : memref<4x8x64xf32, #tpu.memory_space<vmem>>, vector<4x1x32xf32>,
    %316 = arith.truncf %284 : vector<4x32xf32> to vector<4x32xbf16>
    %317 = arith.truncf %309 : vector<4x32xf32> to vector<4x32xbf16>
    %c20_105 = arith.constant 20 : index
    %c0_106 = arith.constant 0 : index
    %318 = vector.load %arg19[%c20_105, %c0_106] : memref<32x256xf32, #tpu.memory_space<vmem>>, vector<4x128xf32>
    %cst_107 = arith.constant dense<0.000000e+00> : vector<4x128xf32>
    %319 = tpu.matmul %316, %8, %cst_107 {dimension_numbers = #tpu.dot_dimension_numbers<[1], [0], [0], [1], [0, 0, 1, 1], [], []>} : vector<4x32xbf16>, vector<32x128xbf16>, vector<4x128xf32> -> vector<4x128xf32>
    %320 = arith.addf %318, %319 : vector<4x128xf32>
    %cst_108 = arith.constant 2.000000e+00 : f32
    %321 = vector.broadcast %cst_108 : f32 to vector<4x128xf32>
    %322 = arith.mulf %321, %320 : vector<4x128xf32>
    %323 = arith.select %27, %322, %320 : vector<4x128xi1>, vector<4x128xf32>
    %324 = arith.negf %323 : vector<4x128xf32>
    %325 = math.exp %324 : vector<4x128xf32>
    %cst_109 = arith.constant 1.000000e+00 : f32
    %326 = vector.broadcast %cst_109 : f32 to vector<4x128xf32>
    %327 = arith.addf %326, %325 : vector<4x128xf32>
    %328 = arith.divf %326, %327 : vector<4x128xf32>
    %cst_110 = arith.constant 2.000000e+00 : f32
    %329 = vector.broadcast %cst_110 : f32 to vector<4x128xf32>
    %330 = arith.mulf %329, %328 : vector<4x128xf32>
    %cst_111 = arith.constant 1.000000e+00 : f32
    %331 = vector.broadcast %cst_111 : f32 to vector<4x128xf32>
    %332 = arith.subf %330, %331 : vector<4x128xf32>
    %333 = arith.select %27, %332, %328 : vector<4x128xi1>, vector<4x128xf32>
    %334 = vector.extract_strided_slice %333 {offsets = [0, 32], sizes = [4, 32], strides = [1, 1]} : vector<4x128xf32> to vector<4x32xf32>
    %335 = arith.mulf %334, %281 : vector<4x32xf32>
    %336 = vector.extract_strided_slice %333 {offsets = [0, 0], sizes = [4, 32], strides = [1, 1]} : vector<4x128xf32> to vector<4x32xf32>
    %337 = vector.extract_strided_slice %333 {offsets = [0, 64], sizes = [4, 32], strides = [1, 1]} : vector<4x128xf32> to vector<4x32xf32>
    %338 = arith.mulf %336, %337 : vector<4x32xf32>
    %339 = arith.addf %335, %338 : vector<4x32xf32>
    %340 = vector.extract_strided_slice %333 {offsets = [0, 96], sizes = [4, 32], strides = [1, 1]} : vector<4x128xf32> to vector<4x32xf32>
    %341 = math.tanh %339 : vector<4x32xf32>
    %342 = arith.mulf %340, %341 : vector<4x32xf32>
    %c8_112 = arith.constant 8 : index
    %c128_113 = arith.constant 128 : index
    %343 = vector.load %arg19[%c8_112, %c128_113] : memref<32x256xf32, #tpu.memory_space<vmem>>, vector<4x128xf32>
    %cst_114 = arith.constant dense<0.000000e+00> : vector<4x128xf32>
    %344 = tpu.matmul %317, %9, %cst_114 {dimension_numbers = #tpu.dot_dimension_numbers<[1], [0], [0], [1], [0, 0, 1, 1], [], []>} : vector<4x32xbf16>, vector<32x128xbf16>, vector<4x128xf32> -> vector<4x128xf32>
    %345 = arith.addf %343, %344 : vector<4x128xf32>
    %cst_115 = arith.constant 2.000000e+00 : f32
    %346 = vector.broadcast %cst_115 : f32 to vector<4x128xf32>
    %347 = arith.mulf %346, %345 : vector<4x128xf32>
    %348 = arith.select %27, %347, %345 : vector<4x128xi1>, vector<4x128xf32>
    %349 = arith.negf %348 : vector<4x128xf32>
    %350 = math.exp %349 : vector<4x128xf32>
    %cst_116 = arith.constant 1.000000e+00 : f32
    %351 = vector.broadcast %cst_116 : f32 to vector<4x128xf32>
    %352 = arith.addf %351, %350 : vector<4x128xf32>
    %353 = arith.divf %351, %352 : vector<4x128xf32>
    %cst_117 = arith.constant 2.000000e+00 : f32
    %354 = vector.broadcast %cst_117 : f32 to vector<4x128xf32>
    %355 = arith.mulf %354, %353 : vector<4x128xf32>
    %cst_118 = arith.constant 1.000000e+00 : f32
    %356 = vector.broadcast %cst_118 : f32 to vector<4x128xf32>
    %357 = arith.subf %355, %356 : vector<4x128xf32>
    %358 = arith.select %27, %357, %353 : vector<4x128xi1>, vector<4x128xf32>
    %359 = vector.extract_strided_slice %358 {offsets = [0, 32], sizes = [4, 32], strides = [1, 1]} : vector<4x128xf32> to vector<4x32xf32>
    %360 = arith.mulf %359, %306 : vector<4x32xf32>
    %361 = vector.extract_strided_slice %358 {offsets = [0, 0], sizes = [4, 32], strides = [1, 1]} : vector<4x128xf32> to vector<4x32xf32>
    %362 = vector.extract_strided_slice %358 {offsets = [0, 64], sizes = [4, 32], strides = [1, 1]} : vector<4x128xf32> to vector<4x32xf32>
    %363 = arith.mulf %361, %362 : vector<4x32xf32>
    %364 = arith.addf %360, %363 : vector<4x32xf32>
    %365 = vector.extract_strided_slice %358 {offsets = [0, 96], sizes = [4, 32], strides = [1, 1]} : vector<4x128xf32> to vector<4x32xf32>
    %366 = math.tanh %364 : vector<4x32xf32>
    %367 = arith.mulf %365, %366 : vector<4x32xf32>
    %c0_119 = arith.constant 0 : index
    %c5_120 = arith.constant 5 : index
    %c0_121 = arith.constant 0 : index
    %368 = vector.load %arg20[%c0_119, %c5_120, %c0_121] : memref<4x8x64xf32, #tpu.memory_space<vmem>>, vector<4x1x32xf32>
    %369 = vector.shape_cast %368 : vector<4x1x32xf32> to vector<4x32xf32>
    %370 = vector.shape_cast %342 : vector<4x32xf32> to vector<4x1x32xf32>
    tpu.vector_store %arg20[%c0_119, %c5_120, %c0_121], %370 {strides = array<i32>} : memref<4x8x64xf32, #tpu.memory_space<vmem>>, vector<4x1x32xf32>,
    %c0_122 = arith.constant 0 : index
    %c2_123 = arith.constant 2 : index
    %c32_124 = arith.constant 32 : index
    %371 = vector.load %arg20[%c0_122, %c2_123, %c32_124] : memref<4x8x64xf32, #tpu.memory_space<vmem>>, vector<4x1x32xf32>
    %372 = vector.shape_cast %371 : vector<4x1x32xf32> to vector<4x32xf32>
    %373 = vector.shape_cast %367 : vector<4x32xf32> to vector<4x1x32xf32>
    tpu.vector_store %arg20[%c0_122, %c2_123, %c32_124], %373 {strides = array<i32>} : memref<4x8x64xf32, #tpu.memory_space<vmem>>, vector<4x1x32xf32>,
    %374 = arith.truncf %342 : vector<4x32xf32> to vector<4x32xbf16>
    %375 = arith.truncf %367 : vector<4x32xf32> to vector<4x32xbf16>
    %c24_125 = arith.constant 24 : index
    %c0_126 = arith.constant 0 : index
    %376 = vector.load %arg19[%c24_125, %c0_126] : memref<32x256xf32, #tpu.memory_space<vmem>>, vector<4x128xf32>
    %cst_127 = arith.constant dense<0.000000e+00> : vector<4x128xf32>
    %377 = tpu.matmul %374, %8, %cst_127 {dimension_numbers = #tpu.dot_dimension_numbers<[1], [0], [0], [1], [0, 0, 1, 1], [], []>} : vector<4x32xbf16>, vector<32x128xbf16>, vector<4x128xf32> -> vector<4x128xf32>
    %378 = arith.addf %376, %377 : vector<4x128xf32>
    %cst_128 = arith.constant 2.000000e+00 : f32
    %379 = vector.broadcast %cst_128 : f32 to vector<4x128xf32>
    %380 = arith.mulf %379, %378 : vector<4x128xf32>
    %381 = arith.select %27, %380, %378 : vector<4x128xi1>, vector<4x128xf32>
    %382 = arith.negf %381 : vector<4x128xf32>
    %383 = math.exp %382 : vector<4x128xf32>
    %cst_129 = arith.constant 1.000000e+00 : f32
    %384 = vector.broadcast %cst_129 : f32 to vector<4x128xf32>
    %385 = arith.addf %384, %383 : vector<4x128xf32>
    %386 = arith.divf %384, %385 : vector<4x128xf32>
    %cst_130 = arith.constant 2.000000e+00 : f32
    %387 = vector.broadcast %cst_130 : f32 to vector<4x128xf32>
    %388 = arith.mulf %387, %386 : vector<4x128xf32>
    %cst_131 = arith.constant 1.000000e+00 : f32
    %389 = vector.broadcast %cst_131 : f32 to vector<4x128xf32>
    %390 = arith.subf %388, %389 : vector<4x128xf32>
    %391 = arith.select %27, %390, %386 : vector<4x128xi1>, vector<4x128xf32>
    %392 = vector.extract_strided_slice %391 {offsets = [0, 32], sizes = [4, 32], strides = [1, 1]} : vector<4x128xf32> to vector<4x32xf32>
    %393 = arith.mulf %392, %339 : vector<4x32xf32>
    %394 = vector.extract_strided_slice %391 {offsets = [0, 0], sizes = [4, 32], strides = [1, 1]} : vector<4x128xf32> to vector<4x32xf32>
    %395 = vector.extract_strided_slice %391 {offsets = [0, 64], sizes = [4, 32], strides = [1, 1]} : vector<4x128xf32> to vector<4x32xf32>
    %396 = arith.mulf %394, %395 : vector<4x32xf32>
    %397 = arith.addf %393, %396 : vector<4x32xf32>
    %398 = vector.extract_strided_slice %391 {offsets = [0, 96], sizes = [4, 32], strides = [1, 1]} : vector<4x128xf32> to vector<4x32xf32>
    %399 = math.tanh %397 : vector<4x32xf32>
    %400 = arith.mulf %398, %399 : vector<4x32xf32>
    %c4_132 = arith.constant 4 : index
    %c128_133 = arith.constant 128 : index
    %401 = vector.load %arg19[%c4_132, %c128_133] : memref<32x256xf32, #tpu.memory_space<vmem>>, vector<4x128xf32>
    %cst_134 = arith.constant dense<0.000000e+00> : vector<4x128xf32>
    %402 = tpu.matmul %375, %9, %cst_134 {dimension_numbers = #tpu.dot_dimension_numbers<[1], [0], [0], [1], [0, 0, 1, 1], [], []>} : vector<4x32xbf16>, vector<32x128xbf16>, vector<4x128xf32> -> vector<4x128xf32>
    %403 = arith.addf %401, %402 : vector<4x128xf32>
    %cst_135 = arith.constant 2.000000e+00 : f32
    %404 = vector.broadcast %cst_135 : f32 to vector<4x128xf32>
    %405 = arith.mulf %404, %403 : vector<4x128xf32>
    %406 = arith.select %27, %405, %403 : vector<4x128xi1>, vector<4x128xf32>
    %407 = arith.negf %406 : vector<4x128xf32>
    %408 = math.exp %407 : vector<4x128xf32>
    %cst_136 = arith.constant 1.000000e+00 : f32
    %409 = vector.broadcast %cst_136 : f32 to vector<4x128xf32>
    %410 = arith.addf %409, %408 : vector<4x128xf32>
    %411 = arith.divf %409, %410 : vector<4x128xf32>
    %cst_137 = arith.constant 2.000000e+00 : f32
    %412 = vector.broadcast %cst_137 : f32 to vector<4x128xf32>
    %413 = arith.mulf %412, %411 : vector<4x128xf32>
    %cst_138 = arith.constant 1.000000e+00 : f32
    %414 = vector.broadcast %cst_138 : f32 to vector<4x128xf32>
    %415 = arith.subf %413, %414 : vector<4x128xf32>
    %416 = arith.select %27, %415, %411 : vector<4x128xi1>, vector<4x128xf32>
    %417 = vector.extract_strided_slice %416 {offsets = [0, 32], sizes = [4, 32], strides = [1, 1]} : vector<4x128xf32> to vector<4x32xf32>
    %418 = arith.mulf %417, %364 : vector<4x32xf32>
    %419 = vector.extract_strided_slice %416 {offsets = [0, 0], sizes = [4, 32], strides = [1, 1]} : vector<4x128xf32> to vector<4x32xf32>
    %420 = vector.extract_strided_slice %416 {offsets = [0, 64], sizes = [4, 32], strides = [1, 1]} : vector<4x128xf32> to vector<4x32xf32>
    %421 = arith.mulf %419, %420 : vector<4x32xf32>
    %422 = arith.addf %418, %421 : vector<4x32xf32>
    %423 = vector.extract_strided_slice %416 {offsets = [0, 96], sizes = [4, 32], strides = [1, 1]} : vector<4x128xf32> to vector<4x32xf32>
    %424 = math.tanh %422 : vector<4x32xf32>
    %425 = arith.mulf %423, %424 : vector<4x32xf32>
    %c0_139 = arith.constant 0 : index
    %c6_140 = arith.constant 6 : index
    %c0_141 = arith.constant 0 : index
    %426 = vector.load %arg20[%c0_139, %c6_140, %c0_141] : memref<4x8x64xf32, #tpu.memory_space<vmem>>, vector<4x1x32xf32>
    %427 = vector.shape_cast %426 : vector<4x1x32xf32> to vector<4x32xf32>
    %428 = vector.shape_cast %400 : vector<4x32xf32> to vector<4x1x32xf32>
    tpu.vector_store %arg20[%c0_139, %c6_140, %c0_141], %428 {strides = array<i32>} : memref<4x8x64xf32, #tpu.memory_space<vmem>>, vector<4x1x32xf32>,
    %c0_142 = arith.constant 0 : index
    %c1_143 = arith.constant 1 : index
    %c32_144 = arith.constant 32 : index
    %429 = vector.load %arg20[%c0_142, %c1_143, %c32_144] : memref<4x8x64xf32, #tpu.memory_space<vmem>>, vector<4x1x32xf32>
    %430 = vector.shape_cast %429 : vector<4x1x32xf32> to vector<4x32xf32>
    %431 = vector.shape_cast %425 : vector<4x32xf32> to vector<4x1x32xf32>
    tpu.vector_store %arg20[%c0_142, %c1_143, %c32_144], %431 {strides = array<i32>} : memref<4x8x64xf32, #tpu.memory_space<vmem>>, vector<4x1x32xf32>,
    %432 = arith.truncf %400 : vector<4x32xf32> to vector<4x32xbf16>
    %433 = arith.truncf %425 : vector<4x32xf32> to vector<4x32xbf16>
    %c28_145 = arith.constant 28 : index
    %c0_146 = arith.constant 0 : index
    %434 = vector.load %arg19[%c28_145, %c0_146] : memref<32x256xf32, #tpu.memory_space<vmem>>, vector<4x128xf32>
    %cst_147 = arith.constant dense<0.000000e+00> : vector<4x128xf32>
    %435 = tpu.matmul %432, %8, %cst_147 {dimension_numbers = #tpu.dot_dimension_numbers<[1], [0], [0], [1], [0, 0, 1, 1], [], []>} : vector<4x32xbf16>, vector<32x128xbf16>, vector<4x128xf32> -> vector<4x128xf32>
    %436 = arith.addf %434, %435 : vector<4x128xf32>
    %cst_148 = arith.constant 2.000000e+00 : f32
    %437 = vector.broadcast %cst_148 : f32 to vector<4x128xf32>
    %438 = arith.mulf %437, %436 : vector<4x128xf32>
    %439 = arith.select %27, %438, %436 : vector<4x128xi1>, vector<4x128xf32>
    %440 = arith.negf %439 : vector<4x128xf32>
    %441 = math.exp %440 : vector<4x128xf32>
    %cst_149 = arith.constant 1.000000e+00 : f32
    %442 = vector.broadcast %cst_149 : f32 to vector<4x128xf32>
    %443 = arith.addf %442, %441 : vector<4x128xf32>
    %444 = arith.divf %442, %443 : vector<4x128xf32>
    %cst_150 = arith.constant 2.000000e+00 : f32
    %445 = vector.broadcast %cst_150 : f32 to vector<4x128xf32>
    %446 = arith.mulf %445, %444 : vector<4x128xf32>
    %cst_151 = arith.constant 1.000000e+00 : f32
    %447 = vector.broadcast %cst_151 : f32 to vector<4x128xf32>
    %448 = arith.subf %446, %447 : vector<4x128xf32>
    %449 = arith.select %27, %448, %444 : vector<4x128xi1>, vector<4x128xf32>
    %450 = vector.extract_strided_slice %449 {offsets = [0, 32], sizes = [4, 32], strides = [1, 1]} : vector<4x128xf32> to vector<4x32xf32>
    %451 = arith.mulf %450, %397 : vector<4x32xf32>
    %452 = vector.extract_strided_slice %449 {offsets = [0, 0], sizes = [4, 32], strides = [1, 1]} : vector<4x128xf32> to vector<4x32xf32>
    %453 = vector.extract_strided_slice %449 {offsets = [0, 64], sizes = [4, 32], strides = [1, 1]} : vector<4x128xf32> to vector<4x32xf32>
    %454 = arith.mulf %452, %453 : vector<4x32xf32>
    %455 = arith.addf %451, %454 : vector<4x32xf32>
    %456 = vector.extract_strided_slice %449 {offsets = [0, 96], sizes = [4, 32], strides = [1, 1]} : vector<4x128xf32> to vector<4x32xf32>
    %457 = math.tanh %455 : vector<4x32xf32>
    %458 = arith.mulf %456, %457 : vector<4x32xf32>
    %c0_152 = arith.constant 0 : index
    %c128_153 = arith.constant 128 : index
    %459 = vector.load %arg19[%c0_152, %c128_153] : memref<32x256xf32, #tpu.memory_space<vmem>>, vector<4x128xf32>
    %cst_154 = arith.constant dense<0.000000e+00> : vector<4x128xf32>
    %460 = tpu.matmul %433, %9, %cst_154 {dimension_numbers = #tpu.dot_dimension_numbers<[1], [0], [0], [1], [0, 0, 1, 1], [], []>} : vector<4x32xbf16>, vector<32x128xbf16>, vector<4x128xf32> -> vector<4x128xf32>
    %461 = arith.addf %459, %460 : vector<4x128xf32>
    %cst_155 = arith.constant 2.000000e+00 : f32
    %462 = vector.broadcast %cst_155 : f32 to vector<4x128xf32>
    %463 = arith.mulf %462, %461 : vector<4x128xf32>
    %464 = arith.select %27, %463, %461 : vector<4x128xi1>, vector<4x128xf32>
    %465 = arith.negf %464 : vector<4x128xf32>
    %466 = math.exp %465 : vector<4x128xf32>
    %cst_156 = arith.constant 1.000000e+00 : f32
    %467 = vector.broadcast %cst_156 : f32 to vector<4x128xf32>
    %468 = arith.addf %467, %466 : vector<4x128xf32>
    %469 = arith.divf %467, %468 : vector<4x128xf32>
    %cst_157 = arith.constant 2.000000e+00 : f32
    %470 = vector.broadcast %cst_157 : f32 to vector<4x128xf32>
    %471 = arith.mulf %470, %469 : vector<4x128xf32>
    %cst_158 = arith.constant 1.000000e+00 : f32
    %472 = vector.broadcast %cst_158 : f32 to vector<4x128xf32>
    %473 = arith.subf %471, %472 : vector<4x128xf32>
    %474 = arith.select %27, %473, %469 : vector<4x128xi1>, vector<4x128xf32>
    %475 = vector.extract_strided_slice %474 {offsets = [0, 32], sizes = [4, 32], strides = [1, 1]} : vector<4x128xf32> to vector<4x32xf32>
    %476 = arith.mulf %475, %422 : vector<4x32xf32>
    %477 = vector.extract_strided_slice %474 {offsets = [0, 0], sizes = [4, 32], strides = [1, 1]} : vector<4x128xf32> to vector<4x32xf32>
    %478 = vector.extract_strided_slice %474 {offsets = [0, 64], sizes = [4, 32], strides = [1, 1]} : vector<4x128xf32> to vector<4x32xf32>
    %479 = arith.mulf %477, %478 : vector<4x32xf32>
    %480 = arith.addf %476, %479 : vector<4x32xf32>
    %481 = vector.extract_strided_slice %474 {offsets = [0, 96], sizes = [4, 32], strides = [1, 1]} : vector<4x128xf32> to vector<4x32xf32>
    %482 = math.tanh %480 : vector<4x32xf32>
    %483 = arith.mulf %481, %482 : vector<4x32xf32>
    %c0_159 = arith.constant 0 : index
    %c7_160 = arith.constant 7 : index
    %c0_161 = arith.constant 0 : index
    %484 = vector.load %arg20[%c0_159, %c7_160, %c0_161] : memref<4x8x64xf32, #tpu.memory_space<vmem>>, vector<4x1x32xf32>
    %485 = vector.shape_cast %484 : vector<4x1x32xf32> to vector<4x32xf32>
    %486 = vector.shape_cast %458 : vector<4x32xf32> to vector<4x1x32xf32>
    tpu.vector_store %arg20[%c0_159, %c7_160, %c0_161], %486 {strides = array<i32>} : memref<4x8x64xf32, #tpu.memory_space<vmem>>, vector<4x1x32xf32>,
    %c0_162 = arith.constant 0 : index
    %c0_163 = arith.constant 0 : index
    %c32_164 = arith.constant 32 : index
    %487 = vector.load %arg20[%c0_162, %c0_163, %c32_164] : memref<4x8x64xf32, #tpu.memory_space<vmem>>, vector<4x1x32xf32>
    %488 = vector.shape_cast %487 : vector<4x1x32xf32> to vector<4x32xf32>
    %489 = vector.shape_cast %483 : vector<4x32xf32> to vector<4x1x32xf32>
    tpu.vector_store %arg20[%c0_162, %c0_163, %c32_164], %489 {strides = array<i32>} : memref<4x8x64xf32, #tpu.memory_space<vmem>>, vector<4x1x32xf32>,
    %c0_165 = arith.constant 0 : index
    %c0_166 = arith.constant 0 : index
    %c0_167 = arith.constant 0 : index
    %490 = vector.load %arg20[%c0_165, %c0_166, %c0_167] : memref<4x8x64xf32, #tpu.memory_space<vmem>>, vector<4x8x64xf32>
    %491 = arith.truncf %490 : vector<4x8x64xf32> to vector<4x8x64xbf16>
    %492 = vector.shape_cast %491 : vector<4x8x64xbf16> to vector<32x64xbf16>
    %c0_168 = arith.constant 0 : index
    %c0_169 = arith.constant 0 : index
    %493 = vector.load %arg9[%c0_168, %c0_169] : memref<64x64xbf16, #tpu.memory_space<vmem>>, vector<64x64xbf16>
    %cst_170 = arith.constant dense<0.000000e+00> : vector<32x64xf32>
    %494 = tpu.matmul %492, %493, %cst_170 {dimension_numbers = #tpu.dot_dimension_numbers<[1], [0], [0], [1], [0, 0, 1, 1], [], []>} : vector<32x64xbf16>, vector<64x64xbf16>, vector<32x64xf32> -> vector<32x64xf32>
    %c0_171 = arith.constant 0 : index
    %c0_172 = arith.constant 0 : index
    %495 = vector.load %arg10[%c0_171, %c0_172] : memref<1x64xf32, #tpu.memory_space<vmem>>, vector<1x64xf32>
    %496 = vector.broadcast %495 : vector<1x64xf32> to vector<32x64xf32>
    %497 = arith.addf %494, %496 : vector<32x64xf32>
    %498 = math.tanh %497 : vector<32x64xf32>
    %499 = arith.truncf %498 : vector<32x64xf32> to vector<32x64xbf16>
    %c0_173 = arith.constant 0 : index
    %c0_174 = arith.constant 0 : index
    %500 = vector.load %arg11[%c0_173, %c0_174] : memref<64x8xbf16, #tpu.memory_space<vmem>>, vector<64x8xbf16>
    %cst_175 = arith.constant dense<0.000000e+00> : vector<32x8xf32>
    %501 = tpu.matmul %499, %500, %cst_175 {dimension_numbers = #tpu.dot_dimension_numbers<[1], [0], [0], [1], [0, 0, 1, 1], [], []>} : vector<32x64xbf16>, vector<64x8xbf16>, vector<32x8xf32> -> vector<32x8xf32>
    %c0_176 = arith.constant 0 : index
    %c0_177 = arith.constant 0 : index
    %502 = vector.load %arg12[%c0_176, %c0_177] : memref<1x8xf32, #tpu.memory_space<vmem>>, vector<1x8xf32>
    %503 = vector.broadcast %502 : vector<1x8xf32> to vector<32x8xf32>
    %504 = arith.addf %501, %503 : vector<32x8xf32>
    %505 = vector.shape_cast %504 : vector<32x8xf32> to vector<4x8x8xf32>
    %cst_178 = arith.constant dense<0xFF800000> : vector<4x8xf32>
    %506 = vector.multi_reduction <maximumf>, %505, %cst_178 [1] : vector<4x8x8xf32> to vector<4x8xf32>
    %507 = vector.shape_cast %506 : vector<4x8xf32> to vector<4x1x8xf32>
    %508 = vector.broadcast %507 : vector<4x1x8xf32> to vector<4x8x8xf32>
    %509 = arith.subf %505, %508 : vector<4x8x8xf32>
    %510 = math.exp %509 : vector<4x8x8xf32>
    %cst_179 = arith.constant dense<0.000000e+00> : vector<4x8xf32>
    %511 = vector.multi_reduction <add>, %510, %cst_179 [1] : vector<4x8x8xf32> to vector<4x8xf32>
    %512 = vector.shape_cast %511 : vector<4x8xf32> to vector<4x1x8xf32>
    %513 = vector.broadcast %512 : vector<4x1x8xf32> to vector<4x8x8xf32>
    %514 = arith.divf %510, %513 : vector<4x8x8xf32>
    %515 = arith.truncf %514 : vector<4x8x8xf32> to vector<4x8x8xbf16>
    "tpu.trace_start"() <{level = 10 : i32, message = "btc,btd->bcd"}> : () -> ()
    %cst_180 = arith.constant dense<0.000000e+00> : vector<4x8x64xf32>
    %516 = tpu.matmul %515, %491, %cst_180 {dimension_numbers = #tpu.dot_dimension_numbers<[1], [1], [2], [2], [0, 0, 0, 2, 1, 2], [0], [0]>} : vector<4x8x8xbf16>, vector<4x8x64xbf16>, vector<4x8x64xf32> -> vector<4x8x64xf32>
    "tpu.trace_stop"() : () -> ()
    %c0_181 = arith.constant 0 : index
    %c0_182 = arith.constant 0 : index
    %517 = vector.load %arg8[%c0_181, %c0_182] : memref<8x32xbf16, #tpu.memory_space<vmem>>, vector<8x32xbf16>
    %518 = vector.extract_strided_slice %491 {offsets = [0, 0, 0], sizes = [4, 8, 32], strides = [1, 1, 1]} : vector<4x8x64xbf16> to vector<4x8x32xbf16>
    %519 = vector.extract_strided_slice %491 {offsets = [0, 0, 32], sizes = [4, 8, 32], strides = [1, 1, 1]} : vector<4x8x64xbf16> to vector<4x8x32xbf16>
    "tpu.trace_start"() <{level = 10 : i32, message = "bth,ch->btc"}> : () -> ()
    %cst_183 = arith.constant dense<0.000000e+00> : vector<4x8x8xf32>
    %520 = tpu.matmul %518, %517, %cst_183 {dimension_numbers = #tpu.dot_dimension_numbers<[2], [1], [0, 1], [0], [0, 0, 0, 1, 1, 0], [], []>} : vector<4x8x32xbf16>, vector<8x32xbf16>, vector<4x8x8xf32> -> vector<4x8x8xf32>
    %cst_184 = arith.constant dense<0.000000e+00> : vector<4x8x8xf32>
    %521 = tpu.matmul %519, %517, %cst_184 {dimension_numbers = #tpu.dot_dimension_numbers<[2], [1], [0, 1], [0], [0, 0, 0, 1, 1, 0], [], []>} : vector<4x8x32xbf16>, vector<8x32xbf16>, vector<4x8x8xf32> -> vector<4x8x8xf32>
    "tpu.trace_stop"() : () -> ()
    %522 = arith.truncf %520 : vector<4x8x8xf32> to vector<4x8x8xbf16>
    "tpu.trace_start"() <{level = 10 : i32, message = "btc,bth->bch"}> : () -> ()
    %cst_185 = arith.constant dense<0.000000e+00> : vector<4x8x32xf32>
    %523 = tpu.matmul %522, %518, %cst_185 {dimension_numbers = #tpu.dot_dimension_numbers<[1], [1], [2], [2], [0, 0, 0, 2, 1, 2], [0], [0]>} : vector<4x8x8xbf16>, vector<4x8x32xbf16>, vector<4x8x32xf32> -> vector<4x8x32xf32>
    "tpu.trace_stop"() : () -> ()
    %524 = arith.truncf %521 : vector<4x8x8xf32> to vector<4x8x8xbf16>
    "tpu.trace_start"() <{level = 10 : i32, message = "btc,bth->bch"}> : () -> ()
    %cst_186 = arith.constant dense<0.000000e+00> : vector<4x8x32xf32>
    %525 = tpu.matmul %524, %519, %cst_186 {dimension_numbers = #tpu.dot_dimension_numbers<[1], [1], [2], [2], [0, 0, 0, 2, 1, 2], [0], [0]>} : vector<4x8x8xbf16>, vector<4x8x32xbf16>, vector<4x8x32xf32> -> vector<4x8x32xf32>
    "tpu.trace_stop"() : () -> ()
    %526 = tpu.concatenate %523, %525 in 2 : vector<4x8x32xf32>, vector<4x8x32xf32> -> vector<4x8x64xf32>
    %c0_187 = arith.constant 0 : index
    %c0_188 = arith.constant 0 : index
    %527 = vector.load %arg13[%c0_187, %c0_188] : memref<1x64xf32, #tpu.memory_space<vmem>>, vector<1x64xf32>
    %528 = vector.shape_cast %527 : vector<1x64xf32> to vector<1x1x64xf32>
    %529 = vector.broadcast %528 : vector<1x1x64xf32> to vector<4x8x64xf32>
    %530 = arith.mulf %526, %529 : vector<4x8x64xf32>
    %cst_189 = arith.constant dense<0.000000e+00> : vector<4x8xf32>
    %531 = vector.multi_reduction <add>, %530, %cst_189 [2] : vector<4x8x64xf32> to vector<4x8xf32>
    %532 = vector.shape_cast %531 : vector<4x8xf32> to vector<4x8x1xf32>
    %c0_190 = arith.constant 0 : index
    %533 = memref.load %arg15[%c0_190] : memref<2xf32, #tpu.memory_space<smem>>
    %534 = vector.broadcast %533 : f32 to vector<4x8x1xf32>
    %535 = arith.addf %532, %534 : vector<4x8x1xf32>
    %536 = arith.negf %535 : vector<4x8x1xf32>
    %537 = math.exp %536 : vector<4x8x1xf32>
    %cst_191 = arith.constant 1.000000e+00 : f32
    %538 = vector.broadcast %cst_191 : f32 to vector<4x8x1xf32>
    %539 = arith.addf %538, %537 : vector<4x8x1xf32>
    %540 = arith.divf %538, %539 : vector<4x8x1xf32>
    %c0_192 = arith.constant 0 : index
    %c0_193 = arith.constant 0 : index
    %541 = vector.load %arg14[%c0_192, %c0_193] : memref<1x64xf32, #tpu.memory_space<vmem>>, vector<1x64xf32>
    %542 = vector.shape_cast %541 : vector<1x64xf32> to vector<1x1x64xf32>
    %543 = vector.broadcast %542 : vector<1x1x64xf32> to vector<4x8x64xf32>
    %544 = arith.mulf %516, %543 : vector<4x8x64xf32>
    %cst_194 = arith.constant dense<0.000000e+00> : vector<4x8xf32>
    %545 = vector.multi_reduction <add>, %544, %cst_194 [2] : vector<4x8x64xf32> to vector<4x8xf32>
    %546 = vector.shape_cast %545 : vector<4x8xf32> to vector<4x8x1xf32>
    %c1_195 = arith.constant 1 : index
    %547 = memref.load %arg15[%c1_195] : memref<2xf32, #tpu.memory_space<smem>>
    %548 = vector.broadcast %547 : f32 to vector<4x8x1xf32>
    %549 = arith.addf %546, %548 : vector<4x8x1xf32>
    %550 = arith.negf %549 : vector<4x8x1xf32>
    %551 = math.exp %550 : vector<4x8x1xf32>
    %cst_196 = arith.constant 1.000000e+00 : f32
    %552 = vector.broadcast %cst_196 : f32 to vector<4x8x1xf32>
    %553 = arith.addf %552, %551 : vector<4x8x1xf32>
    %554 = arith.divf %552, %553 : vector<4x8x1xf32>
    %555 = arith.addf %540, %554 : vector<4x8x1xf32>
    %556 = arith.divf %540, %555 : vector<4x8x1xf32>
    %557 = vector.broadcast %556 : vector<4x8x1xf32> to vector<4x8x64xf32>
    %558 = arith.mulf %557, %526 : vector<4x8x64xf32>
    %cst_197 = arith.constant 1.000000e+00 : f32
    %559 = vector.broadcast %cst_197 : f32 to vector<4x8x1xf32>
    %560 = arith.subf %559, %556 : vector<4x8x1xf32>
    %561 = vector.broadcast %560 : vector<4x8x1xf32> to vector<4x8x64xf32>
    %562 = arith.mulf %561, %516 : vector<4x8x64xf32>
    %563 = arith.addf %558, %562 : vector<4x8x64xf32>
    %cst_198 = arith.constant dense<0.000000e+00> : vector<4x64xf32>
    %564 = vector.multi_reduction <add>, %563, %cst_198 [1] : vector<4x8x64xf32> to vector<4x64xf32>
    %cst_199 = arith.constant 1.250000e-01 : f32
    %565 = vector.broadcast %cst_199 : f32 to vector<4x64xf32>
    %566 = arith.mulf %564, %565 : vector<4x64xf32>
    %567 = arith.truncf %566 : vector<4x64xf32> to vector<4x64xbf16>
    %c0_200 = arith.constant 0 : index
    %c0_201 = arith.constant 0 : index
    %568 = vector.load %arg16[%c0_200, %c0_201] : memref<64x8xbf16, #tpu.memory_space<vmem>>, vector<64x8xbf16>
    %cst_202 = arith.constant dense<0.000000e+00> : vector<4x8xf32>
    %569 = tpu.matmul %567, %568, %cst_202 {dimension_numbers = #tpu.dot_dimension_numbers<[1], [0], [0], [1], [0, 0, 1, 1], [], []>} : vector<4x64xbf16>, vector<64x8xbf16>, vector<4x8xf32> -> vector<4x8xf32>
    %c0_203 = arith.constant 0 : index
    %c0_204 = arith.constant 0 : index
    %570 = vector.load %arg17[%c0_203, %c0_204] : memref<1x8xf32, #tpu.memory_space<vmem>>, vector<1x8xf32>
    %571 = vector.broadcast %570 : vector<1x8xf32> to vector<4x8xf32>
    %572 = arith.addf %569, %571 : vector<4x8xf32>
    %c0_205 = arith.constant 0 : index
    %c0_206 = arith.constant 0 : index
    %c0_207 = arith.constant 0 : index
    %573 = vector.load %arg18[%c0_205, %c0_206, %c0_207] : memref<1x4x8xf32, #tpu.memory_space<vmem>>, vector<1x4x8xf32>
    %574 = vector.shape_cast %573 : vector<1x4x8xf32> to vector<4x8xf32>
    %575 = vector.shape_cast %572 : vector<4x8xf32> to vector<1x4x8xf32>
    tpu.vector_store %arg18[%c0_205, %c0_206, %c0_207], %575 {strides = array<i32>} : memref<1x4x8xf32, #tpu.memory_space<vmem>>, vector<1x4x8xf32>,
    return
  }
  func.func @transform_0(%arg0: i32) -> (i32, i32, i32) {
    %c0_i32 = arith.constant 0 : i32
    %c0_i32_0 = arith.constant 0 : i32
    %c0_i32_1 = arith.constant 0 : i32
    return %arg0, %c0_i32, %c0_i32_0 : i32, i32, i32
  }
  func.func @transform_1(%arg0: i32) -> (i32, i32, i32, i32) {
    %c0_i32 = arith.constant 0 : i32
    %c0_i32_0 = arith.constant 0 : i32
    %c0_i32_1 = arith.constant 0 : i32
    %c0_i32_2 = arith.constant 0 : i32
    return %arg0, %c0_i32, %c0_i32_0, %c0_i32_1 : i32, i32, i32, i32
  }
  func.func @transform_2(%arg0: i32) -> (i32, i32, i32, i32) {
    %c0_i32 = arith.constant 0 : i32
    %c0_i32_0 = arith.constant 0 : i32
    %c0_i32_1 = arith.constant 0 : i32
    %c0_i32_2 = arith.constant 0 : i32
    return %arg0, %c0_i32, %c0_i32_0, %c0_i32_1 : i32, i32, i32, i32
  }
  func.func @transform_3(%arg0: i32) -> (i32, i32) {
    %c0_i32 = arith.constant 0 : i32
    %c0_i32_0 = arith.constant 0 : i32
    %c0_i32_1 = arith.constant 0 : i32
    return %c0_i32, %c0_i32_0 : i32, i32
  }
  func.func @transform_4(%arg0: i32) -> (i32, i32) {
    %c0_i32 = arith.constant 0 : i32
    %c0_i32_0 = arith.constant 0 : i32
    %c0_i32_1 = arith.constant 0 : i32
    return %c0_i32, %c0_i32_0 : i32, i32
  }
  func.func @transform_5(%arg0: i32) -> (i32, i32) {
    %c0_i32 = arith.constant 0 : i32
    %c0_i32_0 = arith.constant 0 : i32
    %c0_i32_1 = arith.constant 0 : i32
    return %c0_i32, %c0_i32_0 : i32, i32
  }
  func.func @transform_6(%arg0: i32) -> (i32, i32) {
    %c0_i32 = arith.constant 0 : i32
    %c0_i32_0 = arith.constant 0 : i32
    %c0_i32_1 = arith.constant 0 : i32
    return %c0_i32, %c0_i32_0 : i32, i32
  }
  func.func @transform_7(%arg0: i32) -> (i32, i32) {
    %c0_i32 = arith.constant 0 : i32
    %c0_i32_0 = arith.constant 0 : i32
    %c0_i32_1 = arith.constant 0 : i32
    return %c0_i32, %c0_i32_0 : i32, i32
  }
  func.func @transform_8(%arg0: i32) -> (i32, i32) {
    %c0_i32 = arith.constant 0 : i32
    %c0_i32_0 = arith.constant 0 : i32
    %c0_i32_1 = arith.constant 0 : i32
    return %c0_i32, %c0_i32_0 : i32, i32
  }
  func.func @transform_9(%arg0: i32) -> (i32, i32) {
    %c0_i32 = arith.constant 0 : i32
    %c0_i32_0 = arith.constant 0 : i32
    %c0_i32_1 = arith.constant 0 : i32
    return %c0_i32, %c0_i32_0 : i32, i32
  }
  func.func @transform_10(%arg0: i32) -> (i32, i32) {
    %c0_i32 = arith.constant 0 : i32
    %c0_i32_0 = arith.constant 0 : i32
    %c0_i32_1 = arith.constant 0 : i32
    return %c0_i32, %c0_i32_0 : i32, i32
  }
  func.func @transform_11(%arg0: i32) -> (i32, i32) {
    %c0_i32 = arith.constant 0 : i32
    %c0_i32_0 = arith.constant 0 : i32
    %c0_i32_1 = arith.constant 0 : i32
    return %c0_i32, %c0_i32_0 : i32, i32
  }
  func.func @transform_12(%arg0: i32) -> (i32, i32) {
    %c0_i32 = arith.constant 0 : i32
    %c0_i32_0 = arith.constant 0 : i32
    %c0_i32_1 = arith.constant 0 : i32
    return %c0_i32, %c0_i32_0 : i32, i32
  }
  func.func @transform_13(%arg0: i32) -> (i32, i32) {
    %c0_i32 = arith.constant 0 : i32
    %c0_i32_0 = arith.constant 0 : i32
    %c0_i32_1 = arith.constant 0 : i32
    return %c0_i32, %c0_i32_0 : i32, i32
  }
  func.func @transform_14(%arg0: i32) -> i32 {
    %c0_i32 = arith.constant 0 : i32
    %c0_i32_0 = arith.constant 0 : i32
    return %c0_i32 : i32
  }
  func.func @transform_15(%arg0: i32) -> (i32, i32) {
    %c0_i32 = arith.constant 0 : i32
    %c0_i32_0 = arith.constant 0 : i32
    %c0_i32_1 = arith.constant 0 : i32
    return %c0_i32, %c0_i32_0 : i32, i32
  }
  func.func @transform_16(%arg0: i32) -> (i32, i32) {
    %c0_i32 = arith.constant 0 : i32
    %c0_i32_0 = arith.constant 0 : i32
    %c0_i32_1 = arith.constant 0 : i32
    return %c0_i32, %c0_i32_0 : i32, i32
  }
  func.func @transform_17(%arg0: i32) -> (i32, i32, i32) {
    %c0_i32 = arith.constant 0 : i32
    %c0_i32_0 = arith.constant 0 : i32
    %c0_i32_1 = arith.constant 0 : i32
    return %arg0, %c0_i32, %c0_i32_0 : i32, i32, i32
  }
}

</mosaic_0001>

<bundles_post_ra>
// kernel: structured_self_attention_forward.1
= control target key start
LH: loop header
LB: loop body
LE: loop exit
PB: predicated region body
PF: predicated region fallthrough
CT: control target
= control target key end

     0   :  { %s7238_s0 = inlined_call_operand.vmem [shape: bf16[2,32,384], index: 0, kind: input, shape index: {}]   ;;  %s7239_s1 = inlined_call_operand.vmem [shape: bf16[2,2,4,32], index: 1, kind: input, shape index: {}]   ;;  %s7240_s2 = inlined_call_operand.vmem [shape: f32[2,2,4,32], index: 2, kind: input, shape index: {}]   ;;  %s7241_s3 = inlined_call_operand.vmem [shape: bf16[384,256], index: 3, kind: input, shape index: {}]   ;;  %s7242_s4 = inlined_call_operand.vmem [shape: f32[1,256], index: 4, kind: input, shape index: {}]   ;;  %s7243_s5 = inlined_call_operand.vmem [shape: bf16[32,128], index: 5, kind: input, shape index: {}]   ;;  %s7244_s6 = inlined_call_operand.vmem [shape: bf16[32,128], index: 6, kind: input, shape index: {}]   ;;  %s7245_s7 = inlined_call_operand.vmem [shape: bf16[8,32], index: 7, kind: input, shape index: {}]   ;;  %s7246_s8 = inlined_call_operand.vmem [shape: bf16[64,64], index: 8, kind: input, shape index: {}]   ;;  %s7247_s9 = inlined_call_operand.vmem [shape: f32[1,64], index: 9, kind: input, shape index: {}]   ;;  %s7248_s10 = inlined_call_operand.vmem [shape: bf16[64,8], index: 10, kind: input, shape index: {}]   ;;  %s7249_s11 = inlined_call_operand.vmem [shape: f32[1,8], index: 11, kind: input, shape index: {}]   ;;  %s7250_s12 = inlined_call_operand.vmem [shape: f32[1,64], index: 12, kind: input, shape index: {}]   ;;  %s7251_s13 = inlined_call_operand.vmem [shape: f32[1,64], index: 13, kind: input, shape index: {}]   ;;  %s7252_s14 = inlined_call_operand.vmem [shape: f32[2], index: 14, kind: input, shape index: {}]   ;;  %s7253_s15 = inlined_call_operand.vmem [shape: bf16[64,8], index: 15, kind: input, shape index: {}]   ;;  %s7254_s16 = inlined_call_operand.vmem [shape: f32[1,8], index: 16, kind: input, shape index: {}]   ;;  %s7255_s17 = inlined_call_operand.hbm [shape: f32[2,4,8], index: 17, kind: output, shape index: {}]  }
   0x1   :  { %7263 = sst [smem:[#allocation16_spill]] %s7238_s0 }
   0x2   :  { %7264 = sst [smem:[#allocation17_spill]] %s7239_s1 }
   0x3   :  { %7265 = sst [smem:[#allocation18_spill]] %s7240_s2 }
   0x4   :  { %7266 = sst [smem:[#allocation19_spill]] %s7252_s14 }
   0x5   :  { %7267 = sst [smem:[#allocation20_spill]] %s7255_s17 }
   0x6   :  { %22 = vsyncpa [#allocation6], 0 }
   0x7   :  { %23 = vsyncpa [#allocation5], 0 }
   0x8   :  { %25 = vsyncpa [#allocation5 + $0x1], 0  ;;  %s5919_s24 = smov 0   ;;  %s5921_s25 = smov 0  }
   0x9   :  { %s5923_s26 = smov 0   ;;  %s5925_s27 = smov 0  }
   0xa LB: > { %7268 = sst [smem:[#allocation10_spill]] %s5806_s24  ;;  %s5940_s28 = sadd.s32 4294967295, %s5818_s27   ;;  %s5818_s27 = sphi %s5925_s27, %s7287_s27   ;;  %s5814_s26 = sphi %s5923_s26, %s7289_s26   ;;  %s5810_s25 = sphi %s5921_s25, %s7291_s25   ;;  %s5806_s24 = sphi %s5919_s24, %s7290_s24  }
   0xb   : > { %7269 = sst [smem:[#allocation11_spill]] %s5814_s26  ;;  %s4883_s29 = sadd.s32 4294967294, %s5818_s27  }
   0xc   : > { %7270 = sst [smem:[#allocation12_spill]] %s5818_s27  ;;  %s5944_s0 = sadd.s32 1, %s5818_s27  }
   0xd   : > { %7271 = sst [smem:[#allocation13_spill]] %s5944_s0  ;;  %s410_s30 = sadd.s32 1, %s5814_s26 }
   0xe   : > { %s407_s18 = ssub.s32 %s5818_s27, %s5944_s0  ;;  %p420_p0 = scmp.ne.s32.totalorder %s5814_s26, %s5810_s25 }
   0xf   : > { %p408_p1 = scmp.eq.s32.totalorder %s407_s18, 0  ;;  %p421_p2 = scmp.eq.s32.totalorder %s5940_s28, 1 }
  0x10   : > { %p426_p3 = scmp.ne.s32.totalorder %s5810_s25, %s5806_s24  ;;  %p427_p4 = scmp.eq.s32.totalorder %s4883_s29, 1 }
  0x11   : > { %s5955_s19 = scalar_select %p408_p1, %s5814_s26, %s410_s30  }
  0x12   : > { %p5957_p5 = por %p421_p2, %p420_p0  ;;  %p5961_p6 = por %p427_p4, %p426_p3 }
  0x13   : > { %7272 = sst [smem:[#allocation14_spill]] %s5955_s19  ;;  %p4884_p7 = scmp.ge.s32.totalorder %s5818_s27, 1 }
  0x14   : > { %s7274_s20 = scalar_select %p5961_p6, 1, 0 }
  0x15   : > { %p434_p8 = scmp.lt.s32.totalorder %s5818_s27, 3  ;;  %p5434_p9 = scmp.eq.s32.totalorder %s5940_s28, 0 }
  0x16   : > { %7275 = sst [smem:[#allocation15_spill]] %s7274_s20  ;;  %s7277_s14 = sld [smem:[#allocation19_spill]] }
  0x17   : > { %p5968_p10 = pnand %p4884_p7, %p434_p8 }
  0x19   : > { %p5426_p11 = pneg %p5968_p10 }
  0x1b   : > { %p5427_p12 = pnand %p5434_p9, %p5426_p11 }
  0x1c   : > { %s480_s29 = sshll.u32 %s7277_s14, 4  ;;  %s481_s29 = int_to_ptr.vmem [resolvable:$true] %s480_s29 }
  0x1d   : > { %s5737_s30 = scalar_lea.vmem %s481_s29, 16  ;;  %p5739_p0 = pneg %p5427_p12 }
  0x1e   : > { %p5738_p13 = scmp.ne.s32.totalorder %s481_s29, %s5737_s30  ;;  %p5745_p3 = scmp.lt.s32.totalorder %s481_s29, %s481_s29 }
  0x1f   : > { %p5746_p4 = scmp.lt.s32.totalorder %s5737_s30, %s5737_s30 }
  0x20   : > { %p5740_p1 = pnand %p5739_p0, %p5738_p13 }
  0x21   : > { %p5747_p7 = por %p5746_p4, %p5745_p3 }
  0x22   : > { %p5741_p2 = pneg %p5740_p1 }
  0x24   : > { %p5748_p8 = pnand %p5747_p7, %p5741_p2 }
  0x26   : > { %5751 = shalt.err (!%p5748_p8)
}
  0x27   : > { %s5820_s18 = smov [#allocation4]   ;;  %523 = sbr.rel (%p5968_p10) target bundleno = 7788 (0x1e6c), region = 88 }
  0x28   : > { %5429 = dma.vmem_to_smem (!%p5427_p12), %s481_s29, 16, %s5820_s18, [#allocation6]  }
  0x2e   : > { %5797 = dma.done.wait (%p5434_p9), [#allocation6], 16  }
  0x2f   : > { %5799 = vsyncadd (%p5434_p9), [#allocation6], 4294967280 }
  0x30   : > { %529 = sfence }
  0x31   : > { %v5477_v0 = vld [vmem:[%s7241_s3 + $0x4] ss:$8 sps:$4 sm:$0xff]   ;;  %v5479_v1 = vld [vmem:[%s7241_s3] ss:$8 sps:$4 sm:$0xff]   ;;  %v5480_v2 = vld [vmem:[%s7241_s3 + $0x14] ss:$8 sps:$4 sm:$0xff]  }
  0x32   : > { %942 = vmatprep.subr.bf16.mxu0 %v5477_v0  ;;  %v5821_v3 = vmov 0.0   ;;  %v5482_v4 = vld [vmem:[%s7241_s3 + $0x10] ss:$8 sps:$4 sm:$0xff]   ;;  %vm5822_vm0 = vmmov 0   ;;  %v5483_v5 = vld [vmem:[%s7241_s3 + $0x24] ss:$8 sps:$4 sm:$0xff]  }
  0x33   : > { %5153 = vmatprep.subr.bf16.mxu1 %v5821_v3  ;;  %943 = vmatpush1.bf16.msra.mxu0 %v5479_v1  ;;  %v5485_v6 = vld [vmem:[%s7241_s3 + $0x20] ss:$8 sps:$4 sm:$0xff]   ;;  %p586_p9 = scmp.lt.s32.totalorder %s5940_s28, 1  ;;  %v5486_v7 = vld [vmem:[%s7241_s3 + $0x34] ss:$8 sps:$4 sm:$0xff]   ;;  %s7278_s14 = sld [smem:[#allocation16_spill]] }
  0x34   : > { %5157 = vmatprep.mubr.msk.bf16.mxu1 %vm5822_vm0, %v5821_v3  ;;  %944 = vmatprep.subr.bf16.mxu0 %v5480_v2  ;;  %v5488_v8 = vld [vmem:[%s7241_s3 + $0x30] ss:$8 sps:$4 sm:$0xff]   ;;  %v5489_v9 = vld [vmem:[%s7241_s3 + $0x44] ss:$8 sps:$4 sm:$0xff]   ;;  %v5491_v10 = vld [vmem:[%s7241_s3 + $0x40] ss:$8 sps:$4 sm:$0xff]  }
  0x35   : > { %s6014_s26 = scalar_select %p586_p9, %s5940_s28, 1  ;;  %v5492_v11 = vld [vmem:[%s7241_s3 + $0x54] ss:$8 sps:$4 sm:$0xff]   ;;  %v5494_v12 = vld [vmem:[%s7241_s3 + $0x50] ss:$8 sps:$4 sm:$0xff]   ;;  %v6066_v23 = vld [vmem:[%s7243_s5] sm:$0xff]  }
  0x36   : > { %v5495_v13 = vld [vmem:[%s7241_s3 + $0x64] ss:$8 sps:$4 sm:$0xff]   ;;  %v5497_v15 = vld [vmem:[%s7241_s3 + $0x60] ss:$8 sps:$4 sm:$0xff]   ;;  %v5498_v16 = vld [vmem:[%s7241_s3 + $0x74] ss:$8 sps:$4 sm:$0xff]   ;;  %5154 = vmatpush3.bf16.msra.mxu1 %v6066_v23 }
  0x37   : > { %945 = vmatpush1.bf16.msra.mxu0 %v5482_v4  ;;  %s5419_s29 = smul.u32 48, %s6014_s26  ;;  %v5500_v17 = vld [vmem:[%s7241_s3 + $0x70] ss:$8 sps:$4 sm:$0xff]   ;;  %v5501_v18 = vld [vmem:[%s7241_s3 + $0x84] ss:$8 sps:$4 sm:$0xff]   ;;  %s5055_s24 = sshll.u32 %s6014_s26, 3  ;;  %5155 = vmatprep.subr.bf16.mxu1 %v5821_v3 }
  0x38   : > { %946 = vmatprep.subr.bf16.mxu0 %v5483_v5  ;;  %v5503_v19 = vld [vmem:[%s7241_s3 + $0x80] ss:$8 sps:$4 sm:$0xff]   ;;  %v5504_v20 = vld [vmem:[%s7241_s3 + $0x94] ss:$8 sps:$4 sm:$0xff]   ;;  %v5506_v21 = vld [vmem:[%s7241_s3 + $0x90] ss:$8 sps:$4 sm:$0xff]  }
  0x39   : > { %s6032_s22 = scalar_lea.vmem %s7278_s14, %s5419_s29  ;;  %v5507_v22 = vld [vmem:[%s7241_s3 + $0xa4] ss:$8 sps:$4 sm:$0xff]   ;;  %s5054_s23 = sshll.u32 %s6014_s26, 2  ;;  %v5509_v25 = vld [vmem:[%s7241_s3 + $0xa0] ss:$8 sps:$4 sm:$0xff]   ;;  %vm1086_vm1 = vcmask 261120  }
  0x3a   : > { %v5527_v14 = vld [vmem:[%s6032_s22 + $0x4] ss:$12 sps:$4 sm:$0xff]   ;;  %v6073_v24 = vld [vmem:[%s7243_s5 + $0x8] sm:$0xff]   ;;  %s7279_s2 = sld [smem:[#allocation18_spill]]  ;;  %s7280_s14 = sld [smem:[#allocation17_spill]]  ;;  %v5824_v52 = vmov 0  }
  0x3b   : > { %947 = vmatpush1.bf16.msra.mxu0 %v5485_v6  ;;  %974 = vmatprep.mubr.bf16.mxu0 %v5527_v14  ;;  %v5510_v26 = vld [vmem:[%s7241_s3 + $0xb4] ss:$8 sps:$4 sm:$0xff]   ;;  %v5512_v27 = vld [vmem:[%s7241_s3 + $0xb0] ss:$8 sps:$4 sm:$0xff]   ;;  %v5513_v29 = vld [vmem:[%s7241_s3 + $0xc4] ss:$8 sps:$4 sm:$0xff]  }
  0x3c   : > { %948 = vmatprep.subr.bf16.mxu0 %v5486_v7  ;;  %5156 = vmatpush3.bf16.msra.mxu1 %v6073_v24  ;;  %v6101_v31 = vld [vmem:[%s7244_s6] sm:$0xff]   ;;  %s5823_s20 = smov 32   ;;  %v6108_v32 = vld [vmem:[%s7244_s6 + $0x8] sm:$0xff]   ;;  %v5516_v34 = vld [vmem:[%s7241_s3 + $0xd4] ss:$8 sps:$4 sm:$0xff]   ;;  %s5825_s29 = smov 64  }
  0x3d   : > { %5161 = vmatprep.subr.bf16.mxu1 %v5821_v3  ;;  %v5515_v33 = vld [vmem:[%s7241_s3 + $0xc0] ss:$8 sps:$4 sm:$0xff]   ;;  %v5518_v36 = vld [vmem:[%s7241_s3 + $0xd0] ss:$8 sps:$4 sm:$0xff]   ;;  %v5519_v37 = vld [vmem:[%s7241_s3 + $0xe4] ss:$8 sps:$4 sm:$0xff]  }
  0x3e   : > { %v5521_v38 = vld [vmem:[%s7241_s3 + $0xe0] ss:$8 sps:$4 sm:$0xff]   ;;  %v5522_v39 = vld [vmem:[%s7241_s3 + $0xf4] ss:$8 sps:$4 sm:$0xff]   ;;  %v5524_v40 = vld [vmem:[%s7241_s3 + $0xf0] ss:$8 sps:$4 sm:$0xff]  }
  0x3f   : > { %949 = vmatpush1.bf16.msra.mxu0 %v5488_v8  ;;  %v5530_v41 = vld [vmem:[%s7241_s3 + $0x104] ss:$8 sps:$4 sm:$0xff]   ;;  %v5528_v43 = vld [vmem:[%s7241_s3 + $0x100] ss:$8 sps:$4 sm:$0xff]   ;;  %v5533_v45 = vld [vmem:[%s7241_s3 + $0x114] ss:$8 sps:$4 sm:$0xff]   ;;  %v660_v8 = vlaneseq }
  0x40   : > { %950 = vmatprep.subr.bf16.mxu0 %v5489_v9  ;;  %s6078_s18 = scalar_lea.vmem %s7279_s2, %s5055_s24  ;;  %s595_s17 = scalar_lea.vmem %s7280_s14, %s5054_s23  ;;  %v5525_v42 = vld [vmem:[%s6032_s22] ss:$12 sps:$4 sm:$0xff]   ;;  %v5546_v44 = vld [vmem:[%s6032_s22 + $0x1c] ss:$12 sps:$4 sm:$0xff]   ;;  %v5531_v46 = vld [vmem:[%s7241_s3 + $0x110] ss:$8 sps:$4 sm:$0xff]  }
  0x41   : > { %v1066_v28 = vld [vmem:[%s6078_s18] sm:$0xf]  ;;  %v5536_v47 = vld [vmem:[%s7241_s3 + $0x124] ss:$8 sps:$4 sm:$0xff]   ;;  %v5539_v50 = vld [vmem:[%s7241_s3 + $0x134] ss:$8 sps:$4 sm:$0xff]  }
  0x42   : > { %v1064_v30 = vld [vmem:[%s595_s17] sm:$0x3]  ;;  %1143 = vrot.lane.b32.xlu1 %v1066_v28, %s5823_s20  ;;  %v1065_v35 = vld [vmem:[%s595_s17 + $0x2] sm:$0x3]  ;;  %v5548_v48 = vld [vmem:[%s6032_s22 + $0x18] ss:$12 sps:$4 sm:$0xff]  }
  0x43   : > { %951 = vmatpush1.bf16.msra.mxu0 %v5491_v10  ;;  %5158 = vmatmul.mubr.msk.bf16.vlgmr.msra.gmra.mrb[0].mxu1 %vm1086_vm1, %v1064_v30  ;;  %v5534_v49 = vld [vmem:[%s7241_s3 + $0x120] ss:$8 sps:$4 sm:$0xff]   ;;  %v5537_v51 = vld [vmem:[%s7241_s3 + $0x130] ss:$8 sps:$4 sm:$0xff]   ;;  %v5542_v53 = vld [vmem:[%s7241_s3 + $0x144] ss:$8 sps:$4 sm:$0xff]  }
  0x44   : > { %952 = vmatprep.subr.bf16.mxu0 %v5492_v11  ;;  %5162 = vmatpush3.bf16.msra.mxu1 %v6101_v31  ;;  %v5540_v54 = vld [vmem:[%s7241_s3 + $0x140] ss:$8 sps:$4 sm:$0xff]   ;;  %v5545_v55 = vld [vmem:[%s7241_s3 + $0x154] ss:$8 sps:$4 sm:$0xff]   ;;  %v5543_v56 = vld [vmem:[%s7241_s3 + $0x150] ss:$8 sps:$4 sm:$0xff]  }
  0x45   : > { %5165 = vmatprep.mubr.msk.bf16.mxu1 %vm5822_vm0, %v5821_v3  ;;  %5163 = vmatprep.subr.bf16.mxu1 %v5821_v3  ;;  %v5551_v57 = vld [vmem:[%s7241_s3 + $0x164] ss:$8 sps:$4 sm:$0xff]   ;;  %v5549_v58 = vld [vmem:[%s7241_s3 + $0x160] ss:$8 sps:$4 sm:$0xff]   ;;  %v5554_v59 = vld [vmem:[%s7241_s3 + $0x174] ss:$8 sps:$4 sm:$0xff]  }
  0x46   : > { %v5552_v60 = vld [vmem:[%s7241_s3 + $0x170] ss:$8 sps:$4 sm:$0xff]   ;;  %v5555_v61 = vld [vmem:[%s6032_s22 + $0x8] ss:$12 sps:$4 sm:$0xff]   ;;  %v5558_v62 = vld [vmem:[%s6032_s22 + $0x20] ss:$12 sps:$4 sm:$0xff]  }
  0x47   : > { %953 = vmatpush1.bf16.msra.mxu0 %v5494_v12  ;;  %v6205_v9 = vshrl.u32 %v660_v8, 7  ;;  %v658_v11 = vld [vmem:[%s7242_s4] sm:$0x3]  ;;  %vm1309_vm5 = vcmask 253952   ;;  %vm1368_vm6 = vcmask 516352   ;;  %vm3383_vm7 = vcmask 523264  }
  0x48   : > { %954 = vmatprep.subr.bf16.mxu0 %v5495_v13  ;;  %5164 = vmatpush3.bf16.msra.mxu1 %v6108_v32  ;;  %vm3639_vm8 = vcmask 1043456   ;;  %vm3539_vm9 = vcmask 64512   ;;  %s5827_s2 = smov 96   ;;  %s4528_s14 = sld [smem:[#allocation4]]  ;;  %vm4698_vm10 = vcmask 1041409   ;;  %vm4700_vm11 = vcmask 1042434  }
  0x49   : > { %5169 = vmatprep.subr.bf16.mxu1 %v5821_v3  ;;  %v6208_v10 = vsub.s32 0, %v6205_v9  ;;  %v666_v12 = vsub.s32 1, %v6205_v9  ;;  %vm4702_vm12 = vcmask 1043459   ;;  %s5051_s21 = sshll.u32 %s5940_s28, 6  ;;  %vm4772_vm13 = vcmask 60416   ;;  %s7283_s23 = sld [smem:[#allocation20_spill]] }
  0x4b   : > { %955 = vmatpush1.bf16.msra.mxu0 %v5497_v15  ;;  %5166 = vmatmul.mubr.msk.bf16.vlgmr.msra.gmra.mrb[4].mxu1 %vm1086_vm1, %v1065_v35  ;;  %v663_v13 = vrot.slane %v658_v11, %v6208_v10  ;;  %v667_v14 = vrot.slane %v658_v11, %v666_v12 }
  0x4c   : > { %956 = vmatprep.subr.bf16.mxu0 %v5498_v16  ;;  %5170 = vmatpush3.bf16.msra.mxu1 %v6066_v23 }
  0x4d   : > { %5173 = vmatprep.mubr.msk.bf16.mxu1 %vm5822_vm0, %v5821_v3  ;;  %5171 = vmatprep.subr.bf16.mxu1 %v5821_v3 }
  0x4f   : > { %957 = vmatpush1.bf16.msra.mxu0 %v5500_v17  ;;  %s7196_s22 = scalar_lea.hbm %s7283_s23, %s5051_s21 }
  0x50   : > { %958 = vmatprep.subr.bf16.mxu0 %v5501_v18  ;;  %5172 = vmatpush3.bf16.msra.mxu1 %v6073_v24 }
  0x51   : > { %5177 = vmatprep.subr.bf16.mxu1 %v5821_v3 }
  0x53   : > { %959 = vmatpush1.bf16.msra.mxu0 %v5503_v19 }
  0x54   : > { %960 = vmatprep.subr.bf16.mxu0 %v5504_v20 }
  0x57   : > { %961 = vmatpush1.bf16.msra.mxu0 %v5506_v21 }
  0x58   : > { %962 = vmatprep.subr.bf16.mxu0 %v5507_v22 }
  0x5b   : > { %963 = vmatpush1.bf16.msra.mxu0 %v5509_v25  ;;  %v1069_v25 = vand.u32 127, %v660_v8 }
  0x5c   : > { %964 = vmatprep.subr.bf16.mxu0 %v5510_v26 }
  0x5d   : > { %vm1070_vm2 = vcmp.ge.s32.totalorder %v1069_v25, 64  ;;  %vm1071_vm3 = vcmp.lt.s32.totalorder %v1069_v25, 96 }
  0x5e   : > { %vm6215_vm4 = vmand %vm1070_vm2, %vm1071_vm3 }
  0x5f   : > { %965 = vmatpush1.bf16.msra.mxu0 %v5512_v27 }
  0x60   : > { %966 = vmatprep.subr.bf16.mxu0 %v5513_v29 }
  0x63   : > { %967 = vmatpush1.bf16.msra.mxu0 %v5515_v33 }
  0x64   : > { %968 = vmatprep.subr.bf16.mxu0 %v5516_v34 }
  0x67   : > { %969 = vmatpush1.bf16.msra.mxu0 %v5518_v36 }
  0x68   : > { %970 = vmatprep.subr.bf16.mxu0 %v5519_v37 }
  0x6b   : > { %971 = vmatpush1.bf16.msra.mxu0 %v5521_v38 }
  0x6c   : > { %972 = vmatprep.subr.bf16.mxu0 %v5522_v39 }
  0x6f   : > { %973 = vmatpush1.bf16.msra.mxu0 %v5524_v40 }
  0x70   : > { %995 = vmatprep.subr.bf16.mxu0 %v5530_v41 }
  0x72   : > { %975 = vmatmul.mubr.bf16.vlgmr.msra.gmra.mrb[0].mxu0 %v5525_v42 }
  0x73   : > { %996 = vmatpush1.bf16.msra.mxu0 %v5528_v43  ;;  %984 = vmatprep.mubr.bf16.mxu0 %v5546_v44 }
  0x74   : > { %997 = vmatprep.subr.bf16.mxu0 %v5533_v45 }
  0x77   : > { %998 = vmatpush1.bf16.msra.mxu0 %v5531_v46 }
  0x78   : > { %999 = vmatprep.subr.bf16.mxu0 %v5536_v47 }
  0x7a   : > { %985 = vmatmul.mubr.bf16.gmra.mrb[4].mxu0 %v5548_v48 }
  0x7b   : > { %1000 = vmatpush1.bf16.msra.mxu0 %v5534_v49  ;;  %1027 = vmatprep.mubr.bf16.mxu0 %v5824_v52 }
  0x7c   : > { %1001 = vmatprep.subr.bf16.mxu0 %v5539_v50 }
  0x7f   : > { %1002 = vmatpush1.bf16.msra.mxu0 %v5537_v51 }
  0x80   : > { %1003 = vmatprep.subr.bf16.mxu0 %v5542_v53 }
  0x83   : > { %1004 = vmatpush1.bf16.msra.mxu0 %v5540_v54 }
  0x84   : > { %1005 = vmatprep.subr.bf16.mxu0 %v5545_v55 }
  0x87   : > { %1006 = vmatpush1.bf16.msra.mxu0 %v5543_v56 }
  0x88   : > { %1007 = vmatprep.subr.bf16.mxu0 %v5551_v57 }
  0x8b   : > { %1008 = vmatpush1.bf16.msra.mxu0 %v5549_v58  ;;  %v1067_v58 = vld [vmem:[%s6078_s18 + $0x4] sm:$0xf]  ;;  %s5828_s18 = smov [#allocation7]  }
  0x8c   : > { %1009 = vmatprep.subr.bf16.mxu0 %v5554_v59 }
  0x8f   : > { %1010 = vmatpush1.bf16.msra.mxu0 %v5552_v60 }
  0x90   : > { %5257 = vmatprep.subr.bf16.mxu0 %v5821_v3 }
  0x92   : > { %1028 = vmatmul.mubr.bf16.vlgmr.msra.gmra.mrb[0].mxu0 %v5555_v61  ;;  %v1235_v61 = vrot.slane %v1067_v58, 4 }
  0x93   : > { %1037 = vmatprep.mubr.bf16.mxu0 %v5824_v52  ;;  %5258 = vmatpush3.bf16.msra.mxu0 %v6101_v31 }
  0x94   : > { %5259 = vmatprep.subr.bf16.mxu0 %v5821_v3 }
  0x97   : > { %5260 = vmatpush3.bf16.msra.mxu0 %v6108_v32 }
  0x98   : > { %5273 = vmatprep.subr.bf16.mxu0 %v5821_v3 }
  0x9a   : > { %1038 = vmatmul.mubr.bf16.gmra.mrb[4].mxu0 %v5558_v62 }
  0x9b   : > { %5261 = vmatprep.mubr.msk.bf16.mxu0 %vm5822_vm0, %v5821_v3 }
 0x116   : > { %v1124_v63 = vpop.f32.mrb[0].mxu1 }
 0x117   : > { %v5159_v0 = vpop.f32.mrb[1].mxu1 }
 0x118   : > { %v1127_v1 = vpop.f32.mrb[2].mxu1 }
 0x119   : > { %v5160_v2 = vpop.f32.mrb[3].mxu1 }
 0x11a   : > { %v1144_v2 = vpop.permute.xlu1 %1143 }
 0x11e   : > { %v1213_v4 = vpop.f32.mrb[4].mxu1 }
 0x11f   : > { %v5167_v5 = vpop.f32.mrb[5].mxu1  ;;  %v1220_v42 = vrot.slane %v1213_v4, 4 }
 0x120   : > { %v1216_v6 = vpop.f32.mrb[6].mxu1 }
 0x121   : > { %v5168_v7 = vpop.f32.mrb[7].mxu1 }
 0x165   : > { %v1029_v15 = vpop.f32.mrb[0].mxu0 }
 0x166   : > { %v5401_v16 = vadd.f32 %v1029_v15, %v663_v13  ;;  %v1031_v17 = vpop.f32.mrb[1].mxu0 }
 0x167   : > { %v5402_v18 = vadd.f32 %v1031_v17, %v667_v14  ;;  %v1033_v19 = vpop.f32.mrb[2].mxu0 }
 0x168   : > { %1048 = vst [vmem:[#allocation2] sm:$0xff] %v5401_v16  ;;  %v5403_v20 = vadd.f32 %v1033_v19, %v663_v13  ;;  %v1035_v21 = vpop.f32.mrb[3].mxu0 }
 0x169   : > { %1049 = vst [vmem:[#allocation2 + $0x8] sm:$0xff] %v5402_v18  ;;  %v5404_v22 = vadd.f32 %v1035_v21, %v667_v14 }
 0x16a   : > { %1050 = vst [vmem:[#allocation2 + $0x10] sm:$0xff] %v5403_v20 }
 0x16b   : > { %1051 = vst [vmem:[#allocation2 + $0x18] sm:$0xff] %v5404_v22 }
 0x16d   : > { %v1039_v26 = vpop.f32.mrb[4].mxu0 }
 0x16e   : > { %v5405_v27 = vadd.f32 %v1039_v26, %v663_v13  ;;  %v1041_v28 = vpop.f32.mrb[5].mxu0 }
 0x16f   : > { %v1073_v29 = vld [vmem:[#allocation2] sm:$0xf]  ;;  %v5406_v30 = vadd.f32 %v1041_v28, %v667_v14  ;;  %v1043_v33 = vpop.f32.mrb[6].mxu0 }
 0x170   : > { %1052 = vst [vmem:[#allocation2 + $0x20] sm:$0xff] %v5405_v27  ;;  %v1130_v34 = vadd.f32 %v1124_v63, %v1073_v29  ;;  %v5407_v35 = vadd.f32 %v1043_v33, %v663_v13  ;;  %v1045_v36 = vpop.f32.mrb[7].mxu0  ;;  %v1375_v29 = vld [vmem:[#allocation2] sm:$0xf0] }
 0x171   : > { %1053 = vst [vmem:[#allocation2 + $0x28] sm:$0xff] %v5406_v30  ;;  %v5408_v38 = vadd.f32 %v1045_v36, %v667_v14 }
 0x172   : > { %v1131_v39 = vmul.f32 2.0, %v1130_v34  ;;  %1054 = vst [vmem:[#allocation2 + $0x30] sm:$0xff] %v5407_v35 }
 0x173   : > { %1055 = vst [vmem:[#allocation2 + $0x38] sm:$0xff] %v5408_v38 }
 0x174   : > { %v1132_v40 = vsel %vm6215_vm4, %v1131_v39, %v1130_v34 }
 0x175   : > { %v4952_v41 = vmul.f32 -1.442695, %v1132_v40 }
 0x177   : > { %5573 = vpow2.f32 %v4952_v41 }
 0x17a   : > { %v1163_v43 = vld [vmem:[#allocation2 + $0x38] sm:$0xf0]  ;;  %v1457_v39 = vld [vmem:[#allocation2 + $0x38] sm:$0xf] }
 0x17b   : > { %v1222_v44 = vadd.f32 %v1220_v42, %v1163_v43 }
 0x17d   : > { %v1223_v45 = vmul.f32 2.0, %v1222_v44 }
 0x17f   : > { %v1224_v46 = vsel %vm6215_vm4, %v1223_v45, %v1222_v44 }
 0x180   : > { %v4957_v47 = vmul.f32 -1.442695, %v1224_v46 }
 0x181   : > { %v5574_v48 = vpop.eup %5573 }
 0x182   : > { %v1136_v49 = vadd.f32 1.0, %v5574_v48  ;;  %5575 = vpow2.f32 %v4957_v47 }
 0x184   : > { %5577 = vrcp.f32 %v1136_v49 }
 0x18c   : > { %v5576_v50 = vpop.eup %5575 }
 0x18d   : > { %v1228_v51 = vadd.f32 1.0, %v5576_v50 }
 0x18e   : > { %v5578_v52 = vpop.eup %5577 }
 0x18f   : > { %5579 = vrcp.f32 %v1228_v51  ;;  %v1139_v53 = vmul.f32 2.0, %v5578_v52 }
 0x191   : > { %v4953_v54 = vadd.f32 -1.0, %v1139_v53 }
 0x193   : > { %v1141_v55 = vsel %vm6215_vm4, %v4953_v54, %v5578_v52 }
 0x194   : > { %1148 = vrot.lane.b32.xlu0 %v1141_v55, %s5825_s29  ;;  %v1146_v4 = vmul.f32 %v1144_v2, %v1141_v55 }
 0x199   : > { %v5580_v56 = vpop.eup %5579 }
 0x19a   : > { %v1231_v57 = vmul.f32 2.0, %v5580_v56 }
 0x19c   : > { %v4958_v59 = vadd.f32 -1.0, %v1231_v57 }
 0x19e   : > { %v1233_v60 = vsel %vm6215_vm4, %v4958_v59, %v5580_v56 }
 0x19f   : > { %1241 = vrot.lane.b32.xlu0 %v1233_v60, %s5825_s29 }
 0x1a3   : > { %1236 = vrot.lane.b32.xlu0 %v1235_v61, %s5823_s20 }
 0x206   : > { %v1149_v62 = vpop.permute.xlu0 %1148 }
 0x207   : > { %v1151_v63 = vmul.f32 %v1149_v62, %v1141_v55 }
 0x209   : > { %1153 = vrot.lane.b32.xlu1 %v1151_v63, %s5823_s20 }
 0x211   : > { %v1242_v0 = vpop.permute.xlu0 %1241 }
 0x212   : > { %v1244_v1 = vmul.f32 %v1242_v0, %v1233_v60 }
 0x214   : > { %1246 = vrot.lane.b32.xlu1 %v1244_v1, %s5823_s20 }
 0x215   : > { %v1237_v7 = vpop.permute.xlu0 %1236 }
 0x216   : > { %v1239_v8 = vmul.f32 %v1237_v7, %v1233_v60 }
 0x27b   : > { %v1154_v5 = vpop.permute.xlu1 %1153 }
 0x27c   : > { %v6233_v6 = vadd.f32 %v1154_v5, %v1146_v4 }
 0x27e   : > { %5581 = vtanh.f32 %v6233_v6  ;;  %v1438_v0 = vrot.slane %v6233_v6, 4 }
 0x286   : > { %v1247_v11 = vpop.permute.xlu1 %1246 }
 0x287   : > { %v6236_v12 = vadd.f32 %v1247_v11, %v1239_v8 }
 0x288   : > { %v5582_v13 = vpop.eup %5581 }
 0x289   : > { %5583 = vtanh.f32 %v6236_v12  ;;  %1159 = vrot.lane.b32.xlu0 %v5582_v13, %s5825_s29  ;;  %v1518_v5 = vrot.slane %v6236_v12, 4 }
 0x293   : > { %v5584_v14 = vpop.eup %5583 }
 0x294   : > { %1252 = vrot.lane.b32.xlu1 %v5584_v14, %s5825_s29 }
 0x2fb   : > { %v1160_v15 = vpop.permute.xlu0 %1159 }
 0x2fc   : > { %v6241_v16 = vmul.f32 %v1160_v15, %v1141_v55 }
 0x2fe   : > { %v1373_v17 = vpack.c.bf16 %v6241_v16, %v6241_v16 }
 0x300   : > { %1377 = vrot.lane.b32.xlu0 %v1373_v17, %s5823_s20 }
 0x306   : > { %v1253_v18 = vpop.permute.xlu1 %1252 }
 0x307   : > { %v6246_v19 = vmul.f32 %v1253_v18, %v1233_v60 }
 0x309   : > { %v1374_v20 = vpack.c.bf16 %v6246_v19, %v6246_v19 }
 0x30b   : > { %v1459_v21 = vrot.slane %v1374_v20, 2 }
 0x30d   : > { %1460 = vrot.lane.b32.xlu1 %v1459_v21, %s5823_s20 }
 0x372   : > { %v1378_v22 = vpop.permute.xlu0 %1377 }
 0x373   : > { %5174 = vmatmul.mubr.msk.bf16.vlgmr.msra.gmra.mrb[8].mxu1 %vm1086_vm1, %v1378_v22 }
 0x374   : > { %5178 = vmatpush3.bf16.msra.mxu1 %v6101_v31  ;;  %5181 = vmatprep.mubr.msk.bf16.mxu1 %vm5822_vm0, %v5821_v3 }
 0x375   : > { %5179 = vmatprep.subr.bf16.mxu1 %v5821_v3 }
 0x378   : > { %5180 = vmatpush3.bf16.msra.mxu1 %v6108_v32 }
 0x379   : > { %5185 = vmatprep.subr.bf16.mxu1 %v5821_v3 }
 0x37f   : > { %v1461_v25 = vpop.permute.xlu1 %1460 }
 0x380   : > { %5182 = vmatmul.mubr.msk.bf16.vlgmr.msra.gmra.mrb[12].mxu1 %vm1086_vm1, %v1461_v25 }
 0x381   : > { %5186 = vmatpush3.bf16.msra.mxu1 %v6066_v23  ;;  %5189 = vmatprep.mubr.msk.bf16.mxu1 %vm5822_vm0, %v5821_v3 }
 0x382   : > { %5187 = vmatprep.subr.bf16.mxu1 %v5821_v3 }
 0x385   : > { %5188 = vmatpush3.bf16.msra.mxu1 %v6073_v24 }
 0x386   : > { %5193 = vmatprep.subr.bf16.mxu1 %v5821_v3 }
 0x446   : > { %v1416_v26 = vpop.f32.mrb[8].mxu1 }
 0x447   : > { %v1423_v27 = vrot.slane %v1416_v26, 4  ;;  %v5175_v28 = vpop.f32.mrb[9].mxu1  ;;  %v1654_v26 = vld [vmem:[#allocation2 + $0x10] sm:$0xf] }
 0x448   : > { %v1419_v30 = vpop.f32.mrb[10].mxu1 }
 0x449   : > { %v1425_v33 = vadd.f32 %v1423_v27, %v1375_v29  ;;  %v5176_v34 = vpop.f32.mrb[11].mxu1 }
 0x44b   : > { %v1426_v35 = vmul.f32 2.0, %v1425_v33 }
 0x44d   : > { %v1427_v36 = vsel %vm6215_vm4, %v1426_v35, %v1425_v33 }
 0x44e   : > { %v4960_v38 = vmul.f32 -1.442695, %v1427_v36 }
 0x450   : > { %5585 = vpow2.f32 %v4960_v38 }
 0x453   : > { %v1499_v40 = vpop.f32.mrb[12].mxu1 }
 0x454   : > { %v1505_v41 = vadd.f32 %v1499_v40, %v1457_v39  ;;  %v5183_v42 = vpop.f32.mrb[13].mxu1 }
 0x455   : > { %v1502_v43 = vpop.f32.mrb[14].mxu1 }
 0x456   : > { %v1506_v44 = vmul.f32 2.0, %v1505_v41  ;;  %v5184_v45 = vpop.f32.mrb[15].mxu1 }
 0x458   : > { %v1507_v46 = vsel %vm6215_vm4, %v1506_v44, %v1505_v41  ;;  %v1734_v41 = vld [vmem:[#allocation2 + $0x28] sm:$0xf0] }
 0x459   : > { %v4963_v47 = vmul.f32 -1.442695, %v1507_v46 }
 0x45a   : > { %v5586_v48 = vpop.eup %5585 }
 0x45b   : > { %v1431_v49 = vadd.f32 1.0, %v5586_v48  ;;  %5587 = vpow2.f32 %v4963_v47 }
 0x45d   : > { %5589 = vrcp.f32 %v1431_v49 }
 0x465   : > { %v5588_v50 = vpop.eup %5587 }
 0x466   : > { %v1511_v51 = vadd.f32 1.0, %v5588_v50 }
 0x467   : > { %v5590_v52 = vpop.eup %5589 }
 0x468   : > { %5591 = vrcp.f32 %v1511_v51  ;;  %v1434_v53 = vmul.f32 2.0, %v5590_v52 }
 0x46a   : > { %v4961_v54 = vadd.f32 -1.0, %v1434_v53 }
 0x46c   : > { %v1436_v55 = vsel %vm6215_vm4, %v4961_v54, %v5590_v52 }
 0x46d   : > { %1442 = vrot.lane.b32.xlu0 %v1436_v55, %s5825_s29  ;;  %v1440_v1 = vmul.f32 %v1438_v0, %v1436_v55 }
 0x472   : > { %v5592_v56 = vpop.eup %5591 }
 0x473   : > { %v1514_v57 = vmul.f32 2.0, %v5592_v56 }
 0x475   : > { %v4964_v58 = vadd.f32 -1.0, %v1514_v57 }
 0x477   : > { %v1516_v59 = vsel %vm6215_vm4, %v4964_v58, %v5592_v56 }
 0x478   : > { %1522 = vrot.lane.b32.xlu1 %v1516_v59, %s5825_s29  ;;  %v1520_v7 = vmul.f32 %v1518_v5, %v1516_v59 }
 0x4df   : > { %v1443_v60 = vpop.permute.xlu0 %1442 }
 0x4e0   : > { %v1445_v61 = vmul.f32 %v1443_v60, %v1436_v55 }
 0x4e2   : > { %1447 = vrot.lane.b32.xlu0 %v1445_v61, %s5823_s20 }
 0x4ea   : > { %v1523_v62 = vpop.permute.xlu1 %1522 }
 0x4eb   : > { %v1525_v63 = vmul.f32 %v1523_v62, %v1516_v59 }
 0x4ed   : > { %1527 = vrot.lane.b32.xlu1 %v1525_v63, %s5823_s20 }
 0x554   : > { %v1448_v2 = vpop.permute.xlu0 %1447 }
 0x555   : > { %v6278_v4 = vadd.f32 %v1448_v2, %v1440_v1 }
 0x557   : > { %5593 = vtanh.f32 %v6278_v4  ;;  %v1715_v0 = vrot.slane %v6278_v4, 4 }
 0x55f   : > { %v1528_v8 = vpop.permute.xlu1 %1527 }
 0x560   : > { %v6282_v11 = vadd.f32 %v1528_v8, %v1520_v7 }
 0x561   : > { %v5594_v13 = vpop.eup %5593 }
 0x562   : > { %5595 = vtanh.f32 %v6282_v11  ;;  %1453 = vrot.lane.b32.xlu0 %v5594_v13, %s5825_s29  ;;  %v1797_v7 = vrot.slane %v6282_v11, 4 }
 0x56c   : > { %v5596_v14 = vpop.eup %5595 }
 0x56d   : > { %1533 = vrot.lane.b32.xlu1 %v5596_v14, %s5825_s29 }
 0x5d4   : > { %v1454_v6 = vpop.permute.xlu0 %1453 }
 0x5d5   : > { %v6287_v15 = vmul.f32 %v1454_v6, %v1436_v55 }
 0x5d7   : > { %v1652_v17 = vpack.c.bf16 %v6287_v15, %v6287_v15 }
 0x5d9   : > { %v1656_v18 = vrot.slane %v1652_v17, 2 }
 0x5db   : > { %1657 = vrot.lane.b32.xlu0 %v1656_v18, %s5823_s20 }
 0x5df   : > { %v1534_v12 = vpop.permute.xlu1 %1533 }
 0x5e0   : > { %v6292_v20 = vmul.f32 %v1534_v12, %v1516_v59 }
 0x5e2   : > { %v1653_v21 = vpack.c.bf16 %v6292_v20, %v6292_v20 }
 0x5e4   : > { %1736 = vrot.lane.b32.xlu1 %v1653_v21, %s5823_s20 }
 0x64d   : > { %v1658_v22 = vpop.permute.xlu0 %1657 }
 0x64e   : > { %5190 = vmatmul.mubr.msk.bf16.vlgmr.msra.gmra.mrb[16].mxu1 %vm1086_vm1, %v1658_v22 }
 0x64f   : > { %5194 = vmatpush3.bf16.msra.mxu1 %v6101_v31  ;;  %5197 = vmatprep.mubr.msk.bf16.mxu1 %vm5822_vm0, %v5821_v3 }
 0x650   : > { %5195 = vmatprep.subr.bf16.mxu1 %v5821_v3 }
 0x653   : > { %5196 = vmatpush3.bf16.msra.mxu1 %v6108_v32 }
 0x654   : > { %5201 = vmatprep.subr.bf16.mxu1 %v5821_v3 }
 0x656   : > { %v1737_v25 = vpop.permute.xlu1 %1736 }
 0x657   : > { %5198 = vmatmul.mubr.msk.bf16.vlgmr.msra.gmra.mrb[20].mxu1 %vm1086_vm1, %v1737_v25 }
 0x658   : > { %5202 = vmatpush3.bf16.msra.mxu1 %v6066_v23  ;;  %5205 = vmatprep.mubr.msk.bf16.mxu1 %vm5822_vm0, %v5821_v3 }
 0x659   : > { %5203 = vmatprep.subr.bf16.mxu1 %v5821_v3 }
 0x65c   : > { %5204 = vmatpush3.bf16.msra.mxu1 %v6073_v24 }
 0x65d   : > { %5209 = vmatprep.subr.bf16.mxu1 %v5821_v3 }
 0x721   : > { %v1696_v27 = vpop.f32.mrb[16].mxu1 }
 0x722   : > { %v1702_v28 = vadd.f32 %v1696_v27, %v1654_v26  ;;  %v5191_v29 = vpop.f32.mrb[17].mxu1 }
 0x723   : > { %v1699_v30 = vpop.f32.mrb[18].mxu1 }
 0x724   : > { %v1703_v33 = vmul.f32 2.0, %v1702_v28  ;;  %v5192_v34 = vpop.f32.mrb[19].mxu1 }
 0x726   : > { %v1704_v35 = vsel %vm6215_vm4, %v1703_v33, %v1702_v28  ;;  %v1933_v33 = vld [vmem:[#allocation2 + $0x10] sm:$0xf0] }
 0x727   : > { %v4966_v36 = vmul.f32 -1.442695, %v1704_v35 }
 0x729   : > { %5597 = vpow2.f32 %v4966_v36 }
 0x72a   : > { %v1775_v38 = vpop.f32.mrb[20].mxu1 }
 0x72b   : > { %v1782_v39 = vrot.slane %v1775_v38, 4  ;;  %v5199_v40 = vpop.f32.mrb[21].mxu1 }
 0x72c   : > { %v1778_v42 = vpop.f32.mrb[22].mxu1 }
 0x72d   : > { %v1784_v43 = vadd.f32 %v1782_v39, %v1734_v41  ;;  %v5200_v44 = vpop.f32.mrb[23].mxu1  ;;  %v2015_v41 = vld [vmem:[#allocation2 + $0x28] sm:$0xf] }
 0x72f   : > { %v1785_v45 = vmul.f32 2.0, %v1784_v43 }
 0x731   : > { %v1786_v46 = vsel %vm6215_vm4, %v1785_v45, %v1784_v43 }
 0x732   : > { %v4969_v47 = vmul.f32 -1.442695, %v1786_v46 }
 0x733   : > { %v5598_v48 = vpop.eup %5597 }
 0x734   : > { %v1708_v49 = vadd.f32 1.0, %v5598_v48  ;;  %5599 = vpow2.f32 %v4969_v47 }
 0x736   : > { %5601 = vrcp.f32 %v1708_v49 }
 0x73e   : > { %v5600_v50 = vpop.eup %5599 }
 0x73f   : > { %v1790_v51 = vadd.f32 1.0, %v5600_v50 }
 0x740   : > { %v5602_v52 = vpop.eup %5601 }
 0x741   : > { %5603 = vrcp.f32 %v1790_v51  ;;  %v1711_v53 = vmul.f32 2.0, %v5602_v52 }
 0x743   : > { %v4967_v54 = vadd.f32 -1.0, %v1711_v53 }
 0x745   : > { %v1713_v55 = vsel %vm6215_vm4, %v4967_v54, %v5602_v52 }
 0x746   : > { %1719 = vrot.lane.b32.xlu0 %v1713_v55, %s5825_s29  ;;  %v1717_v1 = vmul.f32 %v1715_v0, %v1713_v55 }
 0x74b   : > { %v5604_v56 = vpop.eup %5603 }
 0x74c   : > { %v1793_v57 = vmul.f32 2.0, %v5604_v56 }
 0x74e   : > { %v4970_v58 = vadd.f32 -1.0, %v1793_v57 }
 0x750   : > { %v1795_v59 = vsel %vm6215_vm4, %v4970_v58, %v5604_v56 }
 0x751   : > { %1801 = vrot.lane.b32.xlu1 %v1795_v59, %s5825_s29  ;;  %v1799_v8 = vmul.f32 %v1797_v7, %v1795_v59 }
 0x7b8   : > { %v1720_v60 = vpop.permute.xlu0 %1719 }
 0x7b9   : > { %v1722_v61 = vmul.f32 %v1720_v60, %v1713_v55 }
 0x7bb   : > { %1724 = vrot.lane.b32.xlu0 %v1722_v61, %s5823_s20 }
 0x7c3   : > { %v1802_v62 = vpop.permute.xlu1 %1801 }
 0x7c4   : > { %v1804_v63 = vmul.f32 %v1802_v62, %v1795_v59 }
 0x7c6   : > { %1806 = vrot.lane.b32.xlu1 %v1804_v63, %s5823_s20 }
 0x82d   : > { %v1725_v2 = vpop.permute.xlu0 %1724 }
 0x82e   : > { %v6324_v5 = vadd.f32 %v1725_v2, %v1717_v1 }
 0x830   : > { %5605 = vtanh.f32 %v6324_v5  ;;  %v1996_v2 = vrot.slane %v6324_v5, 4 }
 0x838   : > { %v1807_v13 = vpop.permute.xlu1 %1806 }
 0x839   : > { %v6328_v14 = vadd.f32 %v1807_v13, %v1799_v8 }
 0x83a   : > { %v5606_v6 = vpop.eup %5605 }
 0x83b   : > { %5607 = vtanh.f32 %v6328_v14  ;;  %1730 = vrot.lane.b32.xlu0 %v5606_v6, %s5825_s29  ;;  %v2076_v6 = vrot.slane %v6328_v14, 4 }
 0x845   : > { %v5608_v17 = vpop.eup %5607 }
 0x846   : > { %1812 = vrot.lane.b32.xlu1 %v5608_v17, %s5825_s29 }
 0x8ad   : > { %v1731_v4 = vpop.permute.xlu0 %1730 }
 0x8ae   : > { %v6333_v18 = vmul.f32 %v1731_v4, %v1713_v55 }
 0x8b0   : > { %v1931_v12 = vpack.c.bf16 %v6333_v18, %v6333_v18 }
 0x8b2   : > { %1935 = vrot.lane.b32.xlu0 %v1931_v12, %s5823_s20 }
 0x8b8   : > { %v1813_v11 = vpop.permute.xlu1 %1812 }
 0x8b9   : > { %v6338_v21 = vmul.f32 %v1813_v11, %v1795_v59 }
 0x8bb   : > { %v1932_v22 = vpack.c.bf16 %v6338_v21, %v6338_v21 }
 0x8bd   : > { %v2017_v25 = vrot.slane %v1932_v22, 2 }
 0x8bf   : > { %2018 = vrot.lane.b32.xlu1 %v2017_v25, %s5823_s20 }
 0x924   : > { %v1936_v26 = vpop.permute.xlu0 %1935 }
 0x925   : > { %5206 = vmatmul.mubr.msk.bf16.vlgmr.msra.gmra.mrb[24].mxu1 %vm1086_vm1, %v1936_v26 }
 0x926   : > { %5210 = vmatpush3.bf16.msra.mxu1 %v6101_v31  ;;  %5213 = vmatprep.mubr.msk.bf16.mxu1 %vm5822_vm0, %v5821_v3 }
 0x927   : > { %5211 = vmatprep.subr.bf16.mxu1 %v5821_v3 }
 0x92a   : > { %5212 = vmatpush3.bf16.msra.mxu1 %v6108_v32 }
 0x92b   : > { %5217 = vmatprep.subr.bf16.mxu1 %v5821_v3 }
 0x931   : > { %v2019_v27 = vpop.permute.xlu1 %2018 }
 0x932   : > { %5214 = vmatmul.mubr.msk.bf16.vlgmr.msra.gmra.mrb[28].mxu1 %vm1086_vm1, %v2019_v27 }
 0x933   : > { %5218 = vmatpush3.bf16.msra.mxu1 %v6066_v23  ;;  %5221 = vmatprep.mubr.msk.bf16.mxu1 %vm5822_vm0, %v5821_v3 }
 0x934   : > { %5219 = vmatprep.subr.bf16.mxu1 %v5821_v3 }
 0x937   : > { %5220 = vmatpush3.bf16.msra.mxu1 %v6073_v24 }
 0x938   : > { %5225 = vmatprep.subr.bf16.mxu1 %v5821_v3 }
 0x9f8   : > { %v1974_v28 = vpop.f32.mrb[24].mxu1 }
 0x9f9   : > { %v1981_v29 = vrot.slane %v1974_v28, 4  ;;  %v5207_v30 = vpop.f32.mrb[25].mxu1 }
 0x9fa   : > { %v1977_v34 = vpop.f32.mrb[26].mxu1 }
 0x9fb   : > { %v1983_v35 = vadd.f32 %v1981_v29, %v1933_v33  ;;  %v5208_v36 = vpop.f32.mrb[27].mxu1 }
 0x9fd   : > { %v1984_v38 = vmul.f32 2.0, %v1983_v35 }
 0x9ff   : > { %v1985_v39 = vsel %vm6215_vm4, %v1984_v38, %v1983_v35 }
 0xa00   : > { %v4972_v40 = vmul.f32 -1.442695, %v1985_v39 }
 0xa02   : > { %5609 = vpow2.f32 %v4972_v40 }
 0xa05   : > { %v2057_v42 = vpop.f32.mrb[28].mxu1 }
 0xa06   : > { %v2063_v43 = vadd.f32 %v2057_v42, %v2015_v41  ;;  %v5215_v44 = vpop.f32.mrb[29].mxu1 }
 0xa07   : > { %v2060_v45 = vpop.f32.mrb[30].mxu1  ;;  %v2292_v44 = vld [vmem:[#allocation2 + $0x18] sm:$0xf0] }
 0xa08   : > { %v2064_v46 = vmul.f32 2.0, %v2063_v43  ;;  %v5216_v47 = vpop.f32.mrb[31].mxu1 }
 0xa0a   : > { %v2065_v48 = vsel %vm6215_vm4, %v2064_v46, %v2063_v43 }
 0xa0b   : > { %v4975_v49 = vmul.f32 -1.442695, %v2065_v48 }
 0xa0c   : > { %v5610_v50 = vpop.eup %5609 }
 0xa0d   : > { %v1989_v51 = vadd.f32 1.0, %v5610_v50  ;;  %5611 = vpow2.f32 %v4975_v49 }
 0xa0f   : > { %5613 = vrcp.f32 %v1989_v51 }
 0xa17   : > { %v5612_v52 = vpop.eup %5611 }
 0xa18   : > { %v2069_v53 = vadd.f32 1.0, %v5612_v52 }
 0xa19   : > { %v5614_v54 = vpop.eup %5613 }
 0xa1a   : > { %5615 = vrcp.f32 %v2069_v53  ;;  %v1992_v55 = vmul.f32 2.0, %v5614_v54 }
 0xa1c   : > { %v4973_v56 = vadd.f32 -1.0, %v1992_v55 }
 0xa1e   : > { %v1994_v57 = vsel %vm6215_vm4, %v4973_v56, %v5614_v54 }
 0xa1f   : > { %2000 = vrot.lane.b32.xlu0 %v1994_v57, %s5825_s29  ;;  %v1998_v7 = vmul.f32 %v1996_v2, %v1994_v57 }
 0xa24   : > { %v5616_v58 = vpop.eup %5615 }
 0xa25   : > { %v2072_v59 = vmul.f32 2.0, %v5616_v58 }
 0xa27   : > { %v4976_v60 = vadd.f32 -1.0, %v2072_v59 }
 0xa29   : > { %v2074_v61 = vsel %vm6215_vm4, %v4976_v60, %v5616_v58 }
 0xa2a   : > { %2080 = vrot.lane.b32.xlu1 %v2074_v61, %s5825_s29  ;;  %v2078_v17 = vmul.f32 %v2076_v6, %v2074_v61 }
 0xa91   : > { %v2001_v62 = vpop.permute.xlu0 %2000 }
 0xa92   : > { %v2003_v63 = vmul.f32 %v2001_v62, %v1994_v57 }
 0xa94   : > { %2005 = vrot.lane.b32.xlu0 %v2003_v63, %s5823_s20 }
 0xa9c   : > { %v2081_v0 = vpop.permute.xlu1 %2080 }
 0xa9d   : > { %v2083_v1 = vmul.f32 %v2081_v0, %v2074_v61 }
 0xa9f   : > { %2085 = vrot.lane.b32.xlu1 %v2083_v1, %s5823_s20 }
 0xb06   : > { %v2006_v8 = vpop.permute.xlu0 %2005 }
 0xb07   : > { %v6370_v13 = vadd.f32 %v2006_v8, %v1998_v7 }
 0xb09   : > { %5617 = vtanh.f32 %v6370_v13  ;;  %v2273_v2 = vrot.slane %v6370_v13, 4 }
 0xb11   : > { %v2086_v4 = vpop.permute.xlu1 %2085 }
 0xb12   : > { %v6374_v12 = vadd.f32 %v2086_v4, %v2078_v17 }
 0xb13   : > { %v5618_v11 = vpop.eup %5617 }
 0xb14   : > { %5619 = vtanh.f32 %v6374_v12  ;;  %2011 = vrot.lane.b32.xlu0 %v5618_v11, %s5825_s29  ;;  %v2355_v17 = vrot.slane %v6374_v12, 4 }
 0xb1e   : > { %v5620_v22 = vpop.eup %5619 }
 0xb1f   : > { %2091 = vrot.lane.b32.xlu1 %v5620_v22, %s5825_s29 }
 0xb86   : > { %v2012_v5 = vpop.permute.xlu0 %2011 }
 0xb87   : > { %v6379_v25 = vmul.f32 %v2012_v5, %v1994_v57 }
 0xb89   : > { %v2210_v26 = vpack.c.bf16 %v6379_v25, %v6379_v25 }
 0xb8b   : > { %v2214_v27 = vrot.slane %v2210_v26, 2 }
 0xb8d   : > { %2215 = vrot.lane.b32.xlu0 %v2214_v27, %s5823_s20 }
 0xb91   : > { %v2092_v14 = vpop.permute.xlu1 %2091 }
 0xb92   : > { %v6384_v28 = vmul.f32 %v2092_v14, %v2074_v61 }
 0xb94   : > { %v2211_v29 = vpack.c.bf16 %v6384_v28, %v6384_v28 }
 0xb96   : > { %2294 = vrot.lane.b32.xlu1 %v2211_v29, %s5823_s20 }
 0xbff   : > { %v2216_v30 = vpop.permute.xlu0 %2215 }
 0xc00   : > { %5222 = vmatmul.mubr.msk.bf16.vlgmr.msra.gmra.mrb[32].mxu1 %vm1086_vm1, %v2216_v30 }
 0xc01   : > { %5226 = vmatpush3.bf16.msra.mxu1 %v6101_v31  ;;  %5229 = vmatprep.mubr.msk.bf16.mxu1 %vm5822_vm0, %v5821_v3  ;;  %v2212_v31 = vld [vmem:[#allocation2 + $0x20] sm:$0xf] }
 0xc02   : > { %5227 = vmatprep.subr.bf16.mxu1 %v5821_v3 }
 0xc05   : > { %5228 = vmatpush3.bf16.msra.mxu1 %v6108_v32 }
 0xc06   : > { %5233 = vmatprep.subr.bf16.mxu1 %v5821_v3 }
 0xc08   : > { %v2295_v33 = vpop.permute.xlu1 %2294 }
 0xc09   : > { %5230 = vmatmul.mubr.msk.bf16.vlgmr.msra.gmra.mrb[36].mxu1 %vm1086_vm1, %v2295_v33 }
 0xc0a   : > { %5234 = vmatpush3.bf16.msra.mxu1 %v6066_v23  ;;  %5237 = vmatprep.mubr.msk.bf16.mxu1 %vm5822_vm0, %v5821_v3 }
 0xc0b   : > { %5235 = vmatprep.subr.bf16.mxu1 %v5821_v3 }
 0xc0e   : > { %5236 = vmatpush3.bf16.msra.mxu1 %v6073_v24 }
 0xc0f   : > { %5241 = vmatprep.subr.bf16.mxu1 %v5821_v3 }
 0xcd3   : > { %v2254_v34 = vpop.f32.mrb[32].mxu1 }
 0xcd4   : > { %v2260_v35 = vadd.f32 %v2254_v34, %v2212_v31  ;;  %v5223_v32 = vpop.f32.mrb[33].mxu1  ;;  %v6439_v34 = vld [vmem:[%s7244_s6] sm:$0xff]  }
 0xcd5   : > { %v2257_v36 = vpop.f32.mrb[34].mxu1 }
 0xcd6   : > { %v2261_v38 = vmul.f32 2.0, %v2260_v35  ;;  %v5224_v39 = vpop.f32.mrb[35].mxu1  ;;  %v6456_v36 = vld [vmem:[%s7243_s5] sm:$0xff]  }
 0xcd8   : > { %v2262_v40 = vsel %vm6215_vm4, %v2261_v38, %v2260_v35  ;;  %v6448_v35 = vld [vmem:[%s7244_s6 + $0x8] sm:$0xff]  }
 0xcd9   : > { %v4978_v23 = vmul.f32 -1.442695, %v2262_v40  ;;  %v6465_v38 = vld [vmem:[%s7243_s5 + $0x8] sm:$0xff]  }
 0xcdb   : > { %5621 = vpow2.f32 %v4978_v23 }
 0xcdc   : > { %v2333_v41 = vpop.f32.mrb[36].mxu1 }
 0xcdd   : > { %v2340_v42 = vrot.slane %v2333_v41, 4  ;;  %v5231_v43 = vpop.f32.mrb[37].mxu1  ;;  %v2491_v41 = vld [vmem:[#allocation2 + $0x20] sm:$0xf0] }
 0xcde   : > { %v2336_v45 = vpop.f32.mrb[38].mxu1 }
 0xcdf   : > { %v2342_v24 = vadd.f32 %v2340_v42, %v2292_v44  ;;  %v5232_v46 = vpop.f32.mrb[39].mxu1 }
 0xce1   : > { %v2343_v47 = vmul.f32 2.0, %v2342_v24 }
 0xce3   : > { %v2344_v48 = vsel %vm6215_vm4, %v2343_v47, %v2342_v24  ;;  %v2573_v47 = vld [vmem:[#allocation2 + $0x18] sm:$0xf] }
 0xce4   : > { %v4981_v49 = vmul.f32 -1.442695, %v2344_v48 }
 0xce5   : > { %v5622_v50 = vpop.eup %5621 }
 0xce6   : > { %v2266_v51 = vadd.f32 1.0, %v5622_v50  ;;  %5623 = vpow2.f32 %v4981_v49 }
 0xce8   : > { %5625 = vrcp.f32 %v2266_v51 }
 0xcf0   : > { %v5624_v52 = vpop.eup %5623 }
 0xcf1   : > { %v2348_v53 = vadd.f32 1.0, %v5624_v52 }
 0xcf2   : > { %v5626_v54 = vpop.eup %5625 }
 0xcf3   : > { %5627 = vrcp.f32 %v2348_v53  ;;  %v2269_v55 = vmul.f32 2.0, %v5626_v54 }
 0xcf5   : > { %v4979_v56 = vadd.f32 -1.0, %v2269_v55 }
 0xcf7   : > { %v2271_v57 = vsel %vm6215_vm4, %v4979_v56, %v5626_v54 }
 0xcf8   : > { %2277 = vrot.lane.b32.xlu0 %v2271_v57, %s5825_s29  ;;  %v2275_v7 = vmul.f32 %v2273_v2, %v2271_v57 }
 0xcfd   : > { %v5628_v58 = vpop.eup %5627 }
 0xcfe   : > { %v2351_v59 = vmul.f32 2.0, %v5628_v58 }
 0xd00   : > { %v4982_v60 = vadd.f32 -1.0, %v2351_v59 }
 0xd02   : > { %v2353_v61 = vsel %vm6215_vm4, %v4982_v60, %v5628_v58 }
 0xd03   : > { %2359 = vrot.lane.b32.xlu1 %v2353_v61, %s5825_s29  ;;  %v2357_v4 = vmul.f32 %v2355_v17, %v2353_v61 }
 0xd6a   : > { %v2278_v62 = vpop.permute.xlu0 %2277 }
 0xd6b   : > { %v2280_v63 = vmul.f32 %v2278_v62, %v2271_v57 }
 0xd6d   : > { %2282 = vrot.lane.b32.xlu0 %v2280_v63, %s5823_s20 }
 0xd75   : > { %v2360_v0 = vpop.permute.xlu1 %2359 }
 0xd76   : > { %v2362_v1 = vmul.f32 %v2360_v0, %v2353_v61 }
 0xd78   : > { %2364 = vrot.lane.b32.xlu1 %v2362_v1, %s5823_s20 }
 0xddf   : > { %v2283_v8 = vpop.permute.xlu0 %2282 }
 0xde0   : > { %v6416_v6 = vadd.f32 %v2283_v8, %v2275_v7 }
 0xde2   : > { %5629 = vtanh.f32 %v6416_v6 }
 0xdea   : > { %v2365_v11 = vpop.permute.xlu1 %2364 }
 0xdeb   : > { %v6420_v22 = vadd.f32 %v2365_v11, %v2357_v4 }
 0xdec   : > { %v5630_v5 = vpop.eup %5629 }
 0xded   : > { %5631 = vtanh.f32 %v6420_v22  ;;  %2288 = vrot.lane.b32.xlu0 %v5630_v5, %s5825_s29  ;;  %v2554_v5 = vrot.slane %v6416_v6, 4 }
 0xdf7   : > { %v5632_v26 = vpop.eup %5631 }
 0xdf8   : > { %2370 = vrot.lane.b32.xlu1 %v5632_v26, %s5825_s29 }
 0xe5f   : > { %v2289_v13 = vpop.permute.xlu0 %2288 }
 0xe60   : > { %v6425_v27 = vmul.f32 %v2289_v13, %v2271_v57 }
 0xe62   : > { %v2489_v14 = vpack.c.bf16 %v6425_v27, %v6425_v27 }
 0xe64   : > { %2493 = vrot.lane.b32.xlu0 %v2489_v14, %s5823_s20 }
 0xe6a   : > { %v2371_v12 = vpop.permute.xlu1 %2370 }
 0xe6b   : > { %v6430_v29 = vmul.f32 %v2371_v12, %v2353_v61  ;;  %v2634_v12 = vrot.slane %v6420_v22, 4 }
 0xe6d   : > { %v2490_v30 = vpack.c.bf16 %v6430_v29, %v6430_v29 }
 0xe6f   : > { %v2575_v33 = vrot.slane %v2490_v30, 2 }
 0xe71   : > { %2576 = vrot.lane.b32.xlu1 %v2575_v33, %s5823_s20 }
 0xed6   : > { %v2494_v31 = vpop.permute.xlu0 %2493 }
 0xed7   : > { %5238 = vmatmul.mubr.msk.bf16.vlgmr.msra.gmra.mrb[40].mxu1 %vm1086_vm1, %v2494_v31 }
 0xed8   : > { %5242 = vmatpush3.bf16.msra.mxu1 %v6439_v34  ;;  %5245 = vmatprep.mubr.msk.bf16.mxu1 %vm5822_vm0, %v5821_v3 }
 0xed9   : > { %5243 = vmatprep.subr.bf16.mxu1 %v5821_v3 }
 0xedc   : > { %5244 = vmatpush3.bf16.msra.mxu1 %v6448_v35 }
 0xedd   : > { %5249 = vmatprep.subr.bf16.mxu1 %v5821_v3 }
 0xee3   : > { %v2577_v32 = vpop.permute.xlu1 %2576 }
 0xee4   : > { %5246 = vmatmul.mubr.msk.bf16.vlgmr.msra.gmra.mrb[44].mxu1 %vm1086_vm1, %v2577_v32 }
 0xee5   : > { %5250 = vmatpush3.bf16.msra.mxu1 %v6456_v36  ;;  %5253 = vmatprep.mubr.msk.bf16.mxu1 %vm5822_vm0, %v5821_v3 }
 0xee6   : > { %5251 = vmatprep.subr.bf16.mxu1 %v5821_v3 }
 0xee9   : > { %5252 = vmatpush3.bf16.msra.mxu1 %v6465_v38 }
 0xeea   : > { %5265 = vmatprep.subr.bf16.mxu1 %v5821_v3 }
 0xfaa   : > { %v2532_v39 = vpop.f32.mrb[40].mxu1 }
 0xfab   : > { %v2539_v40 = vrot.slane %v2532_v39, 4  ;;  %v5239_v23 = vpop.f32.mrb[41].mxu1 }
 0xfac   : > { %v2535_v42 = vpop.f32.mrb[42].mxu1 }
 0xfad   : > { %v2541_v43 = vadd.f32 %v2539_v40, %v2491_v41  ;;  %v5240_v44 = vpop.f32.mrb[43].mxu1 }
 0xfaf   : > { %v2542_v45 = vmul.f32 2.0, %v2541_v43 }
 0xfb1   : > { %v2543_v24 = vsel %vm6215_vm4, %v2542_v45, %v2541_v43 }
 0xfb2   : > { %v4984_v46 = vmul.f32 -1.442695, %v2543_v24 }
 0xfb4   : > { %5633 = vpow2.f32 %v4984_v46 }
 0xfb7   : > { %v2615_v48 = vpop.f32.mrb[44].mxu1 }
 0xfb8   : > { %v2621_v49 = vadd.f32 %v2615_v48, %v2573_v47  ;;  %v5247_v50 = vpop.f32.mrb[45].mxu1 }
 0xfb9   : > { %v2618_v51 = vpop.f32.mrb[46].mxu1 }
 0xfba   : > { %v2622_v52 = vmul.f32 2.0, %v2621_v49  ;;  %v5248_v53 = vpop.f32.mrb[47].mxu1 }
 0xfbc   : > { %v2623_v54 = vsel %vm6215_vm4, %v2622_v52, %v2621_v49 }
 0xfbd   : > { %v4987_v55 = vmul.f32 -1.442695, %v2623_v54  ;;  %v2850_v54 = vld [vmem:[#allocation2 + $0x8] sm:$0xf0] }
 0xfbe   : > { %v5634_v56 = vpop.eup %5633 }
 0xfbf   : > { %v2547_v57 = vadd.f32 1.0, %v5634_v56  ;;  %5635 = vpow2.f32 %v4987_v55 }
 0xfc1   : > { %5637 = vrcp.f32 %v2547_v57 }
 0xfc9   : > { %v5636_v58 = vpop.eup %5635 }
 0xfca   : > { %v2627_v59 = vadd.f32 1.0, %v5636_v58 }
 0xfcb   : > { %v5638_v60 = vpop.eup %5637 }
 0xfcc   : > { %5639 = vrcp.f32 %v2627_v59  ;;  %v2550_v61 = vmul.f32 2.0, %v5638_v60 }
 0xfce   : > { %v4985_v62 = vadd.f32 -1.0, %v2550_v61 }
 0xfd0   : > { %v2552_v63 = vsel %vm6215_vm4, %v4985_v62, %v5638_v60 }
 0xfd1   : > { %2558 = vrot.lane.b32.xlu0 %v2552_v63, %s5825_s29  ;;  %v2556_v26 = vmul.f32 %v2554_v5, %v2552_v63 }
 0xfd6   : > { %v5640_v0 = vpop.eup %5639 }
 0xfd7   : > { %v2630_v1 = vmul.f32 2.0, %v5640_v0 }
 0xfd9   : > { %v4988_v2 = vadd.f32 -1.0, %v2630_v1 }
 0xfdb   : > { %v2632_v7 = vsel %vm6215_vm4, %v4988_v2, %v5640_v0 }
 0xfdc   : > { %2638 = vrot.lane.b32.xlu1 %v2632_v7, %s5825_s29  ;;  %v2636_v30 = vmul.f32 %v2634_v12, %v2632_v7 }
0x1043   : > { %v2559_v8 = vpop.permute.xlu0 %2558 }
0x1044   : > { %v2561_v17 = vmul.f32 %v2559_v8, %v2552_v63 }
0x1046   : > { %2563 = vrot.lane.b32.xlu0 %v2561_v17, %s5823_s20 }
0x104e   : > { %v2639_v4 = vpop.permute.xlu1 %2638 }
0x104f   : > { %v2641_v11 = vmul.f32 %v2639_v4, %v2632_v7 }
0x1051   : > { %2643 = vrot.lane.b32.xlu1 %v2641_v11, %s5823_s20 }
0x10b8   : > { %v2564_v13 = vpop.permute.xlu0 %2563 }
0x10b9   : > { %v6482_v14 = vadd.f32 %v2564_v13, %v2556_v26 }
0x10bb   : > { %5641 = vtanh.f32 %v6482_v14 }
0x10c3   : > { %v2644_v33 = vpop.permute.xlu1 %2643 }
0x10c4   : > { %v6486_v31 = vadd.f32 %v2644_v33, %v2636_v30  ;;  %v2831_v30 = vrot.slane %v6482_v14, 4 }
0x10c5   : > { %v5642_v32 = vpop.eup %5641 }
0x10c6   : > { %5643 = vtanh.f32 %v6486_v31  ;;  %2569 = vrot.lane.b32.xlu0 %v5642_v32, %s5825_s29 }
0x10d0   : > { %v5644_v39 = vpop.eup %5643 }
0x10d1   : > { %2649 = vrot.lane.b32.xlu1 %v5644_v39, %s5825_s29 }
0x1138   : > { %v2570_v6 = vpop.permute.xlu0 %2569 }
0x1139   : > { %v6491_v40 = vmul.f32 %v2570_v6, %v2552_v63  ;;  %v2913_v6 = vrot.slane %v6486_v31, 4 }
0x113b   : > { %v2768_v23 = vpack.c.bf16 %v6491_v40, %v6491_v40 }
0x113d   : > { %v2772_v41 = vrot.slane %v2768_v23, 2 }
0x113f   : > { %2773 = vrot.lane.b32.xlu0 %v2772_v41, %s5823_s20 }
0x1143   : > { %v2650_v22 = vpop.permute.xlu1 %2649 }
0x1144   : > { %v6496_v42 = vmul.f32 %v2650_v22, %v2632_v7 }
0x1146   : > { %v2769_v43 = vpack.c.bf16 %v6496_v42, %v6496_v42 }
0x1148   : > { %2852 = vrot.lane.b32.xlu1 %v2769_v43, %s5823_s20 }
0x11b1   : > { %v2774_v44 = vpop.permute.xlu0 %2773 }
0x11b2   : > { %5254 = vmatmul.mubr.msk.bf16.vlgmr.msra.gmra.mrb[48].mxu1 %vm1086_vm1, %v2774_v44 }
0x11b3   : > { %5266 = vmatpush3.bf16.msra.mxu1 %v6456_v36  ;;  %5269 = vmatprep.mubr.msk.bf16.mxu1 %vm5822_vm0, %v5821_v3  ;;  %v2770_v36 = vld [vmem:[#allocation2 + $0x30] sm:$0xf] }
0x11b4   : > { %5267 = vmatprep.subr.bf16.mxu1 %v5821_v3 }
0x11b7   : > { %5268 = vmatpush3.bf16.msra.mxu1 %v6465_v38 }
0x11ba   : > { %v2853_v45 = vpop.permute.xlu1 %2852 }
0x11bb   : > { %5262 = vmatmul.mubr.msk.bf16.vlgmr.msra.gmra.mrb[8].mxu0 %vm1086_vm1, %v2853_v45 }
0x11bc   : > { %5274 = vmatpush3.bf16.msra.mxu0 %v6439_v34  ;;  %5277 = vmatprep.mubr.msk.bf16.mxu0 %vm5822_vm0, %v5821_v3 }
0x11bd   : > { %5275 = vmatprep.subr.bf16.mxu0 %v5821_v3 }
0x11c0   : > { %5276 = vmatpush3.bf16.msra.mxu0 %v6448_v35 }
0x1285   : > { %v2812_v24 = vpop.f32.mrb[48].mxu1 }
0x1286   : > { %v2818_v46 = vadd.f32 %v2812_v24, %v2770_v36  ;;  %v5255_v47 = vpop.f32.mrb[49].mxu1 }
0x1287   : > { %v2815_v48 = vpop.f32.mrb[50].mxu1 }
0x1288   : > { %v2819_v49 = vmul.f32 2.0, %v2818_v46  ;;  %v5256_v50 = vpop.f32.mrb[51].mxu1 }
0x128a   : > { %v2820_v38 = vsel %vm6215_vm4, %v2819_v49, %v2818_v46 }
0x128b   : > { %v4990_v51 = vmul.f32 -1.442695, %v2820_v38 }
0x128d   : > { %5645 = vpow2.f32 %v4990_v51 }
0x128e   : > { %v2891_v34 = vpop.f32.mrb[8].mxu0 }
0x128f   : > { %v2898_v52 = vrot.slane %v2891_v34, 4  ;;  %v5263_v53 = vpop.f32.mrb[9].mxu0  ;;  %v3049_v34 = vld [vmem:[#allocation2 + $0x30] sm:$0xf0] }
0x1290   : > { %v2894_v55 = vpop.f32.mrb[10].mxu0 }
0x1291   : > { %v2900_v56 = vadd.f32 %v2898_v52, %v2850_v54  ;;  %v5264_v57 = vpop.f32.mrb[11].mxu0 }
0x1293   : > { %v2901_v35 = vmul.f32 2.0, %v2900_v56 }
0x1295   : > { %v2902_v58 = vsel %vm6215_vm4, %v2901_v35, %v2900_v56  ;;  %v3131_v35 = vld [vmem:[#allocation2 + $0x8] sm:$0xf] }
0x1296   : > { %v4993_v59 = vmul.f32 -1.442695, %v2902_v58 }
0x1297   : > { %v5646_v60 = vpop.eup %5645 }
0x1298   : > { %v2824_v61 = vadd.f32 1.0, %v5646_v60  ;;  %5647 = vpow2.f32 %v4993_v59 }
0x129a   : > { %5649 = vrcp.f32 %v2824_v61 }
0x12a2   : > { %v5648_v62 = vpop.eup %5647 }
0x12a3   : > { %v2906_v63 = vadd.f32 1.0, %v5648_v62 }
0x12a4   : > { %v5650_v0 = vpop.eup %5649 }
0x12a5   : > { %5651 = vrcp.f32 %v2906_v63  ;;  %v2827_v1 = vmul.f32 2.0, %v5650_v0 }
0x12a7   : > { %v4991_v2 = vadd.f32 -1.0, %v2827_v1 }
0x12a9   : > { %v2829_v7 = vsel %vm6215_vm4, %v4991_v2, %v5650_v0 }
0x12aa   : > { %2835 = vrot.lane.b32.xlu0 %v2829_v7, %s5825_s29  ;;  %v2833_v33 = vmul.f32 %v2831_v30, %v2829_v7 }
0x12af   : > { %v5652_v8 = vpop.eup %5651 }
0x12b0   : > { %v2909_v17 = vmul.f32 2.0, %v5652_v8 }
0x12b2   : > { %v4994_v4 = vadd.f32 -1.0, %v2909_v17 }
0x12b4   : > { %v2911_v11 = vsel %vm6215_vm4, %v4994_v4, %v5652_v8 }
0x12b5   : > { %2917 = vrot.lane.b32.xlu1 %v2911_v11, %s5825_s29  ;;  %v2915_v23 = vmul.f32 %v2913_v6, %v2911_v11 }
0x131c   : > { %v2836_v5 = vpop.permute.xlu0 %2835 }
0x131d   : > { %v2838_v26 = vmul.f32 %v2836_v5, %v2829_v7 }
0x131f   : > { %2840 = vrot.lane.b32.xlu0 %v2838_v26, %s5823_s20 }
0x1327   : > { %v2918_v13 = vpop.permute.xlu1 %2917 }
0x1328   : > { %v2920_v12 = vmul.f32 %v2918_v13, %v2911_v11 }
0x132a   : > { %2922 = vrot.lane.b32.xlu1 %v2920_v12, %s5823_s20 }
0x1391   : > { %v2841_v32 = vpop.permute.xlu0 %2840 }
0x1392   : > { %v6526_v39 = vadd.f32 %v2841_v32, %v2833_v33  ;;  %v5826_v32 = vmov 1966171168  }
0x1393   : > { %v1258_v6 = vunpack.c.l.s4 %v5826_v32 }
0x1394   : > { %5653 = vtanh.f32 %v6526_v39 }
0x139c   : > { %v2923_v41 = vpop.permute.xlu1 %2922 }
0x139d   : > { %v6530_v22 = vadd.f32 %v2923_v41, %v2915_v23  ;;  %v1259_v23 = vunpack.c.0.s8 %v1258_v6 }
0x139e   : > { %v5654_v43 = vpop.eup %5653 }
0x139f   : > { %5655 = vtanh.f32 %v6530_v22  ;;  %2846 = vrot.lane.b32.xlu0 %v5654_v43, %s5825_s29  ;;  %v6564_v41 = vsub.s32 %v1259_v23, %v6205_v9 }
0x13a1   : > { %v1263_v43 = vrot.slane %v6241_v16, %v6564_v41 }
0x13a3   : > { %v6571_v37 = vrot.slane %v1263_v43, %v6564_v41 }
0x13a5   : > { %v1284_v16 = vrot.slane %v6571_v37, %v6208_v10  ;;  %v1279_v23 = vcombine.high %v6571_v37, %v6571_v37 }
0x13a9   : > { %v5656_v44 = vpop.eup %5655 }
0x13aa   : > { %2928 = vrot.lane.b32.xlu1 %v5656_v44, %s5825_s29  ;;  %v1315_v44 = vcombine.high %v6246_v19, %v6246_v19 }
0x1411   : > { %v2847_v14 = vpop.permute.xlu0 %2846 }
0x1412   : > { %v6535_v45 = vmul.f32 %v2847_v14, %v2829_v7 }
0x1414   : > { %v3047_v36 = vpack.c.bf16 %v6535_v45, %v6535_v45 }
0x1416   : > { %3051 = vrot.lane.b32.xlu0 %v3047_v36, %s5823_s20  ;;  %v1322_v36 = vrot.slane %v1315_v44, %v6564_v41 }
0x1418   : > { %v6582_v19 = vrot.slane %v1322_v36, %v6564_v41 }
0x141c   : > { %v2929_v31 = vpop.permute.xlu1 %2928 }
0x141d   : > { %v6540_v24 = vmul.f32 %v2929_v31, %v2911_v11  ;;  %v1538_v31 = vcombine.high %v6287_v15, %v6287_v15  ;;  %v1343_v15 = vrot.slane %v6582_v19, %v6208_v10 }
0x141f   : > { %v3048_v46 = vpack.c.bf16 %v6540_v24, %v6540_v24  ;;  %v1545_v9 = vrot.slane %v1538_v31, %v6564_v41  ;;  %v1338_v31 = vcombine.high %v6582_v19, %v6582_v19 }
0x1421   : > { %v3133_v47 = vrot.slane %v3048_v46, 2 }
0x1423   : > { %3134 = vrot.lane.b32.xlu1 %v3133_v47, %s5823_s20  ;;  %v1264_v47 = vcombine.high %v1263_v43, %v1263_v43 }
0x1488   : > { %v3052_v48 = vpop.permute.xlu0 %3051 }
0x1489   : > { %5270 = vmatmul.mubr.msk.bf16.vlgmr.msra.gmra.mrb[52].mxu1 %vm1086_vm1, %v3052_v48  ;;  %v1602_v48 = vrot.slane %v6292_v20, %v6564_v41  ;;  %v1823_v20 = vrot.slane %v6333_v18, %v6564_v41 }
0x1495   : > { %v3135_v49 = vpop.permute.xlu1 %3134 }
0x1496   : > { %5278 = vmatmul.mubr.msk.bf16.vlgmr.msra.gmra.mrb[12].mxu0 %vm1086_vm1, %v3135_v49  ;;  %v6590_v49 = vrot.slane %v1545_v9, %v6564_v41 }
0x155c   : > { %v3090_v50 = vpop.f32.mrb[52].mxu1 }
0x155d   : > { %v3097_v38 = vrot.slane %v3090_v50, 4  ;;  %v5271_v51 = vpop.f32.mrb[53].mxu1 }
0x155e   : > { %v3093_v52 = vpop.f32.mrb[54].mxu1 }
0x155f   : > { %v3099_v53 = vadd.f32 %v3097_v38, %v3049_v34  ;;  %v5272_v54 = vpop.f32.mrb[55].mxu1  ;;  %v1323_v38 = vcombine.high %v1322_v36, %v1322_v36  ;;  %v6595_v34 = vrot.slane %v1264_v47, %v6564_v41  ;;  %v6598_v52 = vrot.slane %v1602_v48, %v6564_v41 }
0x1560   : > { %v1566_v54 = vrot.slane %v6590_v49, %v6208_v10  ;;  %v1292_v36 = vrot.slane %v1279_v23, %v6208_v10 }
0x1561   : > { %v3100_v55 = vmul.f32 2.0, %v3099_v53  ;;  %v1280_v47 = vcombine.high %v6595_v34, %v6595_v34 }
0x1563   : > { %v3101_v56 = vsel %vm6215_vm4, %v3100_v55, %v3099_v53  ;;  %v1874_v53 = vcombine.high %v6338_v21, %v6338_v21  ;;  %v1546_v55 = vcombine.high %v1545_v9, %v1545_v9  ;;  %v2096_v21 = vcombine.high %v6379_v25, %v6379_v25 }
0x1564   : > { %v4996_v57 = vmul.f32 -1.442695, %v3101_v56  ;;  %v1288_v56 = vrot.slane %v6595_v34, %v6208_v10  ;;  %v1351_v9 = vrot.slane %v1338_v31, %v6208_v10 }
0x1565   : > { %v1881_v18 = vrot.slane %v1874_v53, %v6564_v41 }
0x1566   : > { %5657 = vpow2.f32 %v4996_v57  ;;  %v6611_v57 = vrot.slane %v1323_v38, %v6564_v41 }
0x1567   : > { %v1889_v25 = vrot.slane %v1881_v18, %v6564_v41 }
0x1569   : > { %v3173_v58 = vpop.f32.mrb[12].mxu0  ;;  %v1897_v53 = vcombine.high %v1889_v25, %v1889_v25 }
0x156a   : > { %v3179_v59 = vadd.f32 %v3173_v58, %v3131_v35  ;;  %v5279_v60 = vpop.f32.mrb[13].mxu0  ;;  %v6614_v35 = vrot.slane %v1823_v20, %v6564_v41  ;;  %v1623_v58 = vrot.slane %v6598_v52, %v6208_v10 }
0x156b   : > { %v3176_v61 = vpop.f32.mrb[14].mxu0  ;;  %v1347_v60 = vrot.slane %v6611_v57, %v6208_v10 }
0x156c   : > { %v3180_v62 = vmul.f32 2.0, %v3179_v59  ;;  %v5280_v63 = vpop.f32.mrb[15].mxu0  ;;  %v1560_v61 = vrot.slane %v1546_v55, %v6564_v41 }
0x156d   : > { %v1844_v63 = vrot.slane %v6614_v35, %v6208_v10 }
0x156e   : > { %v3181_v0 = vsel %vm6215_vm4, %v3180_v62, %v3179_v59  ;;  %v1603_v59 = vcombine.high %v1602_v48, %v1602_v48  ;;  %v2103_v62 = vrot.slane %v2096_v21, %v6564_v41 }
0x156f   : > { %v4999_v1 = vmul.f32 -1.442695, %v3181_v0  ;;  %v1824_v0 = vcombine.high %v1823_v20, %v1823_v20 }
0x1570   : > { %v5658_v2 = vpop.eup %5657 }
0x1571   : > { %v3105_v7 = vadd.f32 1.0, %v5658_v2  ;;  %5659 = vpow2.f32 %v4999_v1  ;;  %v1570_v1 = vrot.slane %v1560_v61, %v6208_v10  ;;  %v1617_v2 = vrot.slane %v1603_v59, %v6564_v41 }
0x1572   : > { %v3112_v59 = vrot.slane %v6526_v39, 4 }
0x1573   : > { %5661 = vrcp.f32 %v3105_v7  ;;  %v2160_v7 = vrot.slane %v6384_v28, %v6564_v41  ;;  %v1619_v55 = vcombine.high %v1617_v2, %v1617_v2 }
0x1575   : > { %v2161_v43 = vcombine.high %v2160_v7, %v2160_v7 }
0x157b   : > { %v5660_v8 = vpop.eup %5659 }
0x157c   : > { %v3185_v17 = vadd.f32 1.0, %v5660_v8  ;;  %v1902_v8 = vrot.slane %v1889_v25, %v6208_v10  ;;  %v3192_v25 = vrot.slane %v6530_v22, 4  ;;  %v2381_v22 = vrot.slane %v6425_v27, %v6564_v41 }
0x157d   : > { %v5662_v4 = vpop.eup %5661 }
0x157e   : > { %5663 = vrcp.f32 %v3185_v17  ;;  %v3108_v11 = vmul.f32 2.0, %v5662_v4  ;;  %v6638_v17 = vrot.slane %v2103_v62, %v6564_v41 }
0x1580   : > { %v4997_v5 = vadd.f32 -1.0, %v3108_v11  ;;  %v1627_v11 = vrot.slane %v1617_v2, %v6208_v10  ;;  %v2124_v28 = vrot.slane %v6638_v17, %v6208_v10 }
0x1582   : > { %v6553_v26 = vsel %vm6215_vm4, %v4997_v5, %v5662_v4  ;;  %v1882_v4 = vcombine.high %v1881_v18, %v1881_v18  ;;  %v1838_v5 = vrot.slane %v1824_v0, %v6564_v41 }
0x1583   : > { %3116 = vrot.lane.b32.xlu0 %v6553_v26, %s5825_s29 }
0x1584   : > { %v1896_v32 = vrot.slane %v1882_v4, %v6564_v41 }
0x1586   : > { %v1906_v44 = vrot.slane %v1896_v32, %v6208_v10  ;;  %v1898_v21 = vcombine.high %v1896_v32, %v1896_v32  ;;  %v6730_v32 = vrot.slane %v2381_v22, %v6564_v41 }
0x1588   : > { %v5664_v13 = vpop.eup %5663 }
0x1589   : > { %v3188_v12 = vmul.f32 2.0, %v5664_v13 }
0x158b   : > { %v5000_v30 = vadd.f32 -1.0, %v3188_v12  ;;  %v2104_v12 = vcombine.high %v2103_v62, %v2103_v62 }
0x158d   : > { %v6559_v33 = vsel %vm6215_vm4, %v5000_v30, %v5664_v13  ;;  %v6645_v13 = vrot.slane %v2160_v7, %v6564_v41  ;;  %v1848_v30 = vrot.slane %v1838_v5, %v6208_v10 }
0x158e   : > { %3196 = vrot.lane.b32.xlu1 %v6559_v33, %s5825_s29 }
0x158f   : > { %v2181_v6 = vrot.slane %v6645_v13, %v6208_v10 }
0x15f5   : > { %v3117_v14 = vpop.permute.xlu0 %3116 }
0x15f6   : > { %v3119_v46 = vmul.f32 %v3117_v14, %v6553_v26  ;;  %v6661_v14 = vrot.slane %v2104_v12, %v6564_v41 }
0x15f8   : > { %3121 = vrot.lane.b32.xlu0 %v3119_v46, %s5823_s20  ;;  %v2128_v37 = vrot.slane %v6661_v14, %v6208_v10  ;;  %v6671_v46 = vrot.slane %v2161_v43, %v6564_v41  ;;  %v2120_v43 = vcombine.high %v6661_v14, %v6661_v14 }
0x15fa   : > { %v2185_v19 = vrot.slane %v6671_v46, %v6208_v10 }
0x15fc   : > { %1297 = vrot.lane.b32.xlu0 %v1284_v16, %s5823_s20  ;;  %v1561_v16 = vcombine.high %v6590_v49, %v6590_v49  ;;  %v1296_v49 = vrot.slane %v1280_v47, %v6208_v10 }
0x15fe   : > { %v1574_v48 = vrot.slane %v1561_v16, %v6208_v10  ;;  %v2136_v16 = vrot.slane %v2120_v43, %v6208_v10 }
0x1600   : > { %v3197_v50 = vpop.permute.xlu1 %3196  ;;  %1356 = vrot.lane.b32.xlu0 %v1343_v15, %s5825_s29  ;;  %v1618_v15 = vcombine.high %v6598_v52, %v6598_v52  ;;  %v1562_v52 = vcombine.high %v1560_v61, %v1560_v61 }
0x1601   : > { %v3199_v51 = vmul.f32 %v3197_v50, %v6559_v33  ;;  %v1339_v50 = vcombine.high %v6611_v57, %v6611_v57  ;;  %v1635_v57 = vrot.slane %v1619_v55, %v6208_v10 }
0x1602   : > { %v1631_v38 = vrot.slane %v1618_v15, %v6208_v10 }
0x1603   : > { %3201 = vrot.lane.b32.xlu1 %v3199_v51, %s5823_s20  ;;  %v1839_v51 = vcombine.high %v6614_v35, %v6614_v35  ;;  %v1355_v34 = vrot.slane %v1339_v50, %v6208_v10  ;;  %v1840_v35 = vcombine.high %v1838_v5, %v1838_v5  ;;  %v2432_v5 = vcombine.high %v6430_v29, %v6430_v29 }
0x1604   : > { %1579 = vrot.lane.b32.xlu0 %v1566_v54, %s5823_s20  ;;  %v1578_v54 = vrot.slane %v1562_v52, %v6208_v10  ;;  %v2654_v29 = vcombine.high %v6491_v40, %v6491_v40  ;;  %v2990_v52 = vcombine.high %v6540_v24, %v6540_v24 }
0x1605   : > { %v1852_v20 = vrot.slane %v1839_v51, %v6208_v10  ;;  %v1856_v18 = vrot.slane %v1840_v35, %v6208_v10  ;;  %v2439_v27 = vrot.slane %v2432_v5, %v6564_v41 }
0x1606   : > { %v2661_v31 = vrot.slane %v2654_v29, %v6564_v41 }
0x1607   : > { %1299 = vrot.lane.b32.xlu1 %v1288_v56, %s5823_s20  ;;  %v1910_v56 = vrot.slane %v1897_v53, %v6208_v10  ;;  %v2440_v50 = vcombine.high %v2439_v27, %v2439_v27 }
0x1608   : > { %1636 = vrot.lane.b32.xlu0 %v1623_v58, %s5825_s29  ;;  %v1914_v58 = vrot.slane %v1898_v21, %v6208_v10  ;;  %v6755_v47 = vrot.slane %v2661_v31, %v6564_v41 }
0x160a   : > { %v2682_v53 = vrot.slane %v6755_v47, %v6208_v10 }
0x160b   : > { %1358 = vrot.lane.b32.xlu1 %v1347_v60, %s5825_s29  ;;  %v3114_v60 = vmul.f32 %v3112_v59, %v6553_v26 }
0x160c   : > { %1857 = vrot.lane.b32.xlu0 %v1844_v63, %s5823_s20 }
0x160f   : > { %1581 = vrot.lane.b32.xlu1 %v1570_v1, %s5823_s20  ;;  %v3194_v1 = vmul.f32 %v3192_v25, %v6559_v33 }
0x1610   : > { %1915 = vrot.lane.b32.xlu0 %v1902_v8, %s5825_s29  ;;  %v2119_v8 = vcombine.high %v6638_v17, %v6638_v17  ;;  %v2176_v17 = vcombine.high %v6645_v13, %v6645_v13 }
0x1612   : > { %v2132_v12 = vrot.slane %v2119_v8, %v6208_v10  ;;  %v2189_v23 = vrot.slane %v2176_v17, %v6208_v10 }
0x1613   : > { %1638 = vrot.lane.b32.xlu1 %v1627_v11, %s5825_s29 }
0x1614   : > { %2137 = vrot.lane.b32.xlu0 %v2124_v28, %s5823_s20 }
0x1617   : > { %1859 = vrot.lane.b32.xlu1 %v1848_v30, %s5823_s20 }
0x1618   : > { %2194 = vrot.lane.b32.xlu0 %v2181_v6, %s5825_s29 }
0x161b   : > { %1917 = vrot.lane.b32.xlu1 %v1906_v44, %s5825_s29 }
0x161c   : > { %1301 = vrot.lane.b32.xlu0 %v1292_v36, %s5823_s20  ;;  %v6742_v36 = vrot.slane %v2439_v27, %v6564_v41 }
0x161e   : > { %v2455_v17 = vcombine.high %v6742_v36, %v6742_v36 }
0x161f   : > { %2139 = vrot.lane.b32.xlu1 %v2128_v37, %s5823_s20  ;;  %v2402_v37 = vrot.slane %v6730_v32, %v6208_v10 }
0x1620   : > { %1360 = vrot.lane.b32.xlu0 %v1351_v9, %s5825_s29  ;;  %v2382_v9 = vcombine.high %v2381_v22, %v2381_v22 }
0x1622   : > { %v6767_v51 = vrot.slane %v2382_v9, %v6564_v41 }
0x1623   : > { %2196 = vrot.lane.b32.xlu1 %v2185_v19, %s5825_s29  ;;  %v2177_v19 = vcombine.high %v6671_v46, %v6671_v46 }
0x1624   : > { %1583 = vrot.lane.b32.xlu0 %v1574_v48, %s5823_s20  ;;  %v2718_v48 = vrot.slane %v6496_v42, %v6564_v41 }
0x1626   : > { %v6770_v42 = vrot.slane %v2718_v48, %v6564_v41  ;;  %v2719_v21 = vcombine.high %v2718_v48, %v2718_v48 }
0x1627   : > { %1303 = vrot.lane.b32.xlu1 %v1296_v49, %s5823_s20  ;;  %v2460_v49 = vrot.slane %v6742_v36, %v6208_v10 }
0x1628   : > { %1640 = vrot.lane.b32.xlu0 %v1631_v38, %s5825_s29  ;;  %v2193_v38 = vrot.slane %v2177_v19, %v6208_v10  ;;  %v6812_v25 = vrot.slane %v2719_v21, %v6564_v41  ;;  %v2734_v36 = vcombine.high %v6770_v42, %v6770_v42 }
0x162a   : > { %v2743_v5 = vrot.slane %v6812_v25, %v6208_v10  ;;  %v2747_v19 = vrot.slane %v2734_v36, %v6208_v10 }
0x162b   : > { %1362 = vrot.lane.b32.xlu1 %v1355_v34, %s5825_s29  ;;  %v2939_v34 = vrot.slane %v6535_v45, %v6564_v41  ;;  %v2406_v45 = vrot.slane %v6767_v51, %v6208_v10 }
0x162c   : > { %1861 = vrot.lane.b32.xlu0 %v1852_v20, %s5823_s20 }
0x162d   : > { %v6788_v24 = vrot.slane %v2939_v34, %v6564_v41 }
0x162f   : > { %1585 = vrot.lane.b32.xlu1 %v1578_v54, %s5823_s20  ;;  %v2662_v54 = vcombine.high %v2661_v31, %v2661_v31 }
0x1630   : > { %1919 = vrot.lane.b32.xlu0 %v1910_v56, %s5825_s29  ;;  %v6785_v56 = vrot.slane %v2440_v50, %v6564_v41 }
0x1632   : > { %v2464_v59 = vrot.slane %v6785_v56, %v6208_v10 }
0x1633   : > { %1642 = vrot.lane.b32.xlu1 %v1635_v57, %s5825_s29  ;;  %v2997_v57 = vrot.slane %v2990_v52, %v6564_v41 }
0x1637   : > { %1863 = vrot.lane.b32.xlu1 %v1856_v18, %s5823_s20  ;;  %v2739_v18 = vrot.slane %v6770_v42, %v6208_v10 }
0x163b   : > { %1921 = vrot.lane.b32.xlu1 %v1914_v58, %s5825_s29 }
0x166a   : > { %v3122_v61 = vpop.permute.xlu0 %3121 }
0x166b   : > { %v3124_v62 = vadd.f32 %v3122_v61, %v3114_v60  ;;  %v6800_v60 = vrot.slane %v2662_v54, %v6564_v41  ;;  %v2960_v61 = vrot.slane %v6788_v24, %v6208_v10 }
0x166d   : > { %5665 = vtanh.f32 %v3124_v62  ;;  %v6805_v62 = vrot.slane %v2997_v57, %v6564_v41 }
0x166e   : > { %v1298_v63 = vpop.permute.xlu0 %1297 }
0x166f   : > { %1310 = vst.msk [vmem:[#allocation3] sm:$0x1] %vm1309_vm5, %v1298_v63  ;;  %v3018_v8 = vrot.slane %v6805_v62, %v6208_v10  ;;  %v3013_v50 = vcombine.high %v6805_v62, %v6805_v62 }
0x1671   : > { %v3026_v42 = vrot.slane %v3013_v50, %v6208_v10 }
0x1672   : > { %v1357_v0 = vpop.permute.xlu0 %1356 }
0x1673   : > { %1369 = vst.msk [vmem:[#allocation3 + $0x7] sm:$0x1] %vm1368_vm6, %v1357_v0  ;;  %v2940_v0 = vcombine.high %v2939_v34, %v2939_v34 }
0x1675   : > { %v3202_v2 = vpop.permute.xlu1 %3201 }
0x1676   : > { %v3204_v7 = vadd.f32 %v3202_v2, %v3194_v1  ;;  %v1580_v39 = vpop.permute.xlu0 %1579  ;;  %v2686_v2 = vrot.slane %v6800_v60, %v6208_v10 }
0x1677   : > { %v5666_v4 = vpop.eup %5665  ;;  %1591 = vst.msk [vmem:[#allocation3 + $0x1] sm:$0x1] %vm1309_vm5, %v1580_v39 }
0x1678   : > { %5667 = vtanh.f32 %v3204_v7  ;;  %3127 = vrot.lane.b32.xlu0 %v5666_v4, %s5825_s29  ;;  %v2397_v7 = vcombine.high %v6730_v32, %v6730_v32  ;;  %v2954_v4 = vrot.slane %v2940_v0, %v6564_v41 }
0x1679   : > { %v1300_v11 = vpop.permute.xlu1 %1299 }
0x167a   : > { %1311 = vst.msk [vmem:[#allocation3 + $0x8] sm:$0x1] %vm1309_vm5, %v1300_v11  ;;  %v1637_v28 = vpop.permute.xlu0 %1636  ;;  %v2998_v11 = vcombine.high %v2997_v57, %v2997_v57  ;;  %v2964_v32 = vrot.slane %v2954_v4, %v6208_v10  ;;  %v2956_v34 = vcombine.high %v2954_v4, %v2954_v4  ;;  %v5561_v57 = vld [vmem:[%s7246_s8] sm:$0xff]  }
0x167b   : > { %1648 = vst.msk [vmem:[#allocation3 + $0x6] sm:$0x1] %vm1368_vm6, %v1637_v28  ;;  %5281 = vmatprep.subr.bf16.mxu1 %v5561_v57 }
0x167c   : > { %2141 = vrot.lane.b32.xlu0 %v2132_v12, %s5823_s20  ;;  %v2410_v12 = vrot.slane %v2397_v7, %v6208_v10  ;;  %v3012_v27 = vrot.slane %v2998_v11, %v6564_v41  ;;  %5282 = vmatpush3.bf16.msra.mxu1 %v5561_v57 }
0x167d   : > { %v1359_v30 = vpop.permute.xlu1 %1358 }
0x167e   : > { %1370 = vst.msk [vmem:[#allocation3 + $0xf] sm:$0x1] %vm1368_vm6, %v1359_v30  ;;  %v1858_v6 = vpop.permute.xlu0 %1857 }
0x167f   : > { %1869 = vst.msk [vmem:[#allocation3 + $0x2] sm:$0x1] %vm1309_vm5, %v1858_v6  ;;  %v2468_v6 = vrot.slane %v2455_v17, %v6208_v10 }
0x1680   : > { %2198 = vrot.lane.b32.xlu0 %v2189_v23, %s5825_s29  ;;  %v2677_v23 = vcombine.high %v6755_v47, %v6755_v47 }
0x1681   : > { %v1582_v13 = vpop.permute.xlu1 %1581 }
0x1682   : > { %v5668_v44 = vpop.eup %5667  ;;  %1592 = vst.msk [vmem:[#allocation3 + $0x9] sm:$0x1] %vm1309_vm5, %v1582_v13  ;;  %v1916_v40 = vpop.permute.xlu0 %1915  ;;  %v2398_v13 = vcombine.high %v6767_v51, %v6767_v51  ;;  %v2735_v51 = vcombine.high %v6812_v25, %v6812_v25 }
0x1683   : > { %1927 = vst.msk [vmem:[#allocation3 + $0x5] sm:$0x1] %vm1368_vm6, %v1916_v40  ;;  %3207 = vrot.lane.b32.xlu1 %v5668_v44, %s5825_s29  ;;  %v3022_v44 = vrot.slane %v3012_v27, %v6208_v10  ;;  %v2690_v40 = vrot.slane %v2677_v23, %v6208_v10 }
0x1684   : > { %2415 = vrot.lane.b32.xlu0 %v2402_v37, %s5823_s20  ;;  %v2414_v9 = vrot.slane %v2398_v13, %v6208_v10  ;;  %v2751_v52 = vrot.slane %v2735_v51, %v6208_v10 }
0x1685   : > { %v1639_v14 = vpop.permute.xlu1 %1638 }
0x1686   : > { %1649 = vst.msk [vmem:[#allocation3 + $0xe] sm:$0x1] %vm1368_vm6, %v1639_v14  ;;  %v2138_v15 = vpop.permute.xlu0 %2137  ;;  %v2456_v14 = vcombine.high %v6785_v56, %v6785_v56 }
0x1687   : > { %2149 = vst.msk [vmem:[#allocation3 + $0x3] sm:$0x1] %vm1309_vm5, %v2138_v15  ;;  %2143 = vrot.lane.b32.xlu1 %v2136_v16, %s5823_s20  ;;  %v2955_v16 = vcombine.high %v6788_v24, %v6788_v24  ;;  %v2678_v15 = vcombine.high %v6800_v60, %v6800_v60 }
0x1688   : > { %2473 = vrot.lane.b32.xlu0 %v2460_v49, %s5825_s29  ;;  %v2472_v48 = vrot.slane %v2456_v14, %v6208_v10 }
0x1689   : > { %v1860_v46 = vpop.permute.xlu1 %1859  ;;  %v2968_v49 = vrot.slane %v2955_v16, %v6208_v10 }
0x168a   : > { %1870 = vst.msk [vmem:[#allocation3 + $0xa] sm:$0x1] %vm1309_vm5, %v1860_v46  ;;  %v2195_v20 = vpop.permute.xlu0 %2194 }
0x168b   : > { %2206 = vst.msk [vmem:[#allocation3 + $0x4] sm:$0x1] %vm1368_vm6, %v2195_v20  ;;  %2200 = vrot.lane.b32.xlu1 %v2193_v38, %s5825_s29  ;;  %v2694_v38 = vrot.slane %v2678_v15, %v6208_v10  ;;  %v2972_v20 = vrot.slane %v2956_v34, %v6208_v10 }
0x168c   : > { %2695 = vrot.lane.b32.xlu0 %v2682_v53, %s5823_s20  ;;  %v3014_v53 = vcombine.high %v3012_v27, %v3012_v27 }
0x168d   : > { %v1918_v55 = vpop.permute.xlu1 %1917 }
0x168e   : > { %1928 = vst.msk [vmem:[#allocation3 + $0xd] sm:$0x1] %vm1368_vm6, %v1918_v55  ;;  %v1302_v35 = vpop.permute.xlu0 %1301  ;;  %v3030_v54 = vrot.slane %v3014_v53, %v6208_v10 }
0x168f   : > { %1312 = vst.msk [vmem:[#allocation3 + $0x10] sm:$0x1] %vm1309_vm5, %v1302_v35  ;;  %2417 = vrot.lane.b32.xlu1 %v2406_v45, %s5823_s20 }
0x1690   : > { %2752 = vrot.lane.b32.xlu0 %v2739_v18, %s5825_s29 }
0x1691   : > { %v2140_v58 = vpop.permute.xlu1 %2139 }
0x1692   : > { %2150 = vst.msk [vmem:[#allocation3 + $0xb] sm:$0x1] %vm1309_vm5, %v2140_v58  ;;  %v1361_v63 = vpop.permute.xlu0 %1360 }
0x1693   : > { %1371 = vst.msk [vmem:[#allocation3 + $0x17] sm:$0x1] %vm1368_vm6, %v1361_v63  ;;  %2475 = vrot.lane.b32.xlu1 %v2464_v59, %s5825_s29 }
0x1694   : > { %2973 = vrot.lane.b32.xlu0 %v2960_v61, %s5823_s20 }
0x1695   : > { %v2197_v1 = vpop.permute.xlu1 %2196 }
0x1696   : > { %2207 = vst.msk [vmem:[#allocation3 + $0xc] sm:$0x1] %vm1368_vm6, %v2197_v1  ;;  %v1584_v39 = vpop.permute.xlu0 %1583 }
0x1697   : > { %1593 = vst.msk [vmem:[#allocation3 + $0x11] sm:$0x1] %vm1309_vm5, %v1584_v39  ;;  %2697 = vrot.lane.b32.xlu1 %v2686_v2, %s5823_s20  ;;  %v5563_v2 = vld [vmem:[%s7246_s8 + $0x10] sm:$0xff]   ;;  %v5564_v39 = vld [vmem:[%s7246_s8 + $0x18] sm:$0xff]  }
0x1698   : > { %3031 = vrot.lane.b32.xlu0 %v3018_v8, %s5825_s29 }
0x1699   : > { %v1304_v22 = vpop.permute.xlu1 %1303 }
0x169a   : > { %1313 = vst.msk [vmem:[#allocation3 + $0x18] sm:$0x1] %vm1309_vm5, %v1304_v22  ;;  %v1641_v28 = vpop.permute.xlu0 %1640 }
0x169b   : > { %1650 = vst.msk [vmem:[#allocation3 + $0x16] sm:$0x1] %vm1368_vm6, %v1641_v28  ;;  %2754 = vrot.lane.b32.xlu1 %v2743_v5, %s5825_s29 }
0x169c   : > { %2419 = vrot.lane.b32.xlu0 %v2410_v12, %s5823_s20 }
0x169d   : > { %v1363_v30 = vpop.permute.xlu1 %1362 }
0x169e   : > { %1372 = vst.msk [vmem:[#allocation3 + $0x1f] sm:$0x1] %vm1368_vm6, %v1363_v30  ;;  %v1862_v29 = vpop.permute.xlu0 %1861 }
0x169f   : > { %1871 = vst.msk [vmem:[#allocation3 + $0x12] sm:$0x1] %vm1309_vm5, %v1862_v29  ;;  %2975 = vrot.lane.b32.xlu1 %v2964_v32, %s5823_s20 }
0x16a0   : > { %2477 = vrot.lane.b32.xlu0 %v2468_v6, %s5825_s29 }
0x16a1   : > { %v1586_v43 = vpop.permute.xlu1 %1585 }
0x16a2   : > { %1594 = vst.msk [vmem:[#allocation3 + $0x19] sm:$0x1] %vm1309_vm5, %v1586_v43  ;;  %v1920_v31 = vpop.permute.xlu0 %1919 }
0x16a3   : > { %1929 = vst.msk [vmem:[#allocation3 + $0x15] sm:$0x1] %vm1368_vm6, %v1920_v31  ;;  %3033 = vrot.lane.b32.xlu1 %v3022_v44, %s5825_s29 }
0x16a4   : > { %2699 = vrot.lane.b32.xlu0 %v2690_v40, %s5823_s20 }
0x16a5   : > { %v1643_v37 = vpop.permute.xlu1 %1642 }
0x16a6   : > { %1651 = vst.msk [vmem:[#allocation3 + $0x1e] sm:$0x1] %vm1368_vm6, %v1643_v37 }
0x16a7   : > { %2421 = vrot.lane.b32.xlu1 %v2414_v9, %s5823_s20 }
0x16a8   : > { %2756 = vrot.lane.b32.xlu0 %v2747_v19, %s5825_s29 }
0x16a9   : > { %v1864_v47 = vpop.permute.xlu1 %1863 }
0x16aa   : > { %1872 = vst.msk [vmem:[#allocation3 + $0x1a] sm:$0x1] %vm1309_vm5, %v1864_v47 }
0x16ab   : > { %2479 = vrot.lane.b32.xlu1 %v2472_v48, %s5825_s29 }
0x16ac   : > { %2977 = vrot.lane.b32.xlu0 %v2968_v49, %s5823_s20 }
0x16ad   : > { %v1922_v46 = vpop.permute.xlu1 %1921 }
0x16ae   : > { %1930 = vst.msk [vmem:[#allocation3 + $0x1d] sm:$0x1] %vm1368_vm6, %v1922_v46 }
0x16af   : > { %2701 = vrot.lane.b32.xlu1 %v2694_v38, %s5823_s20 }
0x16b0   : > { %3035 = vrot.lane.b32.xlu0 %v3026_v42, %s5825_s29 }
0x16b3   : > { %2758 = vrot.lane.b32.xlu1 %v2751_v52, %s5825_s29 }
0x16b7   : > { %2979 = vrot.lane.b32.xlu1 %v2972_v20, %s5823_s20 }
0x16bb   : > { %3037 = vrot.lane.b32.xlu1 %v3030_v54, %s5825_s29 }
0x16ea   : > { %v3128_v55 = vpop.permute.xlu0 %3127 }
0x16eb   : > { %v3130_v45 = vmul.f32 %v3128_v55, %v6553_v26  ;;  %v5562_v26 = vld [vmem:[%s7246_s8 + $0x8] sm:$0xff]  }
0x16ec   : > { %5283 = vmatprep.subr.bf16.mxu1 %v5562_v26 }
0x16ed   : > { %v3212_v56 = vcombine.high %v3130_v45, %v3130_v45  ;;  %5284 = vmatpush3.bf16.msra.mxu1 %v5562_v26 }
0x16ee   : > { %v2142_v24 = vpop.permute.xlu0 %2141  ;;  %5285 = vmatprep.subr.bf16.mxu1 %v5563_v2 }
0x16ef   : > { %v3219_v35 = vrot.slane %v3212_v56, %v6564_v41  ;;  %2151 = vst.msk [vmem:[#allocation3 + $0x13] sm:$0x1] %vm1309_vm5, %v2142_v24 }
0x16f1   : > { %v3220_v18 = vcombine.high %v3219_v35, %v3219_v35  ;;  %v3227_v21 = vrot.slane %v3219_v35, %v6564_v41  ;;  %5286 = vmatpush3.bf16.msra.mxu1 %v5563_v2 }
0x16f2   : > { %v2199_v58 = vpop.permute.xlu0 %2198  ;;  %5287 = vmatprep.subr.bf16.mxu1 %v5564_v39 }
0x16f3   : > { %v3234_v59 = vrot.slane %v3220_v18, %v6564_v41  ;;  %v3235_v60 = vcombine.high %v3227_v21, %v3227_v21  ;;  %v3240_v61 = vrot.slane %v3227_v21, %v6208_v10  ;;  %2208 = vst.msk [vmem:[#allocation3 + $0x14] sm:$0x1] %vm1368_vm6, %v2199_v58 }
0x16f5   : > { %v3236_v62 = vcombine.high %v3234_v59, %v3234_v59  ;;  %3253 = vrot.lane.b32.xlu0 %v3240_v61, %s5823_s20  ;;  %v3208_v63 = vpop.permute.xlu1 %3207  ;;  %v3244_v25 = vrot.slane %v3234_v59, %v6208_v10  ;;  %v3248_v7 = vrot.slane %v3235_v60, %v6208_v10  ;;  %5288 = vmatpush3.bf16.msra.mxu1 %v5564_v39  ;;  %v5565_v59 = vld [vmem:[%s7248_s10] sm:$0xff]   ;;  %v5566_v60 = vld [vmem:[%s7248_s10 + $0x8] sm:$0xff]   ;;  %v5567_v61 = vld [vmem:[%s7248_s10 + $0x10] sm:$0xff]  }
0x16f6   : > { %v3210_v0 = vmul.f32 %v3208_v63, %v6559_v33  ;;  %v2416_v1 = vpop.permute.xlu0 %2415  ;;  %5305 = vmatprep.subr.bf16.mxu1 %v5821_v3  ;;  %5293 = vmatprep.subr.bf16.mxu0 %v5565_v59  ;;  %v5001_v63 = vld [vmem:[%s7247_s9] ss:$0 sm:$0xff] }
0x16f7   : > { %2427 = vst.msk [vmem:[#allocation3 + $0x4] sm:$0x1] %vm1309_vm5, %v2416_v1  ;;  %3255 = vrot.lane.b32.xlu1 %v3244_v25, %s5823_s20  ;;  %v3252_v4 = vrot.slane %v3236_v62, %v6208_v10  ;;  %5294 = vmatpush3.bf16.msra.mxu0 %v5565_v59  ;;  %v5568_v62 = vld [vmem:[%s7248_s10 + $0x18] sm:$0xff]  }
0x16f8   : > { %v3276_v8 = vrot.slane %v3210_v0, %v6564_v41  ;;  %5295 = vmatprep.subr.bf16.mxu0 %v5566_v60 }
0x16f9   : > { %3257 = vrot.lane.b32.xlu0 %v3248_v7, %s5823_s20  ;;  %v2144_v33 = vpop.permute.xlu1 %2143 }
0x16fa   : > { %v3277_v11 = vcombine.high %v3276_v8, %v3276_v8  ;;  %v3284_v22 = vrot.slane %v3276_v8, %v6564_v41  ;;  %2152 = vst.msk [vmem:[#allocation3 + $0x1b] sm:$0x1] %vm1309_vm5, %v2144_v33  ;;  %v2474_v5 = vpop.permute.xlu0 %2473 }
0x16fb   : > { %2485 = vst.msk [vmem:[#allocation3 + $0x3] sm:$0x1] %vm1368_vm6, %v2474_v5  ;;  %3259 = vrot.lane.b32.xlu1 %v3252_v4, %s5823_s20  ;;  %5296 = vmatpush3.bf16.msra.mxu0 %v5566_v60 }
0x16fc   : > { %v3291_v28 = vrot.slane %v3277_v11, %v6564_v41  ;;  %v3292_v12 = vcombine.high %v3284_v22, %v3284_v22  ;;  %v3297_v17 = vrot.slane %v3284_v22, %v6208_v10  ;;  %5297 = vmatprep.subr.bf16.mxu0 %v5567_v61 }
0x16fd   : > { %v2201_v30 = vpop.permute.xlu1 %2200 }
0x16fe   : > { %v3293_v32 = vcombine.high %v3291_v28, %v3291_v28  ;;  %2209 = vst.msk [vmem:[#allocation3 + $0x1c] sm:$0x1] %vm1368_vm6, %v2201_v30  ;;  %v2696_v27 = vpop.permute.xlu0 %2695  ;;  %3310 = vrot.lane.b32.xlu0 %v3297_v17, %s5825_s29  ;;  %v3301_v29 = vrot.slane %v3291_v28, %v6208_v10  ;;  %v3305_v41 = vrot.slane %v3292_v12, %v6208_v10 }
0x16ff   : > { %2707 = vst.msk [vmem:[#allocation3 + $0x5] sm:$0x1] %vm1309_vm5, %v2696_v27  ;;  %5298 = vmatpush3.bf16.msra.mxu0 %v5567_v61 }
0x1700   : > { %3312 = vrot.lane.b32.xlu1 %v3301_v29, %s5825_s29  ;;  %v3309_v13 = vrot.slane %v3293_v32, %v6208_v10  ;;  %5299 = vmatprep.subr.bf16.mxu0 %v5568_v62  ;;  %v5010_v32 = vld [vmem:[%s7249_s11] ss:$0 sm:$0xff] }
0x1701   : > { %v2418_v6 = vpop.permute.xlu1 %2417 }
0x1702   : > { %2428 = vst.msk [vmem:[#allocation3 + $0xc] sm:$0x1] %vm1309_vm5, %v2418_v6  ;;  %v2753_v23 = vpop.permute.xlu0 %2752  ;;  %3314 = vrot.lane.b32.xlu0 %v3305_v41, %s5825_s29 }
0x1703   : > { %2764 = vst.msk [vmem:[#allocation3 + $0x2] sm:$0x1] %vm1368_vm6, %v2753_v23  ;;  %5300 = vmatpush3.bf16.msra.mxu0 %v5568_v62 }
0x1704   : > { %3316 = vrot.lane.b32.xlu1 %v3309_v13, %s5825_s29  ;;  %5311 = vmatprep.subr.bf16.mxu0 %v5821_v3  ;;  %s583_s29 = sand.u32 1, %s5810_s25  }
0x1705   : > { %v2476_v43 = vpop.permute.xlu1 %2475  ;;  %s4889_s30 = sshll.u32 %s583_s29, 2  ;;  %s4775_s28 = scalar_lea.sflag [#allocation5], %s583_s29 }
0x1706   : > { %2486 = vst.msk [vmem:[#allocation3 + $0xb] sm:$0x1] %vm1368_vm6, %v2476_v43  ;;  %v2974_v44 = vpop.permute.xlu0 %2973  ;;  %s585_s24 = scalar_lea.vmem [#allocation7], %s4889_s30 }
0x1707   : > { %2985 = vst.msk [vmem:[#allocation3 + $0x6] sm:$0x1] %vm1309_vm5, %v2974_v44  ;;  %s4788_s19 = sshll.u32 %s585_s24, 4  ;;  %s7198_s19 = int_to_ptr.vmem [resolvable:$true] %s4788_s19 }
0x1708   : > { %s5752_s26 = scalar_lea.vmem %s7198_s19, 64 }
0x1709   : > { %v2698_v36 = vpop.permute.xlu1 %2697  ;;  %p5753_p10 = scmp.ne.s32.totalorder %s7198_s19, %s5752_s26 }
0x170a   : > { %2708 = vst.msk [vmem:[#allocation3 + $0xd] sm:$0x1] %vm1309_vm5, %v2698_v36  ;;  %v3032_v31 = vpop.permute.xlu0 %3031 }
0x170b   : > { %3043 = vst.msk [vmem:[#allocation3 + $0x1] sm:$0x1] %vm1368_vm6, %v3032_v31  ;;  %p5754_p11 = pnand %p5753_p10, %p5957_p5 }
0x170d   : > { %v2755_v40 = vpop.permute.xlu1 %2754  ;;  %p5755_p12 = pneg %p5754_p11 }
0x170e   : > { %2765 = vst.msk [vmem:[#allocation3 + $0xa] sm:$0x1] %vm1368_vm6, %v2755_v40  ;;  %v2420_v10 = vpop.permute.xlu0 %2419 }
0x170f   : > { %2429 = vst.msk [vmem:[#allocation3 + $0x14] sm:$0x1] %vm1309_vm5, %v2420_v10 }
0x1711   : > { %v2976_v37 = vpop.permute.xlu1 %2975 }
0x1712   : > { %2986 = vst.msk [vmem:[#allocation3 + $0xe] sm:$0x1] %vm1309_vm5, %v2976_v37  ;;  %v2478_v9 = vpop.permute.xlu0 %2477 }
0x1713   : > { %2487 = vst.msk [vmem:[#allocation3 + $0x13] sm:$0x1] %vm1368_vm6, %v2478_v9 }
0x1715   : > { %v3034_v14 = vpop.permute.xlu1 %3033 }
0x1716   : > { %3044 = vst.msk [vmem:[#allocation3 + $0x9] sm:$0x1] %vm1368_vm6, %v3034_v14  ;;  %v2700_v16 = vpop.permute.xlu0 %2699 }
0x1717   : > { %2709 = vst.msk [vmem:[#allocation3 + $0x15] sm:$0x1] %vm1309_vm5, %v2700_v16 }
0x1719   : > { %v2422_v19 = vpop.permute.xlu1 %2421 }
0x171a   : > { %2430 = vst.msk [vmem:[#allocation3 + $0x1c] sm:$0x1] %vm1309_vm5, %v2422_v19  ;;  %v2757_v47 = vpop.permute.xlu0 %2756 }
0x171b   : > { %2766 = vst.msk [vmem:[#allocation3 + $0x12] sm:$0x1] %vm1368_vm6, %v2757_v47 }
0x171d   : > { %v2480_v48 = vpop.permute.xlu1 %2479 }
0x171e   : > { %2488 = vst.msk [vmem:[#allocation3 + $0x1b] sm:$0x1] %vm1368_vm6, %v2480_v48  ;;  %v2978_v15 = vpop.permute.xlu0 %2977 }
0x171f   : > { %2987 = vst.msk [vmem:[#allocation3 + $0x16] sm:$0x1] %vm1309_vm5, %v2978_v15 }
0x1721   : > { %v2702_v49 = vpop.permute.xlu1 %2701 }
0x1722   : > { %2710 = vst.msk [vmem:[#allocation3 + $0x1d] sm:$0x1] %vm1309_vm5, %v2702_v49  ;;  %v3036_v50 = vpop.permute.xlu0 %3035 }
0x1723   : > { %3045 = vst.msk [vmem:[#allocation3 + $0x11] sm:$0x1] %vm1368_vm6, %v3036_v50 }
0x1725   : > { %v2759_v46 = vpop.permute.xlu1 %2758 }
0x1726   : > { %2767 = vst.msk [vmem:[#allocation3 + $0x1a] sm:$0x1] %vm1368_vm6, %v2759_v46 }
0x1729   : > { %v2980_v38 = vpop.permute.xlu1 %2979 }
0x172a   : > { %2988 = vst.msk [vmem:[#allocation3 + $0x1e] sm:$0x1] %vm1309_vm5, %v2980_v38 }
0x172d   : > { %v3038_v51 = vpop.permute.xlu1 %3037 }
0x172e   : > { %3046 = vst.msk [vmem:[#allocation3 + $0x19] sm:$0x1] %vm1368_vm6, %v3038_v51 }
0x1767   : > { %v3254_v42 = vpop.permute.xlu0 %3253 }
0x1768   : > { %3265 = vst.msk [vmem:[#allocation3 + $0x7] sm:$0x1] %vm1309_vm5, %v3254_v42 }
0x1769   : > { %v3256_v34 = vpop.permute.xlu1 %3255 }
0x176a   : > { %3266 = vst.msk [vmem:[#allocation3 + $0xf] sm:$0x1] %vm1309_vm5, %v3256_v34 }
0x176b   : > { %v3258_v52 = vpop.permute.xlu0 %3257 }
0x176c   : > { %3267 = vst.msk [vmem:[#allocation3 + $0x17] sm:$0x1] %vm1309_vm5, %v3258_v52 }
0x176d   : > { %v3260_v20 = vpop.permute.xlu1 %3259 }
0x176e   : > { %3268 = vst.msk [vmem:[#allocation3 + $0x1f] sm:$0x1] %vm1309_vm5, %v3260_v20 }
0x1770   : > { %v3311_v53 = vpop.permute.xlu0 %3310 }
0x1771   : > { %3322 = vst.msk [vmem:[#allocation3] sm:$0x1] %vm1368_vm6, %v3311_v53 }
0x1772   : > { %v3313_v54 = vpop.permute.xlu1 %3312 }
0x1773   : > { %3323 = vst.msk [vmem:[#allocation3 + $0x8] sm:$0x1] %vm1368_vm6, %v3313_v54 }
0x1774   : > { %v3315_v55 = vpop.permute.xlu0 %3314 }
0x1775   : > { %3324 = vst.msk [vmem:[#allocation3 + $0x10] sm:$0x1] %vm1368_vm6, %v3315_v55 }
0x1776   : > { %v3317_v45 = vpop.permute.xlu1 %3316 }
0x1777   : > { %3325 = vst.msk [vmem:[#allocation3 + $0x18] sm:$0x1] %vm1368_vm6, %v3317_v45 }
0x1778   : > { %v3326_v56 = vld [vmem:[#allocation3] sm:$0xff] }
0x1779   : > { %v6961_v35 = vpack.c.bf16 %v3326_v56, %v3326_v56 }
0x177a   : > { %v3327_v24 = vld [vmem:[#allocation3 + $0x8] sm:$0xff] }
0x177b   : > { %v6957_v57 = vpack.c.bf16 %v3327_v24, %v3326_v56  ;;  %v6975_v26 = vsel %vm3639_vm8, %v6961_v35, 0  ;;  %v6997_v12 = vpack.c.bf16 %v3327_v24, %v3327_v24 }
0x177c   : > { %v6963_v18 = vld [vmem:[#allocation3 + $0x10] sm:$0xff] }
0x177d   : > { %5289 = vmatprep.mubr.msk.bf16.mxu1 %vm3383_vm7, %v6957_v57  ;;  %v7003_v30 = vsel %vm3639_vm8, %v6997_v12, 0 }
0x177e   : > { %v6965_v21 = vld [vmem:[#allocation3 + $0x18] sm:$0xff] }
0x177f   : > { %v6969_v58 = vpack.c.bf16 %v6965_v21, %v6963_v18 }
0x1781   : > { %5290 = vmatmul.mubr.msk.bf16.vlgmr.msra.gmra.mrb[56].mxu1 %vm3383_vm7, %v6969_v58 }
0x1782   : > { %5306 = vmatpush3.bf16.msra.mxu1 %v6975_v26  ;;  %5307 = vmatprep.mubr.msk.bf16.mxu1 %vm5822_vm0, %v5821_v3 }
0x1783   : > { %5317 = vmatprep.subr.bf16.mxu1 %v5821_v3 }
0x1854   : > { %v5291_v25 = vpop.f32.mrb[56].mxu1 }
0x1855   : > { %v3433_v0 = vadd.f32 %v5291_v25, %v5001_v63  ;;  %v3424_v1 = vpop.f32.mrb[57].mxu1 }
0x1856   : > { %v3425_v2 = vadd.f32 %v5001_v63, %v3424_v1  ;;  %v5292_v7 = vpop.f32.mrb[58].mxu1 }
0x1857   : > { %5669 = vtanh.f32 %v3433_v0  ;;  %v3436_v39 = vadd.f32 %v5292_v7, %v5001_v63  ;;  %v3427_v8 = vpop.f32.mrb[59].mxu1 }
0x1858   : > { %5671 = vtanh.f32 %v3425_v2  ;;  %v3428_v33 = vadd.f32 %v5001_v63, %v3427_v8 }
0x1859   : > { %5673 = vtanh.f32 %v3436_v39 }
0x185a   : > { %5675 = vtanh.f32 %v3428_v33 }
0x1861   : > { %v5670_v4 = vpop.eup %5669 }
0x1862   : > { %v5672_v11 = vpop.eup %5671 }
0x1863   : > { %v5674_v22 = vpop.eup %5673 }
0x1864   : > { %v5676_v5 = vpop.eup %5675  ;;  %v3444_v28 = vpack.c.bf16 %v5674_v22, %v5670_v4 }
0x1865   : > { %v3443_v17 = vpack.c.bf16 %v5676_v5, %v5672_v11 }
0x1867   : > { %5301 = vmatprep.mubr.msk.bf16.mxu0 %vm3383_vm7, %v3443_v17 }
0x1868   : > { %5302 = vmatmul.mubr.msk.bf16.vlgmr.msra.gmra.mrb[16].mxu0 %vm3383_vm7, %v3444_v28 }
0x1869   : > { %5312 = vmatpush3.bf16.msra.mxu0 %v7003_v30  ;;  %5313 = vmatprep.mubr.msk.bf16.mxu0 %vm5822_vm0, %v5821_v3 }
0x186a   : > { %5323 = vmatprep.subr.bf16.mxu0 %v5821_v3 }
0x193b   : > { %v5303_v27 = vpop.f32.mrb[16].mxu0 }
0x193c   : > { %v3533_v29 = vadd.f32 %v5303_v27, %v5010_v32  ;;  %v3524_v41 = vpop.f32.mrb[17].mxu0 }
0x193d   : > { %v3525_v6 = vadd.f32 %v5010_v32, %v3524_v41  ;;  %v5304_v23 = vpop.f32.mrb[18].mxu0 }
0x193e   : > { %v3554_v13 = vsel %vm3539_vm9, %v3533_v29, -inf  ;;  %v3536_v43 = vadd.f32 %v5304_v23, %v5010_v32  ;;  %v3527_v44 = vpop.f32.mrb[19].mxu0 }
0x193f   : > { %v3555_v36 = vrot.slane %v3554_v13, 4  ;;  %v3540_v31 = vsel %vm3539_vm9, %v3525_v6, -inf  ;;  %v3528_v40 = vadd.f32 %v5010_v32, %v3527_v44 }
0x1940   : > { %v3541_v10 = vrot.slane %v3540_v31, 4  ;;  %v3561_v37 = vsel %vm3539_vm9, %v3536_v43, -inf }
0x1941   : > { %v3556_v9 = vmax.f32 %v3554_v13, %v3555_v36  ;;  %v3547_v14 = vsel %vm3539_vm9, %v3528_v40, -inf  ;;  %v3562_v19 = vrot.slane %v3561_v37, 4 }
0x1942   : > { %v3542_v16 = vmax.f32 %v3540_v31, %v3541_v10  ;;  %v3548_v48 = vrot.slane %v3547_v14, 4 }
0x1943   : > { %v3557_v47 = vrot.slane %v3556_v9, 2  ;;  %v3563_v46 = vmax.f32 %v3561_v37, %v3562_v19 }
0x1944   : > { %v3543_v15 = vrot.slane %v3542_v16, 2  ;;  %v3549_v51 = vmax.f32 %v3547_v14, %v3548_v48 }
0x1945   : > { %v3558_v49 = vmax.f32 %v3556_v9, %v3557_v47  ;;  %v3564_v20 = vrot.slane %v3563_v46, 2 }
0x1946   : > { %v3544_v50 = vmax.f32 %v3542_v16, %v3543_v15  ;;  %v3550_v54 = vrot.slane %v3549_v51, 2 }
0x1947   : > { %v3559_v38 = vrot.slane %v3558_v49, 1  ;;  %v3565_v24 = vmax.f32 %v3563_v46, %v3564_v20 }
0x1948   : > { %v3545_v42 = vrot.slane %v3544_v50, 1  ;;  %v3551_v59 = vmax.f32 %v3549_v51, %v3550_v54 }
0x1949   : > { %v3560_v34 = vmax.f32 %v3558_v49, %v3559_v38  ;;  %v3566_v60 = vrot.slane %v3565_v24, 1 }
0x194a   : > { %v3546_v52 = vmax.f32 %v3544_v50, %v3545_v42  ;;  %v3552_v61 = vrot.slane %v3551_v59, 1 }
0x194b   : > { %v3570_v53 = vsub.f32 %v3533_v29, %v3560_v34  ;;  %v3567_v62 = vmax.f32 %v3565_v24, %v3566_v60 }
0x194c   : > { %v3568_v55 = vsub.f32 %v3525_v6, %v3546_v52  ;;  %v3553_v63 = vmax.f32 %v3551_v59, %v3552_v61  ;;  %v3869_v59 = vld [vmem:[%s7245_s7] sm:$0xf]  ;;  %v3333_v61 = vpack.c.bf16 %v6965_v21, %v6965_v21 }
0x194d   : > { %v3576_v45 = vmul.f32 1.442695, %v3570_v53  ;;  %v3571_v2 = vsub.f32 %v3536_v43, %v3567_v62 }
0x194e   : > { %v3572_v56 = vmul.f32 1.442695, %v3568_v55  ;;  %v3569_v8 = vsub.f32 %v3528_v40, %v3553_v63 }
0x194f   : > { %5677 = vpow2.f32 %v3576_v45  ;;  %v3578_v22 = vmul.f32 1.442695, %v3571_v2 }
0x1950   : > { %5679 = vpow2.f32 %v3572_v56  ;;  %v3574_v28 = vmul.f32 1.442695, %v3569_v8  ;;  %v3332_v56 = vpack.c.bf16 %v6963_v18, %v6963_v18 }
0x1951   : > { %5681 = vpow2.f32 %v3578_v22 }
0x1952   : > { %5683 = vpow2.f32 %v3574_v28  ;;  %v7036_v60 = vsel %vm3639_vm8, %v3332_v56, 0 }
0x1959   : > { %v5678_v25 = vpop.eup %5677 }
0x195a   : > { %v5680_v0 = vpop.eup %5679  ;;  %v3594_v1 = vsel %vm3539_vm9, %v5678_v25, 0.0 }
0x195b   : > { %v3595_v7 = vrot.slane %v3594_v1, 4  ;;  %v3580_v39 = vsel %vm3539_vm9, %v5680_v0, 0.0  ;;  %v5682_v13 = vpop.eup %5681 }
0x195c   : > { %v3581_v33 = vrot.slane %v3580_v39, 4  ;;  %v5684_v43 = vpop.eup %5683  ;;  %v3601_v44 = vsel %vm3539_vm9, %v5682_v13, 0.0 }
0x195d   : > { %v3596_v4 = vadd.f32 %v3595_v7, %v3594_v1  ;;  %v3587_v36 = vsel %vm3539_vm9, %v5684_v43, 0.0  ;;  %v3602_v10 = vrot.slane %v3601_v44, 4 }
0x195e   : > { %v3582_v11 = vadd.f32 %v3581_v33, %v3580_v39  ;;  %v3588_v9 = vrot.slane %v3587_v36, 4 }
0x195f   : > { %v3597_v5 = vrot.slane %v3596_v4, 2  ;;  %v3603_v47 = vadd.f32 %v3602_v10, %v3601_v44 }
0x1960   : > { %v3583_v17 = vrot.slane %v3582_v11, 2  ;;  %v3589_v48 = vadd.f32 %v3588_v9, %v3587_v36 }
0x1961   : > { %v3598_v32 = vadd.f32 %v3597_v5, %v3596_v4  ;;  %v3604_v15 = vrot.slane %v3603_v47, 2 }
0x1962   : > { %v3584_v27 = vadd.f32 %v3583_v17, %v3582_v11  ;;  %v3590_v49 = vrot.slane %v3589_v48, 2 }
0x1963   : > { %v3599_v29 = vrot.slane %v3598_v32, 1  ;;  %v3605_v50 = vadd.f32 %v3604_v15, %v3603_v47 }
0x1964   : > { %v3585_v41 = vrot.slane %v3584_v27, 1  ;;  %v3591_v46 = vadd.f32 %v3590_v49, %v3589_v48 }
0x1965   : > { %v3600_v6 = vadd.f32 %v3599_v29, %v3598_v32  ;;  %v3606_v38 = vrot.slane %v3605_v50, 1  ;;  %v7081_v29 = vld [vmem:[%s7251_s13] ss:$0 sm:$0xff] }
0x1966   : > { %v3586_v23 = vadd.f32 %v3585_v41, %v3584_v27  ;;  %v3592_v51 = vrot.slane %v3591_v46, 1 }
0x1967   : > { %5685 = vrcp.f32 %v3600_v6  ;;  %v3607_v42 = vadd.f32 %v3606_v38, %v3605_v50 }
0x1968   : > { %5687 = vrcp.f32 %v3586_v23  ;;  %v3593_v34 = vadd.f32 %v3592_v51, %v3591_v46 }
0x1969   : > { %5689 = vrcp.f32 %v3607_v42 }
0x196a   : > { %5691 = vrcp.f32 %v3593_v34 }
0x1971   : > { %v5686_v31 = vpop.eup %5685 }
0x1972   : > { %v5688_v40 = vpop.eup %5687  ;;  %v3613_v37 = vmul.f32 %v5686_v31, %v5678_v25 }
0x1973   : > { %v3609_v14 = vmul.f32 %v5688_v40, %v5680_v0  ;;  %v5690_v52 = vpop.eup %5689 }
0x1974   : > { %v3618_v16 = vpack.c.bf16 %v3613_v37, %v3613_v37  ;;  %v5692_v20 = vpop.eup %5691  ;;  %v3615_v53 = vmul.f32 %v5690_v52, %v5682_v13 }
0x1975   : > { %v3616_v19 = vpack.c.bf16 %v3609_v14, %v3609_v14  ;;  %v3611_v54 = vmul.f32 %v5692_v20, %v5684_v43 }
0x1976   : > { %3745 = vxpose.xlu1.c.b16.start.end [1/1] (short) (narrow) %v3618_v16, 16  ;;  %v3619_v55 = vpack.c.bf16 %v3615_v53, %v3615_v53 }
0x1977   : > { %3620 = vxpose.xlu0.c.b16.start.end [1/1] (short) (narrow) %v3616_v19, 16  ;;  %v3617_v45 = vpack.c.bf16 %v3611_v54, %v3611_v54 }
0x197a   : > { %3928 = vrot.lane.b32.xlu1 %v6969_v58, %s5827_s2 }
0x1980   : > { %3926 = vrot.lane.b32.xlu0 %v6957_v57, %s5827_s2 }
0x199d   : > { %3807 = vxpose.xlu1.c.b16.start.end [1/1] (short) (narrow) %v3619_v55, 16 }
0x199e   : > { %3683 = vxpose.xlu0.c.b16.start.end [1/1] (short) (narrow) %v3617_v45, 16 }
0x19a1   : > { %4309 = vrot.lane.b32.xlu1 %v6997_v12, %s5827_s2 }
0x19a5   : > { %4373 = vrot.lane.b32.xlu1 %v3332_v56, %s5827_s2 }
0x19a7   : > { %4245 = vrot.lane.b32.xlu0 %v6961_v35, %s5827_s2  ;;  %v3875_v35 = vsel %vm1086_vm1, %v3869_v59, 0 }
0x19dc   : > { %v3753_v18 = vpop.trf.xlu1 }
0x19dd   : > { %v3628_v24 = vpop.trf.xlu0 }
0x19de   : > { %5308 = vmatmul.mubr.msk.bf16.vlgmr.msra.gmra.mrb[60].mxu1 %vm3539_vm9, %v3628_v24 }
0x19df   : > { %5318 = vmatpush3.bf16.msra.mxu1 %v7036_v60  ;;  %5319 = vmatprep.mubr.msk.bf16.mxu1 %vm5822_vm0, %v5821_v3 }
0x19e0   : > { %5417 = vmatprep.subr.msk.bf16.mxu1 %vm1086_vm1, %v3869_v59 }
0x19e6   : > { %5320 = vmatmul.mubr.msk.bf16.vlgmr.msra.gmra.mrb[64].mxu1 %vm3539_vm9, %v3753_v18 }
0x19e7   : > { %5331 = vmatprep.mubr.msk.bf16.mxu1 %vm1086_vm1, %v6957_v57  ;;  %v7057_v57 = vsel %vm3639_vm8, %v3333_v61, 0 }
0x19e8   : > { %5330 = vmatpush3.bf16.xpose.msra.mxu1 %v3875_v35 }
0x19e9   : > { %5341 = vmatprep.subr.bf16.mxu1 %v5821_v3 }
0x19ec   : > { %v3929_v63 = vpop.permute.xlu1 %3928 }
0x19ef   : > { %5332 = vmatmul.mubr.msk.bf16.vlgmr.msra.gmra.mrb[68].mxu1 %vm1086_vm1, %v6969_v58 }
0x19f0   : > { %5342 = vmatpush3.bf16.msra.mxu1 %v6975_v26  ;;  %5343 = vmatprep.mubr.msk.bf16.mxu1 %vm5822_vm0, %v5821_v3 }
0x19f1   : > { %5353 = vmatprep.subr.bf16.mxu1 %v5821_v3 }
0x19f2   : > { %v3927_v12 = vpop.permute.xlu0 %3926 }
0x1a03   : > { %v3815_v58 = vpop.trf.xlu1 }
0x1a04   : > { %v3691_v62 = vpop.trf.xlu0 }
0x1a05   : > { %5314 = vmatmul.mubr.msk.bf16.vlgmr.msra.gmra.mrb[20].mxu0 %vm3539_vm9, %v3691_v62 }
0x1a06   : > { %5324 = vmatpush3.bf16.msra.mxu0 %v7057_v57  ;;  %5325 = vmatprep.mubr.msk.bf16.mxu0 %vm5822_vm0, %v5821_v3 }
0x1a07   : > { %5418 = vmatprep.subr.msk.bf16.mxu0 %vm1086_vm1, %v3869_v59 }
0x1a0d   : > { %5326 = vmatmul.mubr.msk.bf16.vlgmr.msra.gmra.mrb[24].mxu0 %vm3539_vm9, %v3815_v58 }
0x1a0e   : > { %5337 = vmatprep.mubr.msk.bf16.mxu0 %vm1086_vm1, %v3927_v12 }
0x1a0f   : > { %5336 = vmatpush3.bf16.xpose.msra.mxu0 %v3875_v35 }
0x1a10   : > { %5347 = vmatprep.subr.bf16.mxu0 %v5821_v3 }
0x1a13   : > { %v4310_v19 = vpop.permute.xlu1 %4309 }
0x1a14   : > { %v4315_v46 = vsel %vm3639_vm8, %v4310_v19, 0 }
0x1a16   : > { %5338 = vmatmul.mubr.msk.bf16.vlgmr.msra.gmra.mrb[28].mxu0 %vm1086_vm1, %v3929_v63 }
0x1a17   : > { %5348 = vmatpush3.bf16.msra.mxu0 %v7003_v30  ;;  %5349 = vmatprep.mubr.msk.bf16.mxu0 %vm5822_vm0, %v5821_v3  ;;  %v4374_v48 = vpop.permute.xlu1 %4373 }
0x1a18   : > { %5359 = vmatprep.subr.bf16.mxu0 %v5821_v3  ;;  %v4379_v54 = vsel %vm3639_vm8, %v4374_v48, 0 }
0x1a19   : > { %v4246_v47 = vpop.permute.xlu0 %4245 }
0x1a1a   : > { %v4251_v34 = vsel %vm3639_vm8, %v4246_v47, 0 }
0x1ab1   : > { %v7071_v21 = vpop.f32.mrb[60].mxu1 }
0x1ab2   : > { %v5309_v26 = vpop.f32.mrb[61].mxu1 }
0x1ab3   : > { %v3680_v25 = vpop.f32.mrb[62].mxu1 }
0x1ab4   : > { %v5310_v0 = vpop.f32.mrb[63].mxu1 }
0x1ab9   : > { %v7073_v1 = vpop.f32.mrb[64].mxu1 }
0x1aba   : > { %v5321_v2 = vpop.f32.mrb[65].mxu1 }
0x1abb   : > { %v3804_v7 = vpop.f32.mrb[66].mxu1 }
0x1abc   : > { %v5322_v39 = vpop.f32.mrb[67].mxu1 }
0x1ac2   : > { %v5333_v8 = vpop.f32.mrb[68].mxu1 }
0x1ac3   : > { %v3911_v33 = vpop.f32.mrb[69].mxu1  ;;  %v3987_v31 = vpack.c.bf16 %v5333_v8, %v5333_v8 }
0x1ac4   : > { %v3985_v4 = vpack.c.bf16 %v3911_v33, %v3911_v33  ;;  %v5334_v11 = vpop.f32.mrb[70].mxu1 }
0x1ac5   : > { %v3914_v30 = vpop.f32.mrb[71].mxu1  ;;  %v3988_v5 = vpack.c.bf16 %v5334_v11, %v5334_v11 }
0x1ac6   : > { %v3986_v22 = vpack.c.bf16 %v3914_v30, %v3914_v30  ;;  %3989 = vxpose.xlu0.c.b16.start.end [1/1] (short) (narrow) %v3985_v4, 16 }
0x1ac8   : > { %4048 = vxpose.xlu1.c.b16.start.end [1/1] (short) (narrow) %v3986_v22, 16 }
0x1acc   : > { %4166 = vxpose.xlu1.c.b16.start.end [1/1] (short) (narrow) %v3988_v5, 16 }
0x1acf   : > { %4437 = vrot.lane.b32.xlu0 %v3333_v61, %s5827_s2  ;;  %s5039_s2 = sld [smem:[#allocation4 + $0x1]] }
0x1ad8   : > { %v7076_v28 = vpop.f32.mrb[20].mxu0 }
0x1ad9   : > { %v5315_v17 = vpop.f32.mrb[21].mxu0 }
0x1ada   : > { %v3742_v32 = vpop.f32.mrb[22].mxu0 }
0x1adb   : > { %v5316_v27 = vpop.f32.mrb[23].mxu0 }
0x1ae0   : > { %v7083_v41 = vpop.f32.mrb[24].mxu0 }
0x1ae1   : > { %v7087_v6 = vmul.f32 %v7081_v29, %v7083_v41  ;;  %v5327_v23 = vpop.f32.mrb[25].mxu0 }
0x1ae2   : > { %v3866_v13 = vpop.f32.mrb[26].mxu0 }
0x1ae3   : > { %v5328_v43 = vpop.f32.mrb[27].mxu0 }
0x1ae9   : > { %v5339_v44 = vpop.f32.mrb[28].mxu0 }
0x1aea   : > { %v3970_v36 = vpop.f32.mrb[29].mxu0  ;;  %v4227_v14 = vpack.c.bf16 %v5339_v44, %v5339_v44  ;;  %v4566_v44 = vmul.f32 %v7081_v29, %v7076_v28 }
0x1aeb   : > { %v4225_v40 = vpack.c.bf16 %v3970_v36, %v3970_v36  ;;  %v5340_v10 = vpop.f32.mrb[30].mxu0  ;;  %v4567_v36 = vmul.f32 %v7081_v29, %v7073_v1 }
0x1aec   : > { %v3973_v37 = vpop.f32.mrb[31].mxu0  ;;  %v4228_v16 = vpack.c.bf16 %v5340_v10, %v5340_v10  ;;  %v4565_v10 = vmul.f32 %v7081_v29, %v7071_v21 }
0x1aed   : > { %4107 = vxpose.xlu0.c.b16.start.end [1/1] (short) (narrow) %v3987_v31, 16  ;;  %4229 = vxpose.xlu1.c.b16.start.end [1/1] (short) (narrow) %v4225_v40, 16  ;;  %v4226_v9 = vpack.c.bf16 %v3973_v37, %v3973_v37  ;;  %v4572_v31 = vsel %vm3383_vm7, %v4566_v44, 0.0  ;;  %v4575_v40 = vsel %vm3383_vm7, %v4567_v36, 0.0 }
0x1aee   : > { %v4569_v37 = vsel %vm3383_vm7, %v4565_v10, 0.0 }
0x1af1   : > { %4293 = vxpose.xlu1.c.b16.start.end [1/1] (short) (narrow) %v4226_v9, 16  ;;  %v5033_v9 = vld [vmem:[%s7250_s12] ss:$0 sm:$0xff] }
0x1af5   : > { %4357 = vxpose.xlu1.c.b16.start.end [1/1] (short) (narrow) %v4227_v14, 16 }
0x1af9   : > { %4421 = vxpose.xlu1.c.b16.start.end [1/1] (short) (narrow) %v4228_v16, 16 }
0x1b2c   : > { %v3997_v15 = vpop.trf.xlu0 }
0x1b2d   : > { %5344 = vmatmul.mubr.msk.bf16.vlgmr.msra.gmra.mrb[72].mxu1 %vm3539_vm9, %v3997_v15 }
0x1b2e   : > { %5354 = vmatpush3.bf16.msra.mxu1 %v7036_v60  ;;  %v4056_v49 = vpop.trf.xlu1  ;;  %5355 = vmatprep.mubr.msk.bf16.mxu1 %vm5822_vm0, %v5821_v3 }
0x1b2f   : > { %5350 = vmatmul.mubr.msk.bf16.vlgmr.msra.gmra.mrb[32].mxu0 %vm3539_vm9, %v4056_v49  ;;  %5365 = vmatprep.subr.bf16.mxu1 %v5821_v3 }
0x1b30   : > { %5360 = vmatpush3.bf16.msra.mxu0 %v7057_v57  ;;  %5361 = vmatprep.mubr.msk.bf16.mxu0 %vm5822_vm0, %v5821_v3 }
0x1b31   : > { %5371 = vmatprep.subr.bf16.mxu0 %v5821_v3 }
0x1b32   : > { %v4174_v50 = vpop.trf.xlu1 }
0x1b37   : > { %5362 = vmatmul.mubr.msk.bf16.vlgmr.msra.gmra.mrb[36].mxu0 %vm3539_vm9, %v4174_v50 }
0x1b38   : > { %5372 = vmatpush3.bf16.msra.mxu0 %v4315_v46  ;;  %5373 = vmatprep.mubr.msk.bf16.mxu0 %vm5822_vm0, %v5821_v3 }
0x1b39   : > { %5383 = vmatprep.subr.bf16.mxu0 %v5821_v3 }
0x1b41   : > { %v4438_v38 = vpop.permute.xlu0 %4437 }
0x1b42   : > { %v4443_v20 = vsel %vm3639_vm8, %v4438_v38, 0 }
0x1b53   : > { %v4115_v51 = vpop.trf.xlu0  ;;  %v4237_v42 = vpop.trf.xlu1 }
0x1b54   : > { %5356 = vmatmul.mubr.msk.bf16.vlgmr.msra.gmra.mrb[76].mxu1 %vm3539_vm9, %v4115_v51 }
0x1b55   : > { %5366 = vmatpush3.bf16.msra.mxu1 %v4251_v34  ;;  %5367 = vmatprep.mubr.msk.bf16.mxu1 %vm5822_vm0, %v5821_v3 }
0x1b56   : > { %5377 = vmatprep.subr.bf16.mxu1 %v5821_v3 }
0x1b57   : > { %v4301_v52 = vpop.trf.xlu1 }
0x1b58   : > { %5374 = vmatmul.mubr.msk.bf16.vlgmr.msra.gmra.mrb[40].mxu0 %vm3539_vm9, %v4301_v52 }
0x1b59   : > { %5384 = vmatpush3.bf16.msra.mxu0 %v4443_v20  ;;  %5385 = vmatprep.mubr.msk.bf16.mxu0 %vm5822_vm0, %v5821_v3  ;;  %v4578_v20 = vsel %vm3383_vm7, %v7087_v6, 0.0  ;;  %v5571_v6 = vld [vmem:[%s7253_s15 + $0x10] sm:$0xff]  }
0x1b5b   : > { %v4365_v53 = vpop.trf.xlu1 }
0x1b5c   : > { %5368 = vmatmul.mubr.msk.bf16.vlgmr.msra.gmra.mrb[80].mxu1 %vm3539_vm9, %v4237_v42 }
0x1b5d   : > { %5378 = vmatpush3.bf16.msra.mxu1 %v4379_v54  ;;  %5379 = vmatprep.mubr.msk.bf16.mxu1 %vm5822_vm0, %v5821_v3  ;;  %v5569_v54 = vld [vmem:[%s7253_s15] sm:$0xff]  }
0x1b5e   : > { %5389 = vmatprep.subr.bf16.mxu1 %v5821_v3 }
0x1b5f   : > { %v4429_v55 = vpop.trf.xlu1 }
0x1b60   : > { %5386 = vmatmul.mubr.msk.bf16.vlgmr.msra.gmra.mrb[44].mxu0 %vm3539_vm9, %v4429_v55  ;;  %v5570_v55 = vld [vmem:[%s7253_s15 + $0x8] sm:$0xff]  }
0x1b64   : > { %5380 = vmatmul.mubr.msk.bf16.vlgmr.msra.gmra.mrb[84].mxu1 %vm3539_vm9, %v4365_v53 }
0x1b65   : > { %5397 = vmatprep.mubr.msk.bf16.mxu1 %vm5822_vm0, %v5821_v3  ;;  %5390 = vmatpush3.bf16.msra.mxu1 %v5569_v54 }
0x1b66   : > { %5391 = vmatprep.subr.bf16.mxu1 %v5821_v3 }
0x1b69   : > { %5392 = vmatpush3.bf16.msra.mxu1 %v5570_v55 }
0x1b6a   : > { %5393 = vmatprep.subr.bf16.mxu1 %v5821_v3 }
0x1b6d   : > { %5394 = vmatpush3.bf16.msra.mxu1 %v5571_v6 }
0x1b6e   : > { %5395 = vmatprep.subr.bf16.mxu1 %v5821_v3 }
0x1c00   : > { %v4042_v45 = vpop.f32.mrb[72].mxu1 }
0x1c01   : > { %v5345_v56 = vpop.f32.mrb[73].mxu1 }
0x1c02   : > { %v4045_v24 = vpop.f32.mrb[74].mxu1  ;;  %v4101_v59 = vpop.f32.mrb[32].mxu0 }
0x1c03   : > { %v5346_v60 = vpop.f32.mrb[75].mxu1  ;;  %v5351_v18 = vpop.f32.mrb[33].mxu0  ;;  %v4582_v24 = vstv %s5039_s2  ;;  %s5756_s2 = sshll.u32 %s5828_s18, 4  ;;  %s5757_s2 = int_to_ptr.vmem [resolvable:$false] %s5756_s2 }
0x1c04   : > { %v4104_v35 = vpop.f32.mrb[34].mxu0  ;;  %p5759_p13 = scmp.lt.s32.totalorder %s7198_s19, %s5757_s2 }
0x1c05   : > { %v5352_v12 = vpop.f32.mrb[35].mxu0 }
0x1c0a   : > { %v4219_v61 = vpop.f32.mrb[36].mxu0 }
0x1c0b   : > { %v5363_v62 = vpop.f32.mrb[37].mxu0 }
0x1c0c   : > { %v4222_v57 = vpop.f32.mrb[38].mxu0 }
0x1c0d   : > { %v5364_v63 = vpop.f32.mrb[39].mxu0 }
0x1c27   : > { %v4160_v58 = vpop.f32.mrb[76].mxu1 }
0x1c28   : > { %v5357_v26 = vpop.f32.mrb[77].mxu1 }
0x1c29   : > { %v4163_v25 = vpop.f32.mrb[78].mxu1 }
0x1c2a   : > { %v5358_v0 = vpop.f32.mrb[79].mxu1 }
0x1c2b   : > { %v4351_v2 = vpop.f32.mrb[40].mxu0 }
0x1c2c   : > { %v5375_v7 = vpop.f32.mrb[41].mxu0 }
0x1c2d   : > { %v4354_v39 = vpop.f32.mrb[42].mxu0 }
0x1c2e   : > { %v5376_v8 = vpop.f32.mrb[43].mxu0 }
0x1c2f   : > { %v4287_v33 = vpop.f32.mrb[80].mxu1 }
0x1c30   : > { %v5369_v4 = vpop.f32.mrb[81].mxu1  ;;  %4489 = vrot.lane.b32.xlu1 %v4287_v33, %s5823_s20 }
0x1c31   : > { %v4290_v11 = vpop.f32.mrb[82].mxu1 }
0x1c32   : > { %v5370_v30 = vpop.f32.mrb[83].mxu1 }
0x1c33   : > { %v4479_v22 = vpop.f32.mrb[44].mxu0 }
0x1c34   : > { %4491 = vrot.lane.b32.xlu1 %v4351_v2, %s5823_s20  ;;  %4495 = vrot.lane.b32.xlu0 %v4479_v22, %s5823_s20  ;;  %v5387_v5 = vpop.f32.mrb[45].mxu0 }
0x1c35   : > { %v4482_v17 = vpop.f32.mrb[46].mxu0 }
0x1c36   : > { %v5388_v32 = vpop.f32.mrb[47].mxu0 }
0x1c37   : > { %v4415_v27 = vpop.f32.mrb[84].mxu1 }
0x1c38   : > { %v5381_v23 = vpop.f32.mrb[85].mxu1  ;;  %4493 = vrot.lane.b32.xlu1 %v4415_v27, %s5823_s20 }
0x1c39   : > { %v4418_v13 = vpop.f32.mrb[86].mxu1 }
0x1c3a   : > { %v5382_v43 = vpop.f32.mrb[87].mxu1 }
0x1c53   : > { %4573 = vadd.xlane.f32.xlu0 %v4572_v31 }
0x1c57   : > { %4576 = vadd.xlane.f32.xlu0 %v4575_v40 }
0x1c5c   : > { %4570 = vadd.xlane.f32.xlu1 %v4569_v37 }
0x1ca2   : > { %v4490_v14 = vpop.permute.xlu1 %4489 }
0x1ca3   : > { %v7139_v16 = vsel %vm1086_vm1, %v4042_v45, %v4490_v14  ;;  %v5572_v45 = vld [vmem:[%s7253_s15 + $0x18] sm:$0xff]  }
0x1ca4   : > { %v4512_v19 = vmul.f32 %v5033_v9, %v7139_v16  ;;  %5396 = vmatpush3.bf16.msra.mxu1 %v5572_v45 }
0x1ca6   : > { %v4492_v47 = vpop.permute.xlu1 %4491  ;;  %v4516_v48 = vsel %vm3383_vm7, %v4512_v19, 0.0  ;;  %v4496_v49 = vpop.permute.xlu0 %4495 }
0x1ca7   : > { %v7144_v15 = vsel %vm1086_vm1, %v4101_v59, %v4492_v47  ;;  %4517 = vadd.xlane.f32.xlu1 %v4516_v48  ;;  %v7149_v38 = vsel %vm1086_vm1, %v4219_v61, %v4496_v49  ;;  %v4529_v61 = vstv %s4528_s14  ;;  %s5758_s14 = scalar_lea.vmem %s5757_s2, 128 }
0x1ca8   : > { %v4513_v29 = vmul.f32 %v5033_v9, %v7144_v15  ;;  %v4515_v34 = vmul.f32 %v5033_v9, %v7149_v38  ;;  %p5760_p0 = scmp.lt.s32.totalorder %s5758_s14, %s5752_s26 }
0x1caa   : > { %v4494_v50 = vpop.permute.xlu1 %4493  ;;  %v4519_v46 = vsel %vm3383_vm7, %v4513_v29, 0.0  ;;  %v4525_v53 = vsel %vm3383_vm7, %v4515_v34, 0.0  ;;  %p5761_p1 = por %p5760_p0, %p5759_p13 }
0x1cab   : > { %v7152_v51 = vsel %vm1086_vm1, %v4160_v58, %v4494_v50  ;;  %4520 = vadd.xlane.f32.xlu0 %v4519_v46 }
0x1cac   : > { %v4514_v42 = vmul.f32 %v5033_v9, %v7152_v51  ;;  %p5762_p2 = pnand %p5761_p1, %p5755_p12 }
0x1cae   : > { %v4522_v52 = vsel %vm3383_vm7, %v4514_v42, 0.0 }
0x1caf   : > { %4523 = vadd.xlane.f32.xlu1 %v4522_v52  ;;  %4579 = vadd.xlane.f32.xlu0 %v4578_v20 }
0x1cb3   : > { %4526 = vadd.xlane.f32.xlu1 %v4525_v53 }
0x1ce0   : > { %v4574_v59 = vpop.xlane.xlu0 %4573 }
0x1ce1   : > { %v4584_v35 = vadd.f32 %v4582_v24, %v4574_v59 }
0x1ce3   : > { %v5041_v62 = vmul.f32 -1.442695, %v4584_v35 }
0x1ce4   : > { %v4577_v12 = vpop.xlane.xlu0 %4576 }
0x1ce5   : > { %v4585_v57 = vadd.f32 %v4582_v24, %v4577_v12 }
0x1ce7   : > { %v5042_v25 = vmul.f32 -1.442695, %v4585_v57 }
0x1ce9   : > { %v4571_v56 = vpop.xlane.xlu1 %4570 }
0x1cea   : > { %v4583_v60 = vadd.f32 %v4582_v24, %v4571_v56 }
0x1cec   : > { %v5040_v18 = vmul.f32 -1.442695, %v4583_v60 }
0x1cee   : > { %5693 = vpow2.f32 %v5040_v18 }
0x1cef   : > { %5695 = vpow2.f32 %v5041_v62 }
0x1cf8   : > { %v5694_v8 = vpop.eup %5693 }
0x1cf9   : > { %v4599_v22 = vadd.f32 1.0, %v5694_v8  ;;  %v5696_v32 = vpop.eup %5695 }
0x1cfa   : > { %v4600_v43 = vadd.f32 1.0, %v5696_v32 }
0x1d34   : > { %v4518_v63 = vpop.xlane.xlu1 %4517 }
0x1d35   : > { %v4530_v58 = vadd.f32 %v4529_v61, %v4518_v63 }
0x1d37   : > { %v5034_v26 = vmul.f32 -1.442695, %v4530_v58 }
0x1d38   : > { %v4521_v3 = vpop.xlane.xlu0 %4520 }
0x1d39   : > { %5697 = vpow2.f32 %v5034_v26  ;;  %v4531_v0 = vadd.f32 %v4529_v61, %v4521_v3 }
0x1d3a   : > { %5699 = vpow2.f32 %v5042_v25 }
0x1d3b   : > { %v5035_v2 = vmul.f32 -1.442695, %v4531_v0 }
0x1d3c   : > { %v4524_v7 = vpop.xlane.xlu1 %4523  ;;  %v4580_v39 = vpop.xlane.xlu0 %4579 }
0x1d3d   : > { %5701 = vpow2.f32 %v5035_v2  ;;  %v4532_v33 = vadd.f32 %v4529_v61, %v4524_v7  ;;  %v4586_v4 = vadd.f32 %v4582_v24, %v4580_v39 }
0x1d3f   : > { %v5036_v11 = vmul.f32 -1.442695, %v4532_v33  ;;  %v5043_v30 = vmul.f32 -1.442695, %v4586_v4 }
0x1d40   : > { %v4527_v5 = vpop.xlane.xlu1 %4526 }
0x1d41   : > { %5703 = vpow2.f32 %v5036_v11  ;;  %v4533_v17 = vadd.f32 %v4529_v61, %v4527_v5 }
0x1d42   : > { %5705 = vpow2.f32 %v5043_v30 }
0x1d43   : > { %v5698_v27 = vpop.eup %5697  ;;  %v5037_v23 = vmul.f32 -1.442695, %v4533_v17  ;;  %5707 = vrcp.f32 %v4599_v22 }
0x1d44   : > { %v4546_v13 = vadd.f32 1.0, %v5698_v27  ;;  %v5700_v44 = vpop.eup %5699 }
0x1d45   : > { %5709 = vpow2.f32 %v5037_v23  ;;  %v4601_v40 = vadd.f32 1.0, %v5700_v44 }
0x1d46   : > { %5711 = vrcp.f32 %v4546_v13 }
0x1d47   : > { %v5702_v36 = vpop.eup %5701  ;;  %5713 = vrcp.f32 %v4600_v43 }
0x1d48   : > { %v4547_v31 = vadd.f32 1.0, %v5702_v36 }
0x1d4a   : > { %5715 = vrcp.f32 %v4547_v31 }
0x1d4b   : > { %v5704_v10 = vpop.eup %5703  ;;  %5717 = vrcp.f32 %v4601_v40 }
0x1d4c   : > { %v5706_v37 = vpop.eup %5705  ;;  %v4548_v9 = vadd.f32 1.0, %v5704_v10 }
0x1d4d   : > { %v4602_v14 = vadd.f32 1.0, %v5706_v37  ;;  %v5708_v19 = vpop.eup %5707 }
0x1d4e   : > { %5719 = vrcp.f32 %v4548_v9 }
0x1d4f   : > { %v5710_v47 = vpop.eup %5709  ;;  %5721 = vrcp.f32 %v4602_v14 }
0x1d50   : > { %v5712_v48 = vpop.eup %5711  ;;  %v4549_v29 = vadd.f32 1.0, %v5710_v47 }
0x1d51   : > { %v4611_v49 = vadd.f32 %v5712_v48, %v5708_v19  ;;  %v5714_v50 = vpop.eup %5713 }
0x1d52   : > { %5723 = vrcp.f32 %v4549_v29 }
0x1d53   : > { %5725 = vrcp.f32 %v4611_v49 }
0x1d54   : > { %v5716_v46 = vpop.eup %5715 }
0x1d55   : > { %v4612_v42 = vadd.f32 %v5716_v46, %v5714_v50  ;;  %v5718_v34 = vpop.eup %5717 }
0x1d57   : > { %5727 = vrcp.f32 %v4612_v42 }
0x1d58   : > { %v5720_v52 = vpop.eup %5719 }
0x1d59   : > { %v4613_v20 = vadd.f32 %v5720_v52, %v5718_v34  ;;  %v5722_v53 = vpop.eup %5721 }
0x1d5b   : > { %5729 = vrcp.f32 %v4613_v20 }
0x1d5c   : > { %v5724_v54 = vpop.eup %5723 }
0x1d5d   : > { %v5726_v55 = vpop.eup %5725  ;;  %v4614_v6 = vadd.f32 %v5724_v54, %v5722_v53 }
0x1d5e   : > { %v4616_v45 = vmul.f32 %v5726_v55, %v5712_v48 }
0x1d5f   : > { %5731 = vrcp.f32 %v4614_v6 }
0x1d60   : > { %v4627_v56 = vsub.f32 1.0, %v4616_v45  ;;  %v4623_v59 = vmul.f32 %v4616_v45, %v7139_v16 }
0x1d61   : > { %v5728_v24 = vpop.eup %5727 }
0x1d62   : > { %v4631_v60 = vmul.f32 %v4627_v56, %v7071_v21  ;;  %v4618_v18 = vmul.f32 %v5728_v24, %v5716_v46 }
0x1d64   : > { %v4635_v35 = vadd.f32 %v4631_v60, %v4623_v59  ;;  %v4628_v12 = vsub.f32 1.0, %v4618_v18  ;;  %v4624_v57 = vmul.f32 %v4618_v18, %v7144_v15  ;;  %v5044_v59 = vld [vmem:[%s7254_s16] ss:$0 sm:$0xff] }
0x1d65   : > { %v5730_v61 = vpop.eup %5729 }
0x1d66   : > { %v4639_v62 = vsel %vm3383_vm7, %v4635_v35, 0.0  ;;  %v4632_v63 = vmul.f32 %v4628_v12, %v7076_v28  ;;  %v4620_v58 = vmul.f32 %v5730_v61, %v5720_v52 }
0x1d67   : > { %v4640_v26 = vrot.slane %v4639_v62, 4 }
0x1d68   : > { %v4636_v25 = vadd.f32 %v4632_v63, %v4624_v57  ;;  %v4629_v3 = vsub.f32 1.0, %v4620_v58  ;;  %v4625_v21 = vmul.f32 %v4620_v58, %v7152_v51 }
0x1d69   : > { %v5732_v0 = vpop.eup %5731  ;;  %v4641_v2 = vadd.f32 %v4640_v26, %v4639_v62 }
0x1d6a   : > { %v4646_v16 = vsel %vm3383_vm7, %v4636_v25, 0.0  ;;  %v4633_v7 = vmul.f32 %v4629_v3, %v7073_v1  ;;  %v4622_v39 = vmul.f32 %v5732_v0, %v5724_v54 }
0x1d6b   : > { %v4642_v8 = vrot.slane %v4641_v2, 2  ;;  %v4647_v33 = vrot.slane %v4646_v16, 4 }
0x1d6c   : > { %v4637_v4 = vadd.f32 %v4633_v7, %v4625_v21  ;;  %v4630_v11 = vsub.f32 1.0, %v4622_v39  ;;  %v4626_v22 = vmul.f32 %v4622_v39, %v7149_v38 }
0x1d6d   : > { %v4648_v15 = vadd.f32 %v4647_v33, %v4646_v16  ;;  %v4643_v30 = vadd.f32 %v4642_v8, %v4641_v2 }
0x1d6e   : > { %v4653_v28 = vsel %vm3383_vm7, %v4637_v4, 0.0  ;;  %v4634_v5 = vmul.f32 %v4630_v11, %v7083_v41 }
0x1d6f   : > { %v4649_v17 = vrot.slane %v4648_v15, 2  ;;  %v4654_v32 = vrot.slane %v4653_v28, 4  ;;  %v4644_v27 = vrot.slane %v4643_v30, 1 }
0x1d70   : > { %v4638_v23 = vadd.f32 %v4634_v5, %v4626_v22 }
0x1d71   : > { %v4655_v51 = vadd.f32 %v4654_v32, %v4653_v28  ;;  %v4645_v13 = vadd.f32 %v4644_v27, %v4643_v30  ;;  %v4650_v1 = vadd.f32 %v4649_v17, %v4648_v15 }
0x1d72   : > { %v4660_v43 = vsel %vm3383_vm7, %v4638_v23, 0.0 }
0x1d73   : > { %v4661_v44 = vrot.slane %v4660_v43, 4  ;;  %v4651_v36 = vrot.slane %v4650_v1, 1  ;;  %v4656_v31 = vrot.slane %v4655_v51, 2  ;;  %v4667_v40 = vmul.f32 0.125, %v4645_v13 }
0x1d75   : > { %v4652_v10 = vadd.f32 %v4651_v36, %v4650_v1  ;;  %v4657_v37 = vadd.f32 %v4656_v31, %v4655_v51  ;;  %v4662_v9 = vadd.f32 %v4661_v44, %v4660_v43  ;;  %v4671_v41 = vpack.c.bf16 %v4667_v40, %v4667_v40 }
0x1d77   : > { %v4658_v14 = vrot.slane %v4657_v37, 1  ;;  %v4663_v38 = vrot.slane %v4662_v9, 2  ;;  %v4668_v19 = vmul.f32 0.125, %v4652_v10  ;;  %v4694_v46 = vunpack.c.l.b16 %v4671_v41 }
0x1d79   : > { %v4659_v47 = vadd.f32 %v4658_v14, %v4657_v37  ;;  %v4664_v48 = vadd.f32 %v4663_v38, %v4662_v9  ;;  %v4672_v29 = vpack.c.bf16 %v4668_v19, %v4668_v19 }
0x1d7b   : > { %v4665_v49 = vrot.slane %v4664_v48, 1  ;;  %v4669_v50 = vmul.f32 0.125, %v4659_v47  ;;  %v4695_v42 = vunpack.c.l.b16 %v4672_v29 }
0x1d7d   : > { %v4666_v34 = vadd.f32 %v4665_v49, %v4664_v48  ;;  %v4673_v52 = vpack.c.bf16 %v4669_v50, %v4669_v50  ;;  %v4699_v20 = vsel %vm4698_vm10, %v4695_v42, %v4694_v46 }
0x1d7f   : > { %v4670_v53 = vmul.f32 0.125, %v4666_v34  ;;  %v4696_v54 = vunpack.c.l.b16 %v4673_v52 }
0x1d81   : > { %v4674_v55 = vpack.c.bf16 %v4670_v53, %v4670_v53  ;;  %v4701_v6 = vsel %vm4700_vm11, %v4696_v54, %v4699_v20 }
0x1d83   : > { %v4697_v45 = vunpack.c.l.b16 %v4674_v55 }
0x1d85   : > { %v4703_v56 = vsel %vm4702_vm12, %v4697_v45, %v4701_v6 }
0x1d86   : > { %v4704_v24 = vpack.c.b16 %v4703_v56, %v4703_v56 }
0x1d88   : > { %5398 = vmatmul.mubr.msk.bf16.vlgmr.msra.gmra.mrb[88].mxu1 %vm3383_vm7, %v4704_v24 }
0x1e5b   : > { %v4766_v60 = vpop.f32.mrb[88].mxu1 }
0x1e5c   : > { %v4767_v18 = vadd.f32 %v5044_v59, %v4766_v60  ;;  %v5399_v35 = vpop.f32.mrb[89].mxu1 }
0x1e5d   : > { %v4769_v12 = vpop.f32.mrb[90].mxu1 }
0x1e5e   : > { %v5400_v61 = vpop.f32.mrb[91].mxu1  ;;  %4773 = vst.msk [vmem:[%s585_s24] sm:$0xf] %vm4772_vm13, %v4767_v18 }
0x1e5f   : > { %5765 = shalt.err (!%p5762_p2)
}
0x1e60   : > { %s5766_s29 = scalar_lea.hbm %s7196_s22, 64  ;;  %s5770_s20 = scalar_lea.hbm %s7283_s23, 128 }
0x1e61   : > { %p5767_p3 = scmp.ne.s32.totalorder %s7196_s22, %s5766_s29  ;;  %p5771_p8 = scmp.lt.u32.totalorder %s7196_s22, %s7283_s23 }
0x1e62   : > { %p5772_p9 = scmp.lt.u32.totalorder %s5770_s20, %s5766_s29  ;;  %p5774_p11 = scmp.lt.u32.totalorder %s5766_s29, %s7196_s22 }
0x1e63   : > { %p5768_p4 = pnand %p5767_p3, %p5957_p5 }
0x1e64   : > { %p5773_p10 = por %p5772_p9, %p5771_p8 }
0x1e65   : > { %p5769_p7 = pneg %p5768_p4 }
0x1e66   : > { %p5775_p12 = por %p5774_p11, %p5773_p10 }
0x1e68   : > { %p5776_p13 = pnand %p5775_p12, %p5769_p7 }
0x1e6a   : > { %5779 = shalt.err (!%p5776_p13)
}
0x1e6b   : > { %5424 = dma.vmem_to_hbm [thread:$0]  (%p5957_p5), %s7198_s19, 64, %s7196_s22, %s4775_s28  }
0x1e6c PF: > { %s7284_s27 = sld [smem:[#allocation12_spill]]  ;;  %s7285_s17 = sld [smem:[#allocation10_spill]] }
0x1e72   : > { %p5436_p0 = scmp.ge.s32.totalorder %s7284_s27, 2  ;;  %s4800_s18 = sand.u32 1, %s7285_s17  }
0x1e73   : > { %s4801_s2 = scalar_lea.sflag [#allocation5], %s4800_s18 }
0x1e74   : > { %p5431_p1 = pnand %p5436_p0, %p5961_p6 }
0x1e76   : > { %5801 = dma.done.wait (!%p5431_p1), %s4801_s2, 64  }
0x1e77   : > { %5803 = vsyncadd (!%p5431_p1), %s4801_s2, 4294967232  ;;  %s7287_s27 = sld [smem:[#allocation13_spill]]  ;;  %s7288_s14 = sld [smem:[#allocation11_spill]] }
0x1e78   : > { %s7289_s26 = sld [smem:[#allocation14_spill]]  ;;  %s7290_s24 = smov %s5810_s25 }
0x1e7d   : > { %p28_p2 = scmp.ge.s32.totalorder %s7287_s27, 4   ;;  %s7291_s25 = smov %s7288_s14 }
0x1e7f   :  { %30 = sbr.rel (!%p28_p2) target bundleno = 10 (0xa), region = 134 }
0x1e86   :  { %4806 = vsyncpa [#allocation5], 1 }
0x1e87   :  { %4808 = vsyncpa [#allocation5 + $0x1], 1 }
0x1e88   :  { %4809 = vsyncpa [#allocation6], 1 }
0x1e89   :  { %4811 = vsyncpa [#allocation6 + $0x1], 1 }

</bundles_post_ra>
